<compile_context>
chip_gen: v6e
topology: v6e:2x2x1
jax: 0.10.0
libtpu: 0.0.40
codegen_flags: <defaults>
</compile_context>

<pallas_src>
import math
import functools

import numpy as np
import jax
import jax.numpy as jnp
from jax.experimental import pallas as pl
from jax.experimental.pallas import tpu as pltpu

# ---------------- hyperparameters (consistent with ourCCT.__init__) -------------
DIM = 32
NUM_LAYERS = 2
NUM_HEADS = 4
IN_CHANNELS = 4
KERNEL_SIZE = (3, 3)          # used for Conv2d AND MaxPool2d (as in the module)
NUM_CLASSES = 10
MLP_RATIO = 2

CONV_OUT = DIM * 7 // 8       # 28
POS_DIM = DIM - CONV_OUT      # dim // 8 = 4
HEAD_DIM = DIM // NUM_HEADS   # 8
MLP_HID = DIM * MLP_RATIO     # 64
FC_PAD = 128                  # lane-dense classifier output width

# This build is specialized to 16x16 inputs (Conv 3x3 valid -> 14x14, MaxPool 3x3 -> 4x4).
IMG_HW = 16
HP = WP = (IMG_HW - KERNEL_SIZE[0] + 1) // KERNEL_SIZE[0]   # 4
N_TOKENS = HP * WP                                          # 16
KWC = IMG_HW * IN_CHANNELS                                  # 64 = image slab lane width

# ---------------- packed parameter slab layout (rows, 128 lanes, f32) -----------
R_CONV = 0                                 # 9 banded conv blocks, 64 rows each
R_PE = 9 * 64                              # 576: positional encoding (N_TOKENS rows)
R_LAYERS = R_PE + N_TOKENS                 # 592
L_LN, L_WQKV, L_BQKV, L_WO, L_BO = 0, 4, 36, 37, 69
L_W1, L_B1, L_W2, L_B2 = 70, 102, 103, 167
LAYER_ROWS = 168
R_POOLW = R_LAYERS + NUM_LAYERS * LAYER_ROWS   # 928
R_POOLB = R_POOLW + 1
R_FCW = R_POOLB + 1
R_FCB = R_FCW + DIM
SLAB_ROWS = ((R_FCB + 1 + 7) // 8) * 8         # 968


# =========================== the fused Pallas kernel ============================

def cct_fused_kernel(img_ref, slab_ref, o_ref, pool_scr, rmax_scr, tok_scr, *,
                     batch, num_heads, num_layers):
    """Whole ourCCT forward, fully VMEM-resident, single invocation (no grid).

    img_ref:  (batch*16 + 8, 64)  NHWC image slab, lane = x*C + c, zero row padding
    slab_ref: (968, 128)          packed parameters (layout constants above)
    o_ref:    (batch, 128)        padded logits (first NUM_CLASSES valid)
    pool_scr: (batch*16, 128)     conv+px-max result (row = b*16 + oy, lane = tx*32 + cout)
    rmax_scr: (batch*16, 128)     + py-max result
    tok_scr:  (batch*16, 32)      token activations (row = b*16 + ty*4 + tx)
    """
    D = DIM
    N = N_TOKENS
    BN = batch * N
    hd = D // num_heads
    scale = 1.0 / math.sqrt(hd)
    RU = batch * IMG_HW                     # conv rows computed (rows >= 12 per image unused)

    # ---- Conv2d(bias=False) as 9 banded matmuls + ReLU + MaxPool over px (tree) ----
    img_sh = [img_ref[dy:dy + RU, :] for dy in range(3)]          # dy-shifted views
    m = None
    for px in range(3):
        acc = None
        for dy in range(3):
            r0 = R_CONV + (dy * 3 + px) * KWC
            part = jnp.dot(img_sh[dy], slab_ref[r0:r0 + KWC, :],
                           preferred_element_type=jnp.float32)    # (RU, 128)
            acc = part if acc is None else acc + part
        acc = jnp.maximum(acc, 0.0)                               # ReLU
        m = acc if m is None else jnp.maximum(m, acc)             # max over pool column px
    pool_scr[0:RU, :] = m

    # ---- MaxPool over py (tree of 3 shifted row-slices) ----
    rmax = jnp.maximum(jnp.maximum(pool_scr[0:RU - 4, :], pool_scr[1:RU - 3, :]),
                       pool_scr[2:RU - 2, :])                     # rmax[r] = max(m[r..r+2])
    rmax_scr[0:RU - 4, :] = rmax

    # ---- token extraction: (row=b*16+oy, lane=tx*32+c) -> (row=b*16+ty*4+tx, lane=c) ----
    for b in range(batch):
        for ty in range(HP):
            src = b * IMG_HW + 3 * ty
            for tx in range(WP):
                dst = b * N + ty * WP + tx
                tok_scr[dst:dst + 1, :] = rmax_scr[src:src + 1, tx * D:(tx + 1) * D]

    # ---- sin/cos positional encoding "append" (pre-placed in the zero-padded cols) ----
    pe = slab_ref[R_PE:R_PE + N, 0:D]                             # (N, D)
    x = tok_scr[...] + jnp.concatenate([pe] * batch, axis=0)      # (BN, D)

    def layernorm(v, g, b_):
        mu = jnp.mean(v, axis=-1, keepdims=True)
        var = jnp.mean(jnp.square(v - mu), axis=-1, keepdims=True)
        return (v - mu) * jax.lax.rsqrt(var + 1e-5) * g + b_

    # ---- transformer encoder (pre-LN, MHA + GELU MLP), static unroll -------------
    for l in range(num_layers):
        base = R_LAYERS + l * LAYER_ROWS
        ln1_g = slab_ref[base + L_LN + 0:base + L_LN + 1, 0:D]
        ln1_b = slab_ref[base + L_LN + 1:base + L_LN + 2, 0:D]
        ln2_g = slab_ref[base + L_LN + 2:base + L_LN + 3, 0:D]
        ln2_b = slab_ref[base + L_LN + 3:base + L_LN + 4, 0:D]
        wqkv = slab_ref[base + L_WQKV:base + L_WQKV + D, 0:3 * D]
        bqkv = slab_ref[base + L_BQKV:base + L_BQKV + 1, 0:3 * D]
        wo = slab_ref[base + L_WO:base + L_WO + D, 0:D]
        bo = slab_ref[base + L_BO:base + L_BO + 1, 0:D]
        w1 = slab_ref[base + L_W1:base + L_W1 + D, 0:MLP_HID]
        b1 = slab_ref[base + L_B1:base + L_B1 + 1, 0:MLP_HID]
        w2 = slab_ref[base + L_W2:base + L_W2 + MLP_HID, 0:D]
        b2 = slab_ref[base + L_B2:base + L_B2 + 1, 0:D]

        # -- pre-LN multi-head self-attention with fused QKV projection --
        h = layernorm(x, ln1_g, ln1_b)
        qkv = jnp.dot(h, wqkv, preferred_element_type=jnp.float32) + bqkv   # (BN, 3D)

        heads = []
        for hh in range(num_heads):                  # static unroll (kept: robust lowering)
            qh = qkv[:, hh * hd:(hh + 1) * hd].reshape(batch, N, hd)
            kh = qkv[:, D + hh * hd:D + (hh + 1) * hd].reshape(batch, N, hd)
            vh = qkv[:, 2 * D + hh * hd:2 * D + (hh + 1) * hd].reshape(batch, N, hd)
            s = jax.lax.dot_general(qh, kh, (((2,), (2,)), ((0,), (0,))),
                                    preferred_element_type=jnp.float32) * scale
            s = s - jnp.max(s, axis=-1, keepdims=True)
            e = jnp.exp(s)
            prob = e / jnp.sum(e, axis=-1, keepdims=True)          # exact division
            ctx = jax.lax.dot_general(prob, vh, (((2,), (1,)), ((0,), (0,))),
                                      preferred_element_type=jnp.float32)   # (B, N, hd)
            heads.append(ctx.reshape(BN, hd))
        ctx = jnp.concatenate(heads, axis=-1)                      # (BN, D)
        attn = jnp.dot(ctx, wo, preferred_element_type=jnp.float32) + bo
        x = x + attn                                               # dropout/drop_path = id

        # -- MLP --
        h2 = layernorm(x, ln2_g, ln2_b)
        m1 = jnp.dot(h2, w1, preferred_element_type=jnp.float32) + b1
        # TODO(synk): tanh-approx GELU; exact erf may differ slightly from nn.GELU.
        m1 = 0.5 * m1 * (1.0 + jnp.tanh(0.7978845608028654 * (m1 + 0.044715 * m1 * m1 * m1)))
        m2 = jnp.dot(m1, w2, preferred_element_type=jnp.float32) + b2
        x = x + m2

    # ---- sequence pooling + classifier ----
    pool_w = slab_ref[R_POOLW:R_POOLW + 1, 0:D]                    # (1, D)
    pool_b = slab_ref[R_POOLB:R_POOLB + 1, 0:1]                    # (1, 1)
    fc_w = slab_ref[R_FCW:R_FCW + D, :]                            # (D, 128)
    fc_b = slab_ref[R_FCB:R_FCB + 1, :]                            # (1, 128)

    logits = jnp.sum(x * pool_w, axis=-1, keepdims=True) + pool_b  # (BN, 1)
    lg = logits.reshape(batch, N, 1)
    lg = lg - jnp.max(lg, axis=1, keepdims=True)
    e = jnp.exp(lg)
    gate = e / jnp.sum(e, axis=1, keepdims=True)                   # softmax over tokens
    aggr = jnp.sum(gate * x.reshape(batch, N, D), axis=1)          # (B, D)
    o_ref[...] = jnp.dot(aggr, fc_w, preferred_element_type=jnp.float32) + fc_b


# =========================== wrappers (glue) ====================================

def sincos_2d_pos_enc(N, pos_dim):
    """Exact numpy port of SinCos2DPositionalEncodingAppend (static, one-time)."""
    h = w = int(round(N ** 0.5))
    assert h * w == N
    y_pos = np.repeat(np.arange(h)[:, None], w, axis=1).astype(np.float32)
    x_pos = np.repeat(np.arange(w)[None, :], h, axis=0).astype(np.float32)
    dim_h = pos_dim // 2
    dim_w = pos_dim - dim_h
    div_h = np.exp(np.arange(0, dim_h, 2).astype(np.float32) * -(math.log(10000.0) / dim_h))
    div_w = np.exp(np.arange(0, dim_w, 2).astype(np.float32) * -(math.log(10000.0) / dim_w))
    pe = np.zeros((h, w, pos_dim), np.float32)
    for i in range(0, dim_h, 2):
        pe[:, :, i] = np.sin(y_pos * div_h[i // 2])
        if i + 1 < dim_h:
            pe[:, :, i + 1] = np.cos(y_pos * div_h[i // 2])
    for i in range(0, dim_w, 2):
        j = i + dim_h
        if j < pos_dim:
            pe[:, :, j] = np.sin(x_pos * div_w[i // 2])
            if j + 1 < pos_dim:
                pe[:, :, j + 1] = np.cos(x_pos * div_w[i // 2])
    return pe.reshape(N, pos_dim)


def pack_params(params):
    """One-time: pack ALL parameters into a single lane-dense (SLAB_ROWS, 128) slab."""
    slab = np.zeros((SLAB_ROWS, 128), np.float32)

    # Conv2d weight (Cout=28, Cin=4, 3, 3) -> 9 banded (64, 128) blocks.
    # blk[dy,px][x*4+c, tx*32+cout] = w[cout, c, dy, x-(3*tx+px)]  (zero outside the band,
    # cout padded 28->32 so the sin/cos positional encoding can be "appended" by add).
    w = np.asarray(params['conv_w'], np.float32)
    for dy in range(3):
        for px in range(3):
            blk = np.zeros((KWC, 128), np.float32)
            for tx in range(WP):
                for dx in range(3):
                    xpos = 3 * tx + px + dx
                    blk[xpos * IN_CHANNELS:(xpos + 1) * IN_CHANNELS,
                        tx * DIM:tx * DIM + CONV_OUT] = w[:, :, dy, dx].T
            r0 = R_CONV + (dy * 3 + px) * KWC
            slab[r0:r0 + KWC, :] = blk

    # positional encoding lives in the zero-padded conv columns 28..31
    slab[R_PE:R_PE + N_TOKENS, CONV_OUT:DIM] = sincos_2d_pos_enc(N_TOKENS, POS_DIM)

    for l, lp in enumerate(params['layers']):
        base = R_LAYERS + l * LAYER_ROWS
        slab[base + L_LN + 0, 0:DIM] = np.asarray(lp['ln1_g'])[0]
        slab[base + L_LN + 1, 0:DIM] = np.asarray(lp['ln1_b'])[0]
        slab[base + L_LN + 2, 0:DIM] = np.asarray(lp['ln2_g'])[0]
        slab[base + L_LN + 3, 0:DIM] = np.asarray(lp['ln2_b'])[0]
        slab[base + L_WQKV:base + L_WQKV + DIM, 0:3 * DIM] = np.concatenate(
            [np.asarray(lp['wq']), np.asarray(lp['wk']), np.asarray(lp['wv'])], axis=1)
        slab[base + L_BQKV, 0:3 * DIM] = np.concatenate(
            [np.asarray(lp['bq'])[0], np.asarray(lp['bk'])[0], np.asarray(lp['bv'])[0]])
        slab[base + L_WO:base + L_WO + DIM, 0:DIM] = np.asarray(lp['wo'])
        slab[base + L_BO, 0:DIM] = np.asarray(lp['bo'])[0]
        slab[base + L_W1:base + L_W1 + DIM, 0:MLP_HID] = np.asarray(lp['w1'])
        slab[base + L_B1, 0:MLP_HID] = np.asarray(lp['b1'])[0]
        slab[base + L_W2:base + L_W2 + MLP_HID, 0:DIM] = np.asarray(lp['w2'])
        slab[base + L_B2, 0:DIM] = np.asarray(lp['b2'])[0]

    slab[R_POOLW, 0:DIM] = np.asarray(params['pool_w'])[0]
    slab[R_POOLB, 0] = float(np.asarray(params['pool_b'])[0, 0])
    slab[R_FCW:R_FCW + DIM, 0:NUM_CLASSES] = np.asarray(params['fc_w'])
    slab[R_FCB, 0:NUM_CLASSES] = np.asarray(params['fc_b'])[0]
    return jnp.asarray(slab)


def our_cct_forward(pixel_values_nchw, slab):
    """pixel_values: (B, Cin, 16, 16) like the PyTorch module."""
    x = jnp.transpose(pixel_values_nchw, (0, 2, 3, 1)).astype(jnp.float32)   # NHWC
    B, H, W, C = x.shape
    assert H == IMG_HW and W == IMG_HW and C == IN_CHANNELS
    img = x.reshape(B * H, W * C)
    img = jnp.pad(img, ((0, 8), (0, 0)))         # so the dy-shifted 32-row slices stay in-bounds

    flops = 2 * (9 * B * IMG_HW * KWC * 128
                 + NUM_LAYERS * (B * N_TOKENS * DIM * (3 * DIM + DIM + 2 * MLP_HID)
                                 + 2 * B * NUM_HEADS * N_TOKENS * N_TOKENS * HEAD_DIM)
                 + B * DIM * FC_PAD)
    transcendentals = NUM_LAYERS * (B * NUM_HEADS * N_TOKENS * N_TOKENS
                                    + B * N_TOKENS * MLP_HID) + B * N_TOKENS
    bytes_accessed = SLAB_ROWS * 128 * 4 + img.size * 4 + B * FC_PAD * 4

    out = pl.pallas_call(
        functools.partial(cct_fused_kernel, batch=B,
                          num_heads=NUM_HEADS, num_layers=NUM_LAYERS),
        out_shape=jax.ShapeDtypeStruct((B, FC_PAD), jnp.float32),
        in_specs=[pl.BlockSpec(memory_space=pltpu.MemorySpace.VMEM),
                  pl.BlockSpec(memory_space=pltpu.MemorySpace.VMEM)],
        out_specs=pl.BlockSpec(memory_space=pltpu.MemorySpace.VMEM),
        scratch_shapes=[pltpu.VMEM((B * IMG_HW, 128), jnp.float32),
                        pltpu.VMEM((B * IMG_HW, 128), jnp.float32),
                        pltpu.VMEM((B * N_TOKENS, DIM), jnp.float32)],
        compiler_params=pltpu.CompilerParams(vmem_limit_bytes=8 * 1024 * 1024),
        cost_estimate=pl.CostEstimate(flops=flops, transcendentals=transcendentals,
                                      bytes_accessed=bytes_accessed),
    )(img, slab)
    return out[:, :NUM_CLASSES]


# =========================== deterministic parameters ===========================

def init_params(key):
    keys = iter(jax.random.split(key, 40))

    def dense(shape, scale=0.05):
        return (scale * jax.random.normal(next(keys), shape)).astype(jnp.float32)

    kh, kw = KERNEL_SIZE
    params = {
        'conv_w': dense((CONV_OUT, IN_CHANNELS, kh, kw)),   # PyTorch Conv2d layout
        'layers': [],
        'pool_w': dense((1, DIM)),
        'pool_b': jnp.zeros((1, 1), jnp.float32),
        'fc_w': dense((DIM, NUM_CLASSES)),
        'fc_b': jnp.zeros((1, NUM_CLASSES), jnp.float32),
    }
    for _ in range(NUM_LAYERS):
        params['layers'].append({
            'ln1_g': jnp.ones((1, DIM), jnp.float32), 'ln1_b': jnp.zeros((1, DIM), jnp.float32),
            'wq': dense((DIM, DIM)), 'bq': jnp.zeros((1, DIM), jnp.float32),
            'wk': dense((DIM, DIM)), 'bk': jnp.zeros((1, DIM), jnp.float32),
            'wv': dense((DIM, DIM)), 'bv': jnp.zeros((1, DIM), jnp.float32),
            'wo': dense((DIM, DIM)), 'bo': jnp.zeros((1, DIM), jnp.float32),
            'ln2_g': jnp.ones((1, DIM), jnp.float32), 'ln2_b': jnp.zeros((1, DIM), jnp.float32),
            'w1': dense((DIM, MLP_HID)), 'b1': jnp.zeros((1, MLP_HID), jnp.float32),
            'w2': dense((MLP_HID, DIM)), 'b2': jnp.zeros((1, DIM), jnp.float32),
        })
    return params


if __name__ == "__main__":
    key = jax.random.PRNGKey(0)
    pkey, xkey = jax.random.split(key)
    params = init_params(pkey)
    slab = pack_params(params)

    # pixel_values: NCHW.  16x16 -> conv(3x3, valid) 14x14 -> maxpool(3x3) 4x4 -> N=16
    # tokens (a perfect square, as the positional encoder requires).
    pixel_values = jax.random.normal(xkey, (2, IN_CHANNELS, IMG_HW, IMG_HW), jnp.float32)

    fwd = jax.jit(our_cct_forward)
    out = fwd(pixel_values, slab)
    out = jax.block_until_ready(out)
    assert out.shape == (2, NUM_CLASSES) and bool(jnp.all(jnp.isfinite(out)))
    print("KERNEL_OK")
</pallas_src>

<mosaic_0001>
module attributes {stable_mosaic.version = 11 : i64} {
  func.func @cct_fused_kernel(%arg0: memref<40x64xf32, #tpu.memory_space<vmem>>, %arg1: memref<968x128xf32, #tpu.memory_space<vmem>>, %arg2: memref<2x128xf32, #tpu.memory_space<vmem>>, %arg3: memref<32x128xf32, #tpu.memory_space<vmem>>, %arg4: memref<32x128xf32, #tpu.memory_space<vmem>>, %arg5: memref<32x32xf32, #tpu.memory_space<vmem>>) attributes {dimension_semantics = [], scalar_prefetch = 0 : i64, scratch_operands = 3 : i64, tpu.core_type = #tpu.core_type<tc>} {
    %c0 = arith.constant 0 : index
    %c0_0 = arith.constant 0 : index
    %0 = vector.load %arg0[%c0, %c0_0] : memref<40x64xf32, #tpu.memory_space<vmem>>, vector<32x64xf32>
    %c1 = arith.constant 1 : index
    %c0_1 = arith.constant 0 : index
    %1 = vector.load %arg0[%c1, %c0_1] : memref<40x64xf32, #tpu.memory_space<vmem>>, vector<32x64xf32>
    %c2 = arith.constant 2 : index
    %c0_2 = arith.constant 0 : index
    %2 = vector.load %arg0[%c2, %c0_2] : memref<40x64xf32, #tpu.memory_space<vmem>>, vector<32x64xf32>
    %c0_3 = arith.constant 0 : index
    %c0_4 = arith.constant 0 : index
    %3 = vector.load %arg1[%c0_3, %c0_4] : memref<968x128xf32, #tpu.memory_space<vmem>>, vector<64x128xf32>
    %cst = arith.constant dense<0.000000e+00> : vector<32x128xf32>
    %4 = tpu.matmul %0, %3, %cst {dimension_numbers = #tpu.dot_dimension_numbers<[1], [0], [0], [1], [0, 0, 1, 1], [], []>} : vector<32x64xf32>, vector<64x128xf32>, vector<32x128xf32> -> vector<32x128xf32>
    %c192 = arith.constant 192 : index
    %c0_5 = arith.constant 0 : index
    %5 = vector.load %arg1[%c192, %c0_5] : memref<968x128xf32, #tpu.memory_space<vmem>>, vector<64x128xf32>
    %cst_6 = arith.constant dense<0.000000e+00> : vector<32x128xf32>
    %6 = tpu.matmul %1, %5, %cst_6 {dimension_numbers = #tpu.dot_dimension_numbers<[1], [0], [0], [1], [0, 0, 1, 1], [], []>} : vector<32x64xf32>, vector<64x128xf32>, vector<32x128xf32> -> vector<32x128xf32>
    %7 = arith.addf %4, %6 : vector<32x128xf32>
    %c384 = arith.constant 384 : index
    %c0_7 = arith.constant 0 : index
    %8 = vector.load %arg1[%c384, %c0_7] : memref<968x128xf32, #tpu.memory_space<vmem>>, vector<64x128xf32>
    %cst_8 = arith.constant dense<0.000000e+00> : vector<32x128xf32>
    %9 = tpu.matmul %2, %8, %cst_8 {dimension_numbers = #tpu.dot_dimension_numbers<[1], [0], [0], [1], [0, 0, 1, 1], [], []>} : vector<32x64xf32>, vector<64x128xf32>, vector<32x128xf32> -> vector<32x128xf32>
    %10 = arith.addf %7, %9 : vector<32x128xf32>
    %cst_9 = arith.constant 0.000000e+00 : f32
    %11 = vector.broadcast %cst_9 : f32 to vector<32x128xf32>
    %12 = arith.maximumf %10, %11 : vector<32x128xf32>
    %c64 = arith.constant 64 : index
    %c0_10 = arith.constant 0 : index
    %13 = vector.load %arg1[%c64, %c0_10] : memref<968x128xf32, #tpu.memory_space<vmem>>, vector<64x128xf32>
    %cst_11 = arith.constant dense<0.000000e+00> : vector<32x128xf32>
    %14 = tpu.matmul %0, %13, %cst_11 {dimension_numbers = #tpu.dot_dimension_numbers<[1], [0], [0], [1], [0, 0, 1, 1], [], []>} : vector<32x64xf32>, vector<64x128xf32>, vector<32x128xf32> -> vector<32x128xf32>
    %c256 = arith.constant 256 : index
    %c0_12 = arith.constant 0 : index
    %15 = vector.load %arg1[%c256, %c0_12] : memref<968x128xf32, #tpu.memory_space<vmem>>, vector<64x128xf32>
    %cst_13 = arith.constant dense<0.000000e+00> : vector<32x128xf32>
    %16 = tpu.matmul %1, %15, %cst_13 {dimension_numbers = #tpu.dot_dimension_numbers<[1], [0], [0], [1], [0, 0, 1, 1], [], []>} : vector<32x64xf32>, vector<64x128xf32>, vector<32x128xf32> -> vector<32x128xf32>
    %17 = arith.addf %14, %16 : vector<32x128xf32>
    %c448 = arith.constant 448 : index
    %c0_14 = arith.constant 0 : index
    %18 = vector.load %arg1[%c448, %c0_14] : memref<968x128xf32, #tpu.memory_space<vmem>>, vector<64x128xf32>
    %cst_15 = arith.constant dense<0.000000e+00> : vector<32x128xf32>
    %19 = tpu.matmul %2, %18, %cst_15 {dimension_numbers = #tpu.dot_dimension_numbers<[1], [0], [0], [1], [0, 0, 1, 1], [], []>} : vector<32x64xf32>, vector<64x128xf32>, vector<32x128xf32> -> vector<32x128xf32>
    %20 = arith.addf %17, %19 : vector<32x128xf32>
    %cst_16 = arith.constant 0.000000e+00 : f32
    %21 = vector.broadcast %cst_16 : f32 to vector<32x128xf32>
    %22 = arith.maximumf %20, %21 : vector<32x128xf32>
    %23 = arith.maximumf %12, %22 : vector<32x128xf32>
    %c128 = arith.constant 128 : index
    %c0_17 = arith.constant 0 : index
    %24 = vector.load %arg1[%c128, %c0_17] : memref<968x128xf32, #tpu.memory_space<vmem>>, vector<64x128xf32>
    %cst_18 = arith.constant dense<0.000000e+00> : vector<32x128xf32>
    %25 = tpu.matmul %0, %24, %cst_18 {dimension_numbers = #tpu.dot_dimension_numbers<[1], [0], [0], [1], [0, 0, 1, 1], [], []>} : vector<32x64xf32>, vector<64x128xf32>, vector<32x128xf32> -> vector<32x128xf32>
    %c320 = arith.constant 320 : index
    %c0_19 = arith.constant 0 : index
    %26 = vector.load %arg1[%c320, %c0_19] : memref<968x128xf32, #tpu.memory_space<vmem>>, vector<64x128xf32>
    %cst_20 = arith.constant dense<0.000000e+00> : vector<32x128xf32>
    %27 = tpu.matmul %1, %26, %cst_20 {dimension_numbers = #tpu.dot_dimension_numbers<[1], [0], [0], [1], [0, 0, 1, 1], [], []>} : vector<32x64xf32>, vector<64x128xf32>, vector<32x128xf32> -> vector<32x128xf32>
    %28 = arith.addf %25, %27 : vector<32x128xf32>
    %c512 = arith.constant 512 : index
    %c0_21 = arith.constant 0 : index
    %29 = vector.load %arg1[%c512, %c0_21] : memref<968x128xf32, #tpu.memory_space<vmem>>, vector<64x128xf32>
    %cst_22 = arith.constant dense<0.000000e+00> : vector<32x128xf32>
    %30 = tpu.matmul %2, %29, %cst_22 {dimension_numbers = #tpu.dot_dimension_numbers<[1], [0], [0], [1], [0, 0, 1, 1], [], []>} : vector<32x64xf32>, vector<64x128xf32>, vector<32x128xf32> -> vector<32x128xf32>
    %31 = arith.addf %28, %30 : vector<32x128xf32>
    %cst_23 = arith.constant 0.000000e+00 : f32
    %32 = vector.broadcast %cst_23 : f32 to vector<32x128xf32>
    %33 = arith.maximumf %31, %32 : vector<32x128xf32>
    %34 = arith.maximumf %23, %33 : vector<32x128xf32>
    %c0_24 = arith.constant 0 : index
    %c0_25 = arith.constant 0 : index
    %35 = vector.load %arg3[%c0_24, %c0_25] : memref<32x128xf32, #tpu.memory_space<vmem>>, vector<32x128xf32>
    tpu.vector_store %arg3[%c0_24, %c0_25], %34 {strides = array<i32>} : memref<32x128xf32, #tpu.memory_space<vmem>>, vector<32x128xf32>,
    %c0_26 = arith.constant 0 : index
    %c0_27 = arith.constant 0 : index
    %36 = vector.load %arg3[%c0_26, %c0_27] : memref<32x128xf32, #tpu.memory_space<vmem>>, vector<28x128xf32>
    %c1_28 = arith.constant 1 : index
    %c0_29 = arith.constant 0 : index
    %37 = vector.load %arg3[%c1_28, %c0_29] : memref<32x128xf32, #tpu.memory_space<vmem>>, vector<28x128xf32>
    %38 = arith.maximumf %36, %37 : vector<28x128xf32>
    %c2_30 = arith.constant 2 : index
    %c0_31 = arith.constant 0 : index
    %39 = vector.load %arg3[%c2_30, %c0_31] : memref<32x128xf32, #tpu.memory_space<vmem>>, vector<28x128xf32>
    %40 = arith.maximumf %38, %39 : vector<28x128xf32>
    %c0_32 = arith.constant 0 : index
    %c0_33 = arith.constant 0 : index
    %41 = vector.load %arg4[%c0_32, %c0_33] : memref<32x128xf32, #tpu.memory_space<vmem>>, vector<28x128xf32>
    tpu.vector_store %arg4[%c0_32, %c0_33], %40 {strides = array<i32>} : memref<32x128xf32, #tpu.memory_space<vmem>>, vector<28x128xf32>,
    %c0_34 = arith.constant 0 : index
    %c0_35 = arith.constant 0 : index
    %42 = vector.load %arg4[%c0_34, %c0_35] : memref<32x128xf32, #tpu.memory_space<vmem>>, vector<1x32xf32>
    %c0_36 = arith.constant 0 : index
    %c0_37 = arith.constant 0 : index
    %43 = vector.load %arg5[%c0_36, %c0_37] : memref<32x32xf32, #tpu.memory_space<vmem>>, vector<1x32xf32>
    tpu.vector_store %arg5[%c0_36, %c0_37], %42 {strides = array<i32>} : memref<32x32xf32, #tpu.memory_space<vmem>>, vector<1x32xf32>,
    %c0_38 = arith.constant 0 : index
    %c32 = arith.constant 32 : index
    %44 = vector.load %arg4[%c0_38, %c32] : memref<32x128xf32, #tpu.memory_space<vmem>>, vector<1x32xf32>
    %c1_39 = arith.constant 1 : index
    %c0_40 = arith.constant 0 : index
    %45 = vector.load %arg5[%c1_39, %c0_40] : memref<32x32xf32, #tpu.memory_space<vmem>>, vector<1x32xf32>
    tpu.vector_store %arg5[%c1_39, %c0_40], %44 {strides = array<i32>} : memref<32x32xf32, #tpu.memory_space<vmem>>, vector<1x32xf32>,
    %c0_41 = arith.constant 0 : index
    %c64_42 = arith.constant 64 : index
    %46 = vector.load %arg4[%c0_41, %c64_42] : memref<32x128xf32, #tpu.memory_space<vmem>>, vector<1x32xf32>
    %c2_43 = arith.constant 2 : index
    %c0_44 = arith.constant 0 : index
    %47 = vector.load %arg5[%c2_43, %c0_44] : memref<32x32xf32, #tpu.memory_space<vmem>>, vector<1x32xf32>
    tpu.vector_store %arg5[%c2_43, %c0_44], %46 {strides = array<i32>} : memref<32x32xf32, #tpu.memory_space<vmem>>, vector<1x32xf32>,
    %c0_45 = arith.constant 0 : index
    %c96 = arith.constant 96 : index
    %48 = vector.load %arg4[%c0_45, %c96] : memref<32x128xf32, #tpu.memory_space<vmem>>, vector<1x32xf32>
    %c3 = arith.constant 3 : index
    %c0_46 = arith.constant 0 : index
    %49 = vector.load %arg5[%c3, %c0_46] : memref<32x32xf32, #tpu.memory_space<vmem>>, vector<1x32xf32>
    tpu.vector_store %arg5[%c3, %c0_46], %48 {strides = array<i32>} : memref<32x32xf32, #tpu.memory_space<vmem>>, vector<1x32xf32>,
    %c3_47 = arith.constant 3 : index
    %c0_48 = arith.constant 0 : index
    %50 = vector.load %arg4[%c3_47, %c0_48] : memref<32x128xf32, #tpu.memory_space<vmem>>, vector<1x32xf32>
    %c4 = arith.constant 4 : index
    %c0_49 = arith.constant 0 : index
    %51 = vector.load %arg5[%c4, %c0_49] : memref<32x32xf32, #tpu.memory_space<vmem>>, vector<1x32xf32>
    tpu.vector_store %arg5[%c4, %c0_49], %50 {strides = array<i32>} : memref<32x32xf32, #tpu.memory_space<vmem>>, vector<1x32xf32>,
    %c3_50 = arith.constant 3 : index
    %c32_51 = arith.constant 32 : index
    %52 = vector.load %arg4[%c3_50, %c32_51] : memref<32x128xf32, #tpu.memory_space<vmem>>, vector<1x32xf32>
    %c5 = arith.constant 5 : index
    %c0_52 = arith.constant 0 : index
    %53 = vector.load %arg5[%c5, %c0_52] : memref<32x32xf32, #tpu.memory_space<vmem>>, vector<1x32xf32>
    tpu.vector_store %arg5[%c5, %c0_52], %52 {strides = array<i32>} : memref<32x32xf32, #tpu.memory_space<vmem>>, vector<1x32xf32>,
    %c3_53 = arith.constant 3 : index
    %c64_54 = arith.constant 64 : index
    %54 = vector.load %arg4[%c3_53, %c64_54] : memref<32x128xf32, #tpu.memory_space<vmem>>, vector<1x32xf32>
    %c6 = arith.constant 6 : index
    %c0_55 = arith.constant 0 : index
    %55 = vector.load %arg5[%c6, %c0_55] : memref<32x32xf32, #tpu.memory_space<vmem>>, vector<1x32xf32>
    tpu.vector_store %arg5[%c6, %c0_55], %54 {strides = array<i32>} : memref<32x32xf32, #tpu.memory_space<vmem>>, vector<1x32xf32>,
    %c3_56 = arith.constant 3 : index
    %c96_57 = arith.constant 96 : index
    %56 = vector.load %arg4[%c3_56, %c96_57] : memref<32x128xf32, #tpu.memory_space<vmem>>, vector<1x32xf32>
    %c7 = arith.constant 7 : index
    %c0_58 = arith.constant 0 : index
    %57 = vector.load %arg5[%c7, %c0_58] : memref<32x32xf32, #tpu.memory_space<vmem>>, vector<1x32xf32>
    tpu.vector_store %arg5[%c7, %c0_58], %56 {strides = array<i32>} : memref<32x32xf32, #tpu.memory_space<vmem>>, vector<1x32xf32>,
    %c6_59 = arith.constant 6 : index
    %c0_60 = arith.constant 0 : index
    %58 = vector.load %arg4[%c6_59, %c0_60] : memref<32x128xf32, #tpu.memory_space<vmem>>, vector<1x32xf32>
    %c8 = arith.constant 8 : index
    %c0_61 = arith.constant 0 : index
    %59 = vector.load %arg5[%c8, %c0_61] : memref<32x32xf32, #tpu.memory_space<vmem>>, vector<1x32xf32>
    tpu.vector_store %arg5[%c8, %c0_61], %58 {strides = array<i32>} : memref<32x32xf32, #tpu.memory_space<vmem>>, vector<1x32xf32>,
    %c6_62 = arith.constant 6 : index
    %c32_63 = arith.constant 32 : index
    %60 = vector.load %arg4[%c6_62, %c32_63] : memref<32x128xf32, #tpu.memory_space<vmem>>, vector<1x32xf32>
    %c9 = arith.constant 9 : index
    %c0_64 = arith.constant 0 : index
    %61 = vector.load %arg5[%c9, %c0_64] : memref<32x32xf32, #tpu.memory_space<vmem>>, vector<1x32xf32>
    tpu.vector_store %arg5[%c9, %c0_64], %60 {strides = array<i32>} : memref<32x32xf32, #tpu.memory_space<vmem>>, vector<1x32xf32>,
    %c6_65 = arith.constant 6 : index
    %c64_66 = arith.constant 64 : index
    %62 = vector.load %arg4[%c6_65, %c64_66] : memref<32x128xf32, #tpu.memory_space<vmem>>, vector<1x32xf32>
    %c10 = arith.constant 10 : index
    %c0_67 = arith.constant 0 : index
    %63 = vector.load %arg5[%c10, %c0_67] : memref<32x32xf32, #tpu.memory_space<vmem>>, vector<1x32xf32>
    tpu.vector_store %arg5[%c10, %c0_67], %62 {strides = array<i32>} : memref<32x32xf32, #tpu.memory_space<vmem>>, vector<1x32xf32>,
    %c6_68 = arith.constant 6 : index
    %c96_69 = arith.constant 96 : index
    %64 = vector.load %arg4[%c6_68, %c96_69] : memref<32x128xf32, #tpu.memory_space<vmem>>, vector<1x32xf32>
    %c11 = arith.constant 11 : index
    %c0_70 = arith.constant 0 : index
    %65 = vector.load %arg5[%c11, %c0_70] : memref<32x32xf32, #tpu.memory_space<vmem>>, vector<1x32xf32>
    tpu.vector_store %arg5[%c11, %c0_70], %64 {strides = array<i32>} : memref<32x32xf32, #tpu.memory_space<vmem>>, vector<1x32xf32>,
    %c9_71 = arith.constant 9 : index
    %c0_72 = arith.constant 0 : index
    %66 = vector.load %arg4[%c9_71, %c0_72] : memref<32x128xf32, #tpu.memory_space<vmem>>, vector<1x32xf32>
    %c12 = arith.constant 12 : index
    %c0_73 = arith.constant 0 : index
    %67 = vector.load %arg5[%c12, %c0_73] : memref<32x32xf32, #tpu.memory_space<vmem>>, vector<1x32xf32>
    tpu.vector_store %arg5[%c12, %c0_73], %66 {strides = array<i32>} : memref<32x32xf32, #tpu.memory_space<vmem>>, vector<1x32xf32>,
    %c9_74 = arith.constant 9 : index
    %c32_75 = arith.constant 32 : index
    %68 = vector.load %arg4[%c9_74, %c32_75] : memref<32x128xf32, #tpu.memory_space<vmem>>, vector<1x32xf32>
    %c13 = arith.constant 13 : index
    %c0_76 = arith.constant 0 : index
    %69 = vector.load %arg5[%c13, %c0_76] : memref<32x32xf32, #tpu.memory_space<vmem>>, vector<1x32xf32>
    tpu.vector_store %arg5[%c13, %c0_76], %68 {strides = array<i32>} : memref<32x32xf32, #tpu.memory_space<vmem>>, vector<1x32xf32>,
    %c9_77 = arith.constant 9 : index
    %c64_78 = arith.constant 64 : index
    %70 = vector.load %arg4[%c9_77, %c64_78] : memref<32x128xf32, #tpu.memory_space<vmem>>, vector<1x32xf32>
    %c14 = arith.constant 14 : index
    %c0_79 = arith.constant 0 : index
    %71 = vector.load %arg5[%c14, %c0_79] : memref<32x32xf32, #tpu.memory_space<vmem>>, vector<1x32xf32>
    tpu.vector_store %arg5[%c14, %c0_79], %70 {strides = array<i32>} : memref<32x32xf32, #tpu.memory_space<vmem>>, vector<1x32xf32>,
    %c9_80 = arith.constant 9 : index
    %c96_81 = arith.constant 96 : index
    %72 = vector.load %arg4[%c9_80, %c96_81] : memref<32x128xf32, #tpu.memory_space<vmem>>, vector<1x32xf32>
    %c15 = arith.constant 15 : index
    %c0_82 = arith.constant 0 : index
    %73 = vector.load %arg5[%c15, %c0_82] : memref<32x32xf32, #tpu.memory_space<vmem>>, vector<1x32xf32>
    tpu.vector_store %arg5[%c15, %c0_82], %72 {strides = array<i32>} : memref<32x32xf32, #tpu.memory_space<vmem>>, vector<1x32xf32>,
    %c16 = arith.constant 16 : index
    %c0_83 = arith.constant 0 : index
    %74 = vector.load %arg4[%c16, %c0_83] : memref<32x128xf32, #tpu.memory_space<vmem>>, vector<1x32xf32>
    %c16_84 = arith.constant 16 : index
    %c0_85 = arith.constant 0 : index
    %75 = vector.load %arg5[%c16_84, %c0_85] : memref<32x32xf32, #tpu.memory_space<vmem>>, vector<1x32xf32>
    tpu.vector_store %arg5[%c16_84, %c0_85], %74 {strides = array<i32>} : memref<32x32xf32, #tpu.memory_space<vmem>>, vector<1x32xf32>,
    %c16_86 = arith.constant 16 : index
    %c32_87 = arith.constant 32 : index
    %76 = vector.load %arg4[%c16_86, %c32_87] : memref<32x128xf32, #tpu.memory_space<vmem>>, vector<1x32xf32>
    %c17 = arith.constant 17 : index
    %c0_88 = arith.constant 0 : index
    %77 = vector.load %arg5[%c17, %c0_88] : memref<32x32xf32, #tpu.memory_space<vmem>>, vector<1x32xf32>
    tpu.vector_store %arg5[%c17, %c0_88], %76 {strides = array<i32>} : memref<32x32xf32, #tpu.memory_space<vmem>>, vector<1x32xf32>,
    %c16_89 = arith.constant 16 : index
    %c64_90 = arith.constant 64 : index
    %78 = vector.load %arg4[%c16_89, %c64_90] : memref<32x128xf32, #tpu.memory_space<vmem>>, vector<1x32xf32>
    %c18 = arith.constant 18 : index
    %c0_91 = arith.constant 0 : index
    %79 = vector.load %arg5[%c18, %c0_91] : memref<32x32xf32, #tpu.memory_space<vmem>>, vector<1x32xf32>
    tpu.vector_store %arg5[%c18, %c0_91], %78 {strides = array<i32>} : memref<32x32xf32, #tpu.memory_space<vmem>>, vector<1x32xf32>,
    %c16_92 = arith.constant 16 : index
    %c96_93 = arith.constant 96 : index
    %80 = vector.load %arg4[%c16_92, %c96_93] : memref<32x128xf32, #tpu.memory_space<vmem>>, vector<1x32xf32>
    %c19 = arith.constant 19 : index
    %c0_94 = arith.constant 0 : index
    %81 = vector.load %arg5[%c19, %c0_94] : memref<32x32xf32, #tpu.memory_space<vmem>>, vector<1x32xf32>
    tpu.vector_store %arg5[%c19, %c0_94], %80 {strides = array<i32>} : memref<32x32xf32, #tpu.memory_space<vmem>>, vector<1x32xf32>,
    %c19_95 = arith.constant 19 : index
    %c0_96 = arith.constant 0 : index
    %82 = vector.load %arg4[%c19_95, %c0_96] : memref<32x128xf32, #tpu.memory_space<vmem>>, vector<1x32xf32>
    %c20 = arith.constant 20 : index
    %c0_97 = arith.constant 0 : index
    %83 = vector.load %arg5[%c20, %c0_97] : memref<32x32xf32, #tpu.memory_space<vmem>>, vector<1x32xf32>
    tpu.vector_store %arg5[%c20, %c0_97], %82 {strides = array<i32>} : memref<32x32xf32, #tpu.memory_space<vmem>>, vector<1x32xf32>,
    %c19_98 = arith.constant 19 : index
    %c32_99 = arith.constant 32 : index
    %84 = vector.load %arg4[%c19_98, %c32_99] : memref<32x128xf32, #tpu.memory_space<vmem>>, vector<1x32xf32>
    %c21 = arith.constant 21 : index
    %c0_100 = arith.constant 0 : index
    %85 = vector.load %arg5[%c21, %c0_100] : memref<32x32xf32, #tpu.memory_space<vmem>>, vector<1x32xf32>
    tpu.vector_store %arg5[%c21, %c0_100], %84 {strides = array<i32>} : memref<32x32xf32, #tpu.memory_space<vmem>>, vector<1x32xf32>,
    %c19_101 = arith.constant 19 : index
    %c64_102 = arith.constant 64 : index
    %86 = vector.load %arg4[%c19_101, %c64_102] : memref<32x128xf32, #tpu.memory_space<vmem>>, vector<1x32xf32>
    %c22 = arith.constant 22 : index
    %c0_103 = arith.constant 0 : index
    %87 = vector.load %arg5[%c22, %c0_103] : memref<32x32xf32, #tpu.memory_space<vmem>>, vector<1x32xf32>
    tpu.vector_store %arg5[%c22, %c0_103], %86 {strides = array<i32>} : memref<32x32xf32, #tpu.memory_space<vmem>>, vector<1x32xf32>,
    %c19_104 = arith.constant 19 : index
    %c96_105 = arith.constant 96 : index
    %88 = vector.load %arg4[%c19_104, %c96_105] : memref<32x128xf32, #tpu.memory_space<vmem>>, vector<1x32xf32>
    %c23 = arith.constant 23 : index
    %c0_106 = arith.constant 0 : index
    %89 = vector.load %arg5[%c23, %c0_106] : memref<32x32xf32, #tpu.memory_space<vmem>>, vector<1x32xf32>
    tpu.vector_store %arg5[%c23, %c0_106], %88 {strides = array<i32>} : memref<32x32xf32, #tpu.memory_space<vmem>>, vector<1x32xf32>,
    %c22_107 = arith.constant 22 : index
    %c0_108 = arith.constant 0 : index
    %90 = vector.load %arg4[%c22_107, %c0_108] : memref<32x128xf32, #tpu.memory_space<vmem>>, vector<1x32xf32>
    %c24 = arith.constant 24 : index
    %c0_109 = arith.constant 0 : index
    %91 = vector.load %arg5[%c24, %c0_109] : memref<32x32xf32, #tpu.memory_space<vmem>>, vector<1x32xf32>
    tpu.vector_store %arg5[%c24, %c0_109], %90 {strides = array<i32>} : memref<32x32xf32, #tpu.memory_space<vmem>>, vector<1x32xf32>,
    %c22_110 = arith.constant 22 : index
    %c32_111 = arith.constant 32 : index
    %92 = vector.load %arg4[%c22_110, %c32_111] : memref<32x128xf32, #tpu.memory_space<vmem>>, vector<1x32xf32>
    %c25 = arith.constant 25 : index
    %c0_112 = arith.constant 0 : index
    %93 = vector.load %arg5[%c25, %c0_112] : memref<32x32xf32, #tpu.memory_space<vmem>>, vector<1x32xf32>
    tpu.vector_store %arg5[%c25, %c0_112], %92 {strides = array<i32>} : memref<32x32xf32, #tpu.memory_space<vmem>>, vector<1x32xf32>,
    %c22_113 = arith.constant 22 : index
    %c64_114 = arith.constant 64 : index
    %94 = vector.load %arg4[%c22_113, %c64_114] : memref<32x128xf32, #tpu.memory_space<vmem>>, vector<1x32xf32>
    %c26 = arith.constant 26 : index
    %c0_115 = arith.constant 0 : index
    %95 = vector.load %arg5[%c26, %c0_115] : memref<32x32xf32, #tpu.memory_space<vmem>>, vector<1x32xf32>
    tpu.vector_store %arg5[%c26, %c0_115], %94 {strides = array<i32>} : memref<32x32xf32, #tpu.memory_space<vmem>>, vector<1x32xf32>,
    %c22_116 = arith.constant 22 : index
    %c96_117 = arith.constant 96 : index
    %96 = vector.load %arg4[%c22_116, %c96_117] : memref<32x128xf32, #tpu.memory_space<vmem>>, vector<1x32xf32>
    %c27 = arith.constant 27 : index
    %c0_118 = arith.constant 0 : index
    %97 = vector.load %arg5[%c27, %c0_118] : memref<32x32xf32, #tpu.memory_space<vmem>>, vector<1x32xf32>
    tpu.vector_store %arg5[%c27, %c0_118], %96 {strides = array<i32>} : memref<32x32xf32, #tpu.memory_space<vmem>>, vector<1x32xf32>,
    %c25_119 = arith.constant 25 : index
    %c0_120 = arith.constant 0 : index
    %98 = vector.load %arg4[%c25_119, %c0_120] : memref<32x128xf32, #tpu.memory_space<vmem>>, vector<1x32xf32>
    %c28 = arith.constant 28 : index
    %c0_121 = arith.constant 0 : index
    %99 = vector.load %arg5[%c28, %c0_121] : memref<32x32xf32, #tpu.memory_space<vmem>>, vector<1x32xf32>
    tpu.vector_store %arg5[%c28, %c0_121], %98 {strides = array<i32>} : memref<32x32xf32, #tpu.memory_space<vmem>>, vector<1x32xf32>,
    %c25_122 = arith.constant 25 : index
    %c32_123 = arith.constant 32 : index
    %100 = vector.load %arg4[%c25_122, %c32_123] : memref<32x128xf32, #tpu.memory_space<vmem>>, vector<1x32xf32>
    %c29 = arith.constant 29 : index
    %c0_124 = arith.constant 0 : index
    %101 = vector.load %arg5[%c29, %c0_124] : memref<32x32xf32, #tpu.memory_space<vmem>>, vector<1x32xf32>
    tpu.vector_store %arg5[%c29, %c0_124], %100 {strides = array<i32>} : memref<32x32xf32, #tpu.memory_space<vmem>>, vector<1x32xf32>,
    %c25_125 = arith.constant 25 : index
    %c64_126 = arith.constant 64 : index
    %102 = vector.load %arg4[%c25_125, %c64_126] : memref<32x128xf32, #tpu.memory_space<vmem>>, vector<1x32xf32>
    %c30 = arith.constant 30 : index
    %c0_127 = arith.constant 0 : index
    %103 = vector.load %arg5[%c30, %c0_127] : memref<32x32xf32, #tpu.memory_space<vmem>>, vector<1x32xf32>
    tpu.vector_store %arg5[%c30, %c0_127], %102 {strides = array<i32>} : memref<32x32xf32, #tpu.memory_space<vmem>>, vector<1x32xf32>,
    %c25_128 = arith.constant 25 : index
    %c96_129 = arith.constant 96 : index
    %104 = vector.load %arg4[%c25_128, %c96_129] : memref<32x128xf32, #tpu.memory_space<vmem>>, vector<1x32xf32>
    %c31 = arith.constant 31 : index
    %c0_130 = arith.constant 0 : index
    %105 = vector.load %arg5[%c31, %c0_130] : memref<32x32xf32, #tpu.memory_space<vmem>>, vector<1x32xf32>
    tpu.vector_store %arg5[%c31, %c0_130], %104 {strides = array<i32>} : memref<32x32xf32, #tpu.memory_space<vmem>>, vector<1x32xf32>,
    %c576 = arith.constant 576 : index
    %c0_131 = arith.constant 0 : index
    %106 = vector.load %arg1[%c576, %c0_131] : memref<968x128xf32, #tpu.memory_space<vmem>>, vector<16x32xf32>
    %c0_132 = arith.constant 0 : index
    %c0_133 = arith.constant 0 : index
    %107 = vector.load %arg5[%c0_132, %c0_133] : memref<32x32xf32, #tpu.memory_space<vmem>>, vector<32x32xf32>
    %108 = tpu.concatenate %106, %106 in 0 : vector<16x32xf32>, vector<16x32xf32> -> vector<32x32xf32>
    %109 = arith.addf %107, %108 : vector<32x32xf32>
    %c592 = arith.constant 592 : index
    %c0_134 = arith.constant 0 : index
    %110 = vector.load %arg1[%c592, %c0_134] : memref<968x128xf32, #tpu.memory_space<vmem>>, vector<1x32xf32>
    %c593 = arith.constant 593 : index
    %c0_135 = arith.constant 0 : index
    %111 = vector.load %arg1[%c593, %c0_135] : memref<968x128xf32, #tpu.memory_space<vmem>>, vector<1x32xf32>
    %c594 = arith.constant 594 : index
    %c0_136 = arith.constant 0 : index
    %112 = vector.load %arg1[%c594, %c0_136] : memref<968x128xf32, #tpu.memory_space<vmem>>, vector<1x32xf32>
    %c595 = arith.constant 595 : index
    %c0_137 = arith.constant 0 : index
    %113 = vector.load %arg1[%c595, %c0_137] : memref<968x128xf32, #tpu.memory_space<vmem>>, vector<1x32xf32>
    %c596 = arith.constant 596 : index
    %c0_138 = arith.constant 0 : index
    %114 = vector.load %arg1[%c596, %c0_138] : memref<968x128xf32, #tpu.memory_space<vmem>>, vector<32x96xf32>
    %c628 = arith.constant 628 : index
    %c0_139 = arith.constant 0 : index
    %115 = vector.load %arg1[%c628, %c0_139] : memref<968x128xf32, #tpu.memory_space<vmem>>, vector<1x96xf32>
    %c629 = arith.constant 629 : index
    %c0_140 = arith.constant 0 : index
    %116 = vector.load %arg1[%c629, %c0_140] : memref<968x128xf32, #tpu.memory_space<vmem>>, vector<32x32xf32>
    %c661 = arith.constant 661 : index
    %c0_141 = arith.constant 0 : index
    %117 = vector.load %arg1[%c661, %c0_141] : memref<968x128xf32, #tpu.memory_space<vmem>>, vector<1x32xf32>
    %c662 = arith.constant 662 : index
    %c0_142 = arith.constant 0 : index
    %118 = vector.load %arg1[%c662, %c0_142] : memref<968x128xf32, #tpu.memory_space<vmem>>, vector<32x64xf32>
    %c694 = arith.constant 694 : index
    %c0_143 = arith.constant 0 : index
    %119 = vector.load %arg1[%c694, %c0_143] : memref<968x128xf32, #tpu.memory_space<vmem>>, vector<1x64xf32>
    %c695 = arith.constant 695 : index
    %c0_144 = arith.constant 0 : index
    %120 = vector.load %arg1[%c695, %c0_144] : memref<968x128xf32, #tpu.memory_space<vmem>>, vector<64x32xf32>
    %c759 = arith.constant 759 : index
    %c0_145 = arith.constant 0 : index
    %121 = vector.load %arg1[%c759, %c0_145] : memref<968x128xf32, #tpu.memory_space<vmem>>, vector<1x32xf32>
    %cst_146 = arith.constant dense<0.000000e+00> : vector<32xf32>
    %122 = vector.multi_reduction <add>, %109, %cst_146 [1] : vector<32x32xf32> to vector<32xf32>
    %123 = vector.shape_cast %122 : vector<32xf32> to vector<32x1xf32>
    %cst_147 = arith.constant 3.200000e+01 : f32
    %124 = vector.broadcast %cst_147 : f32 to vector<32x1xf32>
    %125 = arith.divf %123, %124 : vector<32x1xf32>
    %126 = vector.broadcast %125 : vector<32x1xf32> to vector<32x32xf32>
    %127 = arith.subf %109, %126 : vector<32x32xf32>
    %128 = arith.mulf %127, %127 : vector<32x32xf32>
    %cst_148 = arith.constant dense<0.000000e+00> : vector<32xf32>
    %129 = vector.multi_reduction <add>, %128, %cst_148 [1] : vector<32x32xf32> to vector<32xf32>
    %130 = vector.shape_cast %129 : vector<32xf32> to vector<32x1xf32>
    %cst_149 = arith.constant 3.200000e+01 : f32
    %131 = vector.broadcast %cst_149 : f32 to vector<32x1xf32>
    %132 = arith.divf %130, %131 : vector<32x1xf32>
    %133 = vector.broadcast %125 : vector<32x1xf32> to vector<32x32xf32>
    %134 = arith.subf %109, %133 : vector<32x32xf32>
    %cst_150 = arith.constant 9.99999974E-6 : f32
    %135 = vector.broadcast %cst_150 : f32 to vector<32x1xf32>
    %136 = arith.addf %132, %135 : vector<32x1xf32>
    %137 = math.rsqrt %136 : vector<32x1xf32>
    %138 = vector.broadcast %137 : vector<32x1xf32> to vector<32x32xf32>
    %139 = arith.mulf %134, %138 : vector<32x32xf32>
    %140 = vector.broadcast %110 : vector<1x32xf32> to vector<32x32xf32>
    %141 = arith.mulf %139, %140 : vector<32x32xf32>
    %142 = vector.broadcast %111 : vector<1x32xf32> to vector<32x32xf32>
    %143 = arith.addf %141, %142 : vector<32x32xf32>
    %cst_151 = arith.constant dense<0.000000e+00> : vector<32x96xf32>
    %144 = tpu.matmul %143, %114, %cst_151 {dimension_numbers = #tpu.dot_dimension_numbers<[1], [0], [0], [1], [0, 0, 1, 1], [], []>} : vector<32x32xf32>, vector<32x96xf32>, vector<32x96xf32> -> vector<32x96xf32>
    %145 = vector.broadcast %115 : vector<1x96xf32> to vector<32x96xf32>
    %146 = arith.addf %144, %145 : vector<32x96xf32>
    %147 = vector.extract_strided_slice %146 {offsets = [0, 0], sizes = [32, 8], strides = [1, 1]} : vector<32x96xf32> to vector<32x8xf32>
    %148 = vector.shape_cast %147 : vector<32x8xf32> to vector<2x16x8xf32>
    %149 = vector.extract_strided_slice %146 {offsets = [0, 32], sizes = [32, 8], strides = [1, 1]} : vector<32x96xf32> to vector<32x8xf32>
    %150 = vector.shape_cast %149 : vector<32x8xf32> to vector<2x16x8xf32>
    %151 = vector.extract_strided_slice %146 {offsets = [0, 64], sizes = [32, 8], strides = [1, 1]} : vector<32x96xf32> to vector<32x8xf32>
    %152 = vector.shape_cast %151 : vector<32x8xf32> to vector<2x16x8xf32>
    %cst_152 = arith.constant dense<0.000000e+00> : vector<2x16x16xf32>
    %153 = tpu.matmul %148, %150, %cst_152 {dimension_numbers = #tpu.dot_dimension_numbers<[2], [2], [1], [1], [0, 0, 0, 1, 1, 1], [0], [0]>} : vector<2x16x8xf32>, vector<2x16x8xf32>, vector<2x16x16xf32> -> vector<2x16x16xf32>
    %cst_153 = arith.constant 0.353553385 : f32
    %154 = vector.broadcast %cst_153 : f32 to vector<2x16x16xf32>
    %155 = arith.mulf %153, %154 : vector<2x16x16xf32>
    %cst_154 = arith.constant dense<0xFF800000> : vector<2x16xf32>
    %156 = vector.multi_reduction <maximumf>, %155, %cst_154 [2] : vector<2x16x16xf32> to vector<2x16xf32>
    %157 = vector.shape_cast %156 : vector<2x16xf32> to vector<2x16x1xf32>
    %158 = vector.broadcast %157 : vector<2x16x1xf32> to vector<2x16x16xf32>
    %159 = arith.subf %155, %158 : vector<2x16x16xf32>
    %160 = math.exp %159 : vector<2x16x16xf32>
    %cst_155 = arith.constant dense<0.000000e+00> : vector<2x16xf32>
    %161 = vector.multi_reduction <add>, %160, %cst_155 [2] : vector<2x16x16xf32> to vector<2x16xf32>
    %162 = vector.shape_cast %161 : vector<2x16xf32> to vector<2x16x1xf32>
    %163 = vector.broadcast %162 : vector<2x16x1xf32> to vector<2x16x16xf32>
    %164 = arith.divf %160, %163 : vector<2x16x16xf32>
    %cst_156 = arith.constant dense<0.000000e+00> : vector<2x16x8xf32>
    %165 = tpu.matmul %164, %152, %cst_156 {dimension_numbers = #tpu.dot_dimension_numbers<[2], [1], [1], [2], [0, 0, 0, 1, 1, 2], [0], [0]>} : vector<2x16x16xf32>, vector<2x16x8xf32>, vector<2x16x8xf32> -> vector<2x16x8xf32>
    %166 = vector.shape_cast %165 : vector<2x16x8xf32> to vector<32x8xf32>
    %167 = vector.extract_strided_slice %146 {offsets = [0, 8], sizes = [32, 8], strides = [1, 1]} : vector<32x96xf32> to vector<32x8xf32>
    %168 = vector.shape_cast %167 : vector<32x8xf32> to vector<2x16x8xf32>
    %169 = vector.extract_strided_slice %146 {offsets = [0, 40], sizes = [32, 8], strides = [1, 1]} : vector<32x96xf32> to vector<32x8xf32>
    %170 = vector.shape_cast %169 : vector<32x8xf32> to vector<2x16x8xf32>
    %171 = vector.extract_strided_slice %146 {offsets = [0, 72], sizes = [32, 8], strides = [1, 1]} : vector<32x96xf32> to vector<32x8xf32>
    %172 = vector.shape_cast %171 : vector<32x8xf32> to vector<2x16x8xf32>
    %cst_157 = arith.constant dense<0.000000e+00> : vector<2x16x16xf32>
    %173 = tpu.matmul %168, %170, %cst_157 {dimension_numbers = #tpu.dot_dimension_numbers<[2], [2], [1], [1], [0, 0, 0, 1, 1, 1], [0], [0]>} : vector<2x16x8xf32>, vector<2x16x8xf32>, vector<2x16x16xf32> -> vector<2x16x16xf32>
    %cst_158 = arith.constant 0.353553385 : f32
    %174 = vector.broadcast %cst_158 : f32 to vector<2x16x16xf32>
    %175 = arith.mulf %173, %174 : vector<2x16x16xf32>
    %cst_159 = arith.constant dense<0xFF800000> : vector<2x16xf32>
    %176 = vector.multi_reduction <maximumf>, %175, %cst_159 [2] : vector<2x16x16xf32> to vector<2x16xf32>
    %177 = vector.shape_cast %176 : vector<2x16xf32> to vector<2x16x1xf32>
    %178 = vector.broadcast %177 : vector<2x16x1xf32> to vector<2x16x16xf32>
    %179 = arith.subf %175, %178 : vector<2x16x16xf32>
    %180 = math.exp %179 : vector<2x16x16xf32>
    %cst_160 = arith.constant dense<0.000000e+00> : vector<2x16xf32>
    %181 = vector.multi_reduction <add>, %180, %cst_160 [2] : vector<2x16x16xf32> to vector<2x16xf32>
    %182 = vector.shape_cast %181 : vector<2x16xf32> to vector<2x16x1xf32>
    %183 = vector.broadcast %182 : vector<2x16x1xf32> to vector<2x16x16xf32>
    %184 = arith.divf %180, %183 : vector<2x16x16xf32>
    %cst_161 = arith.constant dense<0.000000e+00> : vector<2x16x8xf32>
    %185 = tpu.matmul %184, %172, %cst_161 {dimension_numbers = #tpu.dot_dimension_numbers<[2], [1], [1], [2], [0, 0, 0, 1, 1, 2], [0], [0]>} : vector<2x16x16xf32>, vector<2x16x8xf32>, vector<2x16x8xf32> -> vector<2x16x8xf32>
    %186 = vector.shape_cast %185 : vector<2x16x8xf32> to vector<32x8xf32>
    %187 = vector.extract_strided_slice %146 {offsets = [0, 16], sizes = [32, 8], strides = [1, 1]} : vector<32x96xf32> to vector<32x8xf32>
    %188 = vector.shape_cast %187 : vector<32x8xf32> to vector<2x16x8xf32>
    %189 = vector.extract_strided_slice %146 {offsets = [0, 48], sizes = [32, 8], strides = [1, 1]} : vector<32x96xf32> to vector<32x8xf32>
    %190 = vector.shape_cast %189 : vector<32x8xf32> to vector<2x16x8xf32>
    %191 = vector.extract_strided_slice %146 {offsets = [0, 80], sizes = [32, 8], strides = [1, 1]} : vector<32x96xf32> to vector<32x8xf32>
    %192 = vector.shape_cast %191 : vector<32x8xf32> to vector<2x16x8xf32>
    %cst_162 = arith.constant dense<0.000000e+00> : vector<2x16x16xf32>
    %193 = tpu.matmul %188, %190, %cst_162 {dimension_numbers = #tpu.dot_dimension_numbers<[2], [2], [1], [1], [0, 0, 0, 1, 1, 1], [0], [0]>} : vector<2x16x8xf32>, vector<2x16x8xf32>, vector<2x16x16xf32> -> vector<2x16x16xf32>
    %cst_163 = arith.constant 0.353553385 : f32
    %194 = vector.broadcast %cst_163 : f32 to vector<2x16x16xf32>
    %195 = arith.mulf %193, %194 : vector<2x16x16xf32>
    %cst_164 = arith.constant dense<0xFF800000> : vector<2x16xf32>
    %196 = vector.multi_reduction <maximumf>, %195, %cst_164 [2] : vector<2x16x16xf32> to vector<2x16xf32>
    %197 = vector.shape_cast %196 : vector<2x16xf32> to vector<2x16x1xf32>
    %198 = vector.broadcast %197 : vector<2x16x1xf32> to vector<2x16x16xf32>
    %199 = arith.subf %195, %198 : vector<2x16x16xf32>
    %200 = math.exp %199 : vector<2x16x16xf32>
    %cst_165 = arith.constant dense<0.000000e+00> : vector<2x16xf32>
    %201 = vector.multi_reduction <add>, %200, %cst_165 [2] : vector<2x16x16xf32> to vector<2x16xf32>
    %202 = vector.shape_cast %201 : vector<2x16xf32> to vector<2x16x1xf32>
    %203 = vector.broadcast %202 : vector<2x16x1xf32> to vector<2x16x16xf32>
    %204 = arith.divf %200, %203 : vector<2x16x16xf32>
    %cst_166 = arith.constant dense<0.000000e+00> : vector<2x16x8xf32>
    %205 = tpu.matmul %204, %192, %cst_166 {dimension_numbers = #tpu.dot_dimension_numbers<[2], [1], [1], [2], [0, 0, 0, 1, 1, 2], [0], [0]>} : vector<2x16x16xf32>, vector<2x16x8xf32>, vector<2x16x8xf32> -> vector<2x16x8xf32>
    %206 = vector.shape_cast %205 : vector<2x16x8xf32> to vector<32x8xf32>
    %207 = vector.extract_strided_slice %146 {offsets = [0, 24], sizes = [32, 8], strides = [1, 1]} : vector<32x96xf32> to vector<32x8xf32>
    %208 = vector.shape_cast %207 : vector<32x8xf32> to vector<2x16x8xf32>
    %209 = vector.extract_strided_slice %146 {offsets = [0, 56], sizes = [32, 8], strides = [1, 1]} : vector<32x96xf32> to vector<32x8xf32>
    %210 = vector.shape_cast %209 : vector<32x8xf32> to vector<2x16x8xf32>
    %211 = vector.extract_strided_slice %146 {offsets = [0, 88], sizes = [32, 8], strides = [1, 1]} : vector<32x96xf32> to vector<32x8xf32>
    %212 = vector.shape_cast %211 : vector<32x8xf32> to vector<2x16x8xf32>
    %cst_167 = arith.constant dense<0.000000e+00> : vector<2x16x16xf32>
    %213 = tpu.matmul %208, %210, %cst_167 {dimension_numbers = #tpu.dot_dimension_numbers<[2], [2], [1], [1], [0, 0, 0, 1, 1, 1], [0], [0]>} : vector<2x16x8xf32>, vector<2x16x8xf32>, vector<2x16x16xf32> -> vector<2x16x16xf32>
    %cst_168 = arith.constant 0.353553385 : f32
    %214 = vector.broadcast %cst_168 : f32 to vector<2x16x16xf32>
    %215 = arith.mulf %213, %214 : vector<2x16x16xf32>
    %cst_169 = arith.constant dense<0xFF800000> : vector<2x16xf32>
    %216 = vector.multi_reduction <maximumf>, %215, %cst_169 [2] : vector<2x16x16xf32> to vector<2x16xf32>
    %217 = vector.shape_cast %216 : vector<2x16xf32> to vector<2x16x1xf32>
    %218 = vector.broadcast %217 : vector<2x16x1xf32> to vector<2x16x16xf32>
    %219 = arith.subf %215, %218 : vector<2x16x16xf32>
    %220 = math.exp %219 : vector<2x16x16xf32>
    %cst_170 = arith.constant dense<0.000000e+00> : vector<2x16xf32>
    %221 = vector.multi_reduction <add>, %220, %cst_170 [2] : vector<2x16x16xf32> to vector<2x16xf32>
    %222 = vector.shape_cast %221 : vector<2x16xf32> to vector<2x16x1xf32>
    %223 = vector.broadcast %222 : vector<2x16x1xf32> to vector<2x16x16xf32>
    %224 = arith.divf %220, %223 : vector<2x16x16xf32>
    %cst_171 = arith.constant dense<0.000000e+00> : vector<2x16x8xf32>
    %225 = tpu.matmul %224, %212, %cst_171 {dimension_numbers = #tpu.dot_dimension_numbers<[2], [1], [1], [2], [0, 0, 0, 1, 1, 2], [0], [0]>} : vector<2x16x16xf32>, vector<2x16x8xf32>, vector<2x16x8xf32> -> vector<2x16x8xf32>
    %226 = vector.shape_cast %225 : vector<2x16x8xf32> to vector<32x8xf32>
    %227 = tpu.concatenate %166, %186, %206, %226 in 1 : vector<32x8xf32>, vector<32x8xf32>, vector<32x8xf32>, vector<32x8xf32> -> vector<32x32xf32>
    %cst_172 = arith.constant dense<0.000000e+00> : vector<32x32xf32>
    %228 = tpu.matmul %227, %116, %cst_172 {dimension_numbers = #tpu.dot_dimension_numbers<[1], [0], [0], [1], [0, 0, 1, 1], [], []>} : vector<32x32xf32>, vector<32x32xf32>, vector<32x32xf32> -> vector<32x32xf32>
    %229 = vector.broadcast %117 : vector<1x32xf32> to vector<32x32xf32>
    %230 = arith.addf %228, %229 : vector<32x32xf32>
    %231 = arith.addf %109, %230 : vector<32x32xf32>
    %cst_173 = arith.constant dense<0.000000e+00> : vector<32xf32>
    %232 = vector.multi_reduction <add>, %231, %cst_173 [1] : vector<32x32xf32> to vector<32xf32>
    %233 = vector.shape_cast %232 : vector<32xf32> to vector<32x1xf32>
    %cst_174 = arith.constant 3.200000e+01 : f32
    %234 = vector.broadcast %cst_174 : f32 to vector<32x1xf32>
    %235 = arith.divf %233, %234 : vector<32x1xf32>
    %236 = vector.broadcast %235 : vector<32x1xf32> to vector<32x32xf32>
    %237 = arith.subf %231, %236 : vector<32x32xf32>
    %238 = arith.mulf %237, %237 : vector<32x32xf32>
    %cst_175 = arith.constant dense<0.000000e+00> : vector<32xf32>
    %239 = vector.multi_reduction <add>, %238, %cst_175 [1] : vector<32x32xf32> to vector<32xf32>
    %240 = vector.shape_cast %239 : vector<32xf32> to vector<32x1xf32>
    %cst_176 = arith.constant 3.200000e+01 : f32
    %241 = vector.broadcast %cst_176 : f32 to vector<32x1xf32>
    %242 = arith.divf %240, %241 : vector<32x1xf32>
    %243 = vector.broadcast %235 : vector<32x1xf32> to vector<32x32xf32>
    %244 = arith.subf %231, %243 : vector<32x32xf32>
    %cst_177 = arith.constant 9.99999974E-6 : f32
    %245 = vector.broadcast %cst_177 : f32 to vector<32x1xf32>
    %246 = arith.addf %242, %245 : vector<32x1xf32>
    %247 = math.rsqrt %246 : vector<32x1xf32>
    %248 = vector.broadcast %247 : vector<32x1xf32> to vector<32x32xf32>
    %249 = arith.mulf %244, %248 : vector<32x32xf32>
    %250 = vector.broadcast %112 : vector<1x32xf32> to vector<32x32xf32>
    %251 = arith.mulf %249, %250 : vector<32x32xf32>
    %252 = vector.broadcast %113 : vector<1x32xf32> to vector<32x32xf32>
    %253 = arith.addf %251, %252 : vector<32x32xf32>
    %cst_178 = arith.constant dense<0.000000e+00> : vector<32x64xf32>
    %254 = tpu.matmul %253, %118, %cst_178 {dimension_numbers = #tpu.dot_dimension_numbers<[1], [0], [0], [1], [0, 0, 1, 1], [], []>} : vector<32x32xf32>, vector<32x64xf32>, vector<32x64xf32> -> vector<32x64xf32>
    %255 = vector.broadcast %119 : vector<1x64xf32> to vector<32x64xf32>
    %256 = arith.addf %254, %255 : vector<32x64xf32>
    %cst_179 = arith.constant 5.000000e-01 : f32
    %257 = vector.broadcast %cst_179 : f32 to vector<32x64xf32>
    %258 = arith.mulf %257, %256 : vector<32x64xf32>
    %cst_180 = arith.constant 4.471500e-02 : f32
    %259 = vector.broadcast %cst_180 : f32 to vector<32x64xf32>
    %260 = arith.mulf %259, %256 : vector<32x64xf32>
    %261 = arith.mulf %260, %256 : vector<32x64xf32>
    %262 = arith.mulf %261, %256 : vector<32x64xf32>
    %263 = arith.addf %256, %262 : vector<32x64xf32>
    %cst_181 = arith.constant 0.797884583 : f32
    %264 = vector.broadcast %cst_181 : f32 to vector<32x64xf32>
    %265 = arith.mulf %264, %263 : vector<32x64xf32>
    %266 = math.tanh %265 : vector<32x64xf32>
    %cst_182 = arith.constant 1.000000e+00 : f32
    %267 = vector.broadcast %cst_182 : f32 to vector<32x64xf32>
    %268 = arith.addf %267, %266 : vector<32x64xf32>
    %269 = arith.mulf %258, %268 : vector<32x64xf32>
    %cst_183 = arith.constant dense<0.000000e+00> : vector<32x32xf32>
    %270 = tpu.matmul %269, %120, %cst_183 {dimension_numbers = #tpu.dot_dimension_numbers<[1], [0], [0], [1], [0, 0, 1, 1], [], []>} : vector<32x64xf32>, vector<64x32xf32>, vector<32x32xf32> -> vector<32x32xf32>
    %271 = vector.broadcast %121 : vector<1x32xf32> to vector<32x32xf32>
    %272 = arith.addf %270, %271 : vector<32x32xf32>
    %273 = arith.addf %231, %272 : vector<32x32xf32>
    %c760 = arith.constant 760 : index
    %c0_184 = arith.constant 0 : index
    %274 = vector.load %arg1[%c760, %c0_184] : memref<968x128xf32, #tpu.memory_space<vmem>>, vector<1x32xf32>
    %c761 = arith.constant 761 : index
    %c0_185 = arith.constant 0 : index
    %275 = vector.load %arg1[%c761, %c0_185] : memref<968x128xf32, #tpu.memory_space<vmem>>, vector<1x32xf32>
    %c762 = arith.constant 762 : index
    %c0_186 = arith.constant 0 : index
    %276 = vector.load %arg1[%c762, %c0_186] : memref<968x128xf32, #tpu.memory_space<vmem>>, vector<1x32xf32>
    %c763 = arith.constant 763 : index
    %c0_187 = arith.constant 0 : index
    %277 = vector.load %arg1[%c763, %c0_187] : memref<968x128xf32, #tpu.memory_space<vmem>>, vector<1x32xf32>
    %c764 = arith.constant 764 : index
    %c0_188 = arith.constant 0 : index
    %278 = vector.load %arg1[%c764, %c0_188] : memref<968x128xf32, #tpu.memory_space<vmem>>, vector<32x96xf32>
    %c796 = arith.constant 796 : index
    %c0_189 = arith.constant 0 : index
    %279 = vector.load %arg1[%c796, %c0_189] : memref<968x128xf32, #tpu.memory_space<vmem>>, vector<1x96xf32>
    %c797 = arith.constant 797 : index
    %c0_190 = arith.constant 0 : index
    %280 = vector.load %arg1[%c797, %c0_190] : memref<968x128xf32, #tpu.memory_space<vmem>>, vector<32x32xf32>
    %c829 = arith.constant 829 : index
    %c0_191 = arith.constant 0 : index
    %281 = vector.load %arg1[%c829, %c0_191] : memref<968x128xf32, #tpu.memory_space<vmem>>, vector<1x32xf32>
    %c830 = arith.constant 830 : index
    %c0_192 = arith.constant 0 : index
    %282 = vector.load %arg1[%c830, %c0_192] : memref<968x128xf32, #tpu.memory_space<vmem>>, vector<32x64xf32>
    %c862 = arith.constant 862 : index
    %c0_193 = arith.constant 0 : index
    %283 = vector.load %arg1[%c862, %c0_193] : memref<968x128xf32, #tpu.memory_space<vmem>>, vector<1x64xf32>
    %c863 = arith.constant 863 : index
    %c0_194 = arith.constant 0 : index
    %284 = vector.load %arg1[%c863, %c0_194] : memref<968x128xf32, #tpu.memory_space<vmem>>, vector<64x32xf32>
    %c927 = arith.constant 927 : index
    %c0_195 = arith.constant 0 : index
    %285 = vector.load %arg1[%c927, %c0_195] : memref<968x128xf32, #tpu.memory_space<vmem>>, vector<1x32xf32>
    %cst_196 = arith.constant dense<0.000000e+00> : vector<32xf32>
    %286 = vector.multi_reduction <add>, %273, %cst_196 [1] : vector<32x32xf32> to vector<32xf32>
    %287 = vector.shape_cast %286 : vector<32xf32> to vector<32x1xf32>
    %cst_197 = arith.constant 3.200000e+01 : f32
    %288 = vector.broadcast %cst_197 : f32 to vector<32x1xf32>
    %289 = arith.divf %287, %288 : vector<32x1xf32>
    %290 = vector.broadcast %289 : vector<32x1xf32> to vector<32x32xf32>
    %291 = arith.subf %273, %290 : vector<32x32xf32>
    %292 = arith.mulf %291, %291 : vector<32x32xf32>
    %cst_198 = arith.constant dense<0.000000e+00> : vector<32xf32>
    %293 = vector.multi_reduction <add>, %292, %cst_198 [1] : vector<32x32xf32> to vector<32xf32>
    %294 = vector.shape_cast %293 : vector<32xf32> to vector<32x1xf32>
    %cst_199 = arith.constant 3.200000e+01 : f32
    %295 = vector.broadcast %cst_199 : f32 to vector<32x1xf32>
    %296 = arith.divf %294, %295 : vector<32x1xf32>
    %297 = vector.broadcast %289 : vector<32x1xf32> to vector<32x32xf32>
    %298 = arith.subf %273, %297 : vector<32x32xf32>
    %cst_200 = arith.constant 9.99999974E-6 : f32
    %299 = vector.broadcast %cst_200 : f32 to vector<32x1xf32>
    %300 = arith.addf %296, %299 : vector<32x1xf32>
    %301 = math.rsqrt %300 : vector<32x1xf32>
    %302 = vector.broadcast %301 : vector<32x1xf32> to vector<32x32xf32>
    %303 = arith.mulf %298, %302 : vector<32x32xf32>
    %304 = vector.broadcast %274 : vector<1x32xf32> to vector<32x32xf32>
    %305 = arith.mulf %303, %304 : vector<32x32xf32>
    %306 = vector.broadcast %275 : vector<1x32xf32> to vector<32x32xf32>
    %307 = arith.addf %305, %306 : vector<32x32xf32>
    %cst_201 = arith.constant dense<0.000000e+00> : vector<32x96xf32>
    %308 = tpu.matmul %307, %278, %cst_201 {dimension_numbers = #tpu.dot_dimension_numbers<[1], [0], [0], [1], [0, 0, 1, 1], [], []>} : vector<32x32xf32>, vector<32x96xf32>, vector<32x96xf32> -> vector<32x96xf32>
    %309 = vector.broadcast %279 : vector<1x96xf32> to vector<32x96xf32>
    %310 = arith.addf %308, %309 : vector<32x96xf32>
    %311 = vector.extract_strided_slice %310 {offsets = [0, 0], sizes = [32, 8], strides = [1, 1]} : vector<32x96xf32> to vector<32x8xf32>
    %312 = vector.shape_cast %311 : vector<32x8xf32> to vector<2x16x8xf32>
    %313 = vector.extract_strided_slice %310 {offsets = [0, 32], sizes = [32, 8], strides = [1, 1]} : vector<32x96xf32> to vector<32x8xf32>
    %314 = vector.shape_cast %313 : vector<32x8xf32> to vector<2x16x8xf32>
    %315 = vector.extract_strided_slice %310 {offsets = [0, 64], sizes = [32, 8], strides = [1, 1]} : vector<32x96xf32> to vector<32x8xf32>
    %316 = vector.shape_cast %315 : vector<32x8xf32> to vector<2x16x8xf32>
    %cst_202 = arith.constant dense<0.000000e+00> : vector<2x16x16xf32>
    %317 = tpu.matmul %312, %314, %cst_202 {dimension_numbers = #tpu.dot_dimension_numbers<[2], [2], [1], [1], [0, 0, 0, 1, 1, 1], [0], [0]>} : vector<2x16x8xf32>, vector<2x16x8xf32>, vector<2x16x16xf32> -> vector<2x16x16xf32>
    %cst_203 = arith.constant 0.353553385 : f32
    %318 = vector.broadcast %cst_203 : f32 to vector<2x16x16xf32>
    %319 = arith.mulf %317, %318 : vector<2x16x16xf32>
    %cst_204 = arith.constant dense<0xFF800000> : vector<2x16xf32>
    %320 = vector.multi_reduction <maximumf>, %319, %cst_204 [2] : vector<2x16x16xf32> to vector<2x16xf32>
    %321 = vector.shape_cast %320 : vector<2x16xf32> to vector<2x16x1xf32>
    %322 = vector.broadcast %321 : vector<2x16x1xf32> to vector<2x16x16xf32>
    %323 = arith.subf %319, %322 : vector<2x16x16xf32>
    %324 = math.exp %323 : vector<2x16x16xf32>
    %cst_205 = arith.constant dense<0.000000e+00> : vector<2x16xf32>
    %325 = vector.multi_reduction <add>, %324, %cst_205 [2] : vector<2x16x16xf32> to vector<2x16xf32>
    %326 = vector.shape_cast %325 : vector<2x16xf32> to vector<2x16x1xf32>
    %327 = vector.broadcast %326 : vector<2x16x1xf32> to vector<2x16x16xf32>
    %328 = arith.divf %324, %327 : vector<2x16x16xf32>
    %cst_206 = arith.constant dense<0.000000e+00> : vector<2x16x8xf32>
    %329 = tpu.matmul %328, %316, %cst_206 {dimension_numbers = #tpu.dot_dimension_numbers<[2], [1], [1], [2], [0, 0, 0, 1, 1, 2], [0], [0]>} : vector<2x16x16xf32>, vector<2x16x8xf32>, vector<2x16x8xf32> -> vector<2x16x8xf32>
    %330 = vector.shape_cast %329 : vector<2x16x8xf32> to vector<32x8xf32>
    %331 = vector.extract_strided_slice %310 {offsets = [0, 8], sizes = [32, 8], strides = [1, 1]} : vector<32x96xf32> to vector<32x8xf32>
    %332 = vector.shape_cast %331 : vector<32x8xf32> to vector<2x16x8xf32>
    %333 = vector.extract_strided_slice %310 {offsets = [0, 40], sizes = [32, 8], strides = [1, 1]} : vector<32x96xf32> to vector<32x8xf32>
    %334 = vector.shape_cast %333 : vector<32x8xf32> to vector<2x16x8xf32>
    %335 = vector.extract_strided_slice %310 {offsets = [0, 72], sizes = [32, 8], strides = [1, 1]} : vector<32x96xf32> to vector<32x8xf32>
    %336 = vector.shape_cast %335 : vector<32x8xf32> to vector<2x16x8xf32>
    %cst_207 = arith.constant dense<0.000000e+00> : vector<2x16x16xf32>
    %337 = tpu.matmul %332, %334, %cst_207 {dimension_numbers = #tpu.dot_dimension_numbers<[2], [2], [1], [1], [0, 0, 0, 1, 1, 1], [0], [0]>} : vector<2x16x8xf32>, vector<2x16x8xf32>, vector<2x16x16xf32> -> vector<2x16x16xf32>
    %cst_208 = arith.constant 0.353553385 : f32
    %338 = vector.broadcast %cst_208 : f32 to vector<2x16x16xf32>
    %339 = arith.mulf %337, %338 : vector<2x16x16xf32>
    %cst_209 = arith.constant dense<0xFF800000> : vector<2x16xf32>
    %340 = vector.multi_reduction <maximumf>, %339, %cst_209 [2] : vector<2x16x16xf32> to vector<2x16xf32>
    %341 = vector.shape_cast %340 : vector<2x16xf32> to vector<2x16x1xf32>
    %342 = vector.broadcast %341 : vector<2x16x1xf32> to vector<2x16x16xf32>
    %343 = arith.subf %339, %342 : vector<2x16x16xf32>
    %344 = math.exp %343 : vector<2x16x16xf32>
    %cst_210 = arith.constant dense<0.000000e+00> : vector<2x16xf32>
    %345 = vector.multi_reduction <add>, %344, %cst_210 [2] : vector<2x16x16xf32> to vector<2x16xf32>
    %346 = vector.shape_cast %345 : vector<2x16xf32> to vector<2x16x1xf32>
    %347 = vector.broadcast %346 : vector<2x16x1xf32> to vector<2x16x16xf32>
    %348 = arith.divf %344, %347 : vector<2x16x16xf32>
    %cst_211 = arith.constant dense<0.000000e+00> : vector<2x16x8xf32>
    %349 = tpu.matmul %348, %336, %cst_211 {dimension_numbers = #tpu.dot_dimension_numbers<[2], [1], [1], [2], [0, 0, 0, 1, 1, 2], [0], [0]>} : vector<2x16x16xf32>, vector<2x16x8xf32>, vector<2x16x8xf32> -> vector<2x16x8xf32>
    %350 = vector.shape_cast %349 : vector<2x16x8xf32> to vector<32x8xf32>
    %351 = vector.extract_strided_slice %310 {offsets = [0, 16], sizes = [32, 8], strides = [1, 1]} : vector<32x96xf32> to vector<32x8xf32>
    %352 = vector.shape_cast %351 : vector<32x8xf32> to vector<2x16x8xf32>
    %353 = vector.extract_strided_slice %310 {offsets = [0, 48], sizes = [32, 8], strides = [1, 1]} : vector<32x96xf32> to vector<32x8xf32>
    %354 = vector.shape_cast %353 : vector<32x8xf32> to vector<2x16x8xf32>
    %355 = vector.extract_strided_slice %310 {offsets = [0, 80], sizes = [32, 8], strides = [1, 1]} : vector<32x96xf32> to vector<32x8xf32>
    %356 = vector.shape_cast %355 : vector<32x8xf32> to vector<2x16x8xf32>
    %cst_212 = arith.constant dense<0.000000e+00> : vector<2x16x16xf32>
    %357 = tpu.matmul %352, %354, %cst_212 {dimension_numbers = #tpu.dot_dimension_numbers<[2], [2], [1], [1], [0, 0, 0, 1, 1, 1], [0], [0]>} : vector<2x16x8xf32>, vector<2x16x8xf32>, vector<2x16x16xf32> -> vector<2x16x16xf32>
    %cst_213 = arith.constant 0.353553385 : f32
    %358 = vector.broadcast %cst_213 : f32 to vector<2x16x16xf32>
    %359 = arith.mulf %357, %358 : vector<2x16x16xf32>
    %cst_214 = arith.constant dense<0xFF800000> : vector<2x16xf32>
    %360 = vector.multi_reduction <maximumf>, %359, %cst_214 [2] : vector<2x16x16xf32> to vector<2x16xf32>
    %361 = vector.shape_cast %360 : vector<2x16xf32> to vector<2x16x1xf32>
    %362 = vector.broadcast %361 : vector<2x16x1xf32> to vector<2x16x16xf32>
    %363 = arith.subf %359, %362 : vector<2x16x16xf32>
    %364 = math.exp %363 : vector<2x16x16xf32>
    %cst_215 = arith.constant dense<0.000000e+00> : vector<2x16xf32>
    %365 = vector.multi_reduction <add>, %364, %cst_215 [2] : vector<2x16x16xf32> to vector<2x16xf32>
    %366 = vector.shape_cast %365 : vector<2x16xf32> to vector<2x16x1xf32>
    %367 = vector.broadcast %366 : vector<2x16x1xf32> to vector<2x16x16xf32>
    %368 = arith.divf %364, %367 : vector<2x16x16xf32>
    %cst_216 = arith.constant dense<0.000000e+00> : vector<2x16x8xf32>
    %369 = tpu.matmul %368, %356, %cst_216 {dimension_numbers = #tpu.dot_dimension_numbers<[2], [1], [1], [2], [0, 0, 0, 1, 1, 2], [0], [0]>} : vector<2x16x16xf32>, vector<2x16x8xf32>, vector<2x16x8xf32> -> vector<2x16x8xf32>
    %370 = vector.shape_cast %369 : vector<2x16x8xf32> to vector<32x8xf32>
    %371 = vector.extract_strided_slice %310 {offsets = [0, 24], sizes = [32, 8], strides = [1, 1]} : vector<32x96xf32> to vector<32x8xf32>
    %372 = vector.shape_cast %371 : vector<32x8xf32> to vector<2x16x8xf32>
    %373 = vector.extract_strided_slice %310 {offsets = [0, 56], sizes = [32, 8], strides = [1, 1]} : vector<32x96xf32> to vector<32x8xf32>
    %374 = vector.shape_cast %373 : vector<32x8xf32> to vector<2x16x8xf32>
    %375 = vector.extract_strided_slice %310 {offsets = [0, 88], sizes = [32, 8], strides = [1, 1]} : vector<32x96xf32> to vector<32x8xf32>
    %376 = vector.shape_cast %375 : vector<32x8xf32> to vector<2x16x8xf32>
    %cst_217 = arith.constant dense<0.000000e+00> : vector<2x16x16xf32>
    %377 = tpu.matmul %372, %374, %cst_217 {dimension_numbers = #tpu.dot_dimension_numbers<[2], [2], [1], [1], [0, 0, 0, 1, 1, 1], [0], [0]>} : vector<2x16x8xf32>, vector<2x16x8xf32>, vector<2x16x16xf32> -> vector<2x16x16xf32>
    %cst_218 = arith.constant 0.353553385 : f32
    %378 = vector.broadcast %cst_218 : f32 to vector<2x16x16xf32>
    %379 = arith.mulf %377, %378 : vector<2x16x16xf32>
    %cst_219 = arith.constant dense<0xFF800000> : vector<2x16xf32>
    %380 = vector.multi_reduction <maximumf>, %379, %cst_219 [2] : vector<2x16x16xf32> to vector<2x16xf32>
    %381 = vector.shape_cast %380 : vector<2x16xf32> to vector<2x16x1xf32>
    %382 = vector.broadcast %381 : vector<2x16x1xf32> to vector<2x16x16xf32>
    %383 = arith.subf %379, %382 : vector<2x16x16xf32>
    %384 = math.exp %383 : vector<2x16x16xf32>
    %cst_220 = arith.constant dense<0.000000e+00> : vector<2x16xf32>
    %385 = vector.multi_reduction <add>, %384, %cst_220 [2] : vector<2x16x16xf32> to vector<2x16xf32>
    %386 = vector.shape_cast %385 : vector<2x16xf32> to vector<2x16x1xf32>
    %387 = vector.broadcast %386 : vector<2x16x1xf32> to vector<2x16x16xf32>
    %388 = arith.divf %384, %387 : vector<2x16x16xf32>
    %cst_221 = arith.constant dense<0.000000e+00> : vector<2x16x8xf32>
    %389 = tpu.matmul %388, %376, %cst_221 {dimension_numbers = #tpu.dot_dimension_numbers<[2], [1], [1], [2], [0, 0, 0, 1, 1, 2], [0], [0]>} : vector<2x16x16xf32>, vector<2x16x8xf32>, vector<2x16x8xf32> -> vector<2x16x8xf32>
    %390 = vector.shape_cast %389 : vector<2x16x8xf32> to vector<32x8xf32>
    %391 = tpu.concatenate %330, %350, %370, %390 in 1 : vector<32x8xf32>, vector<32x8xf32>, vector<32x8xf32>, vector<32x8xf32> -> vector<32x32xf32>
    %cst_222 = arith.constant dense<0.000000e+00> : vector<32x32xf32>
    %392 = tpu.matmul %391, %280, %cst_222 {dimension_numbers = #tpu.dot_dimension_numbers<[1], [0], [0], [1], [0, 0, 1, 1], [], []>} : vector<32x32xf32>, vector<32x32xf32>, vector<32x32xf32> -> vector<32x32xf32>
    %393 = vector.broadcast %281 : vector<1x32xf32> to vector<32x32xf32>
    %394 = arith.addf %392, %393 : vector<32x32xf32>
    %395 = arith.addf %273, %394 : vector<32x32xf32>
    %cst_223 = arith.constant dense<0.000000e+00> : vector<32xf32>
    %396 = vector.multi_reduction <add>, %395, %cst_223 [1] : vector<32x32xf32> to vector<32xf32>
    %397 = vector.shape_cast %396 : vector<32xf32> to vector<32x1xf32>
    %cst_224 = arith.constant 3.200000e+01 : f32
    %398 = vector.broadcast %cst_224 : f32 to vector<32x1xf32>
    %399 = arith.divf %397, %398 : vector<32x1xf32>
    %400 = vector.broadcast %399 : vector<32x1xf32> to vector<32x32xf32>
    %401 = arith.subf %395, %400 : vector<32x32xf32>
    %402 = arith.mulf %401, %401 : vector<32x32xf32>
    %cst_225 = arith.constant dense<0.000000e+00> : vector<32xf32>
    %403 = vector.multi_reduction <add>, %402, %cst_225 [1] : vector<32x32xf32> to vector<32xf32>
    %404 = vector.shape_cast %403 : vector<32xf32> to vector<32x1xf32>
    %cst_226 = arith.constant 3.200000e+01 : f32
    %405 = vector.broadcast %cst_226 : f32 to vector<32x1xf32>
    %406 = arith.divf %404, %405 : vector<32x1xf32>
    %407 = vector.broadcast %399 : vector<32x1xf32> to vector<32x32xf32>
    %408 = arith.subf %395, %407 : vector<32x32xf32>
    %cst_227 = arith.constant 9.99999974E-6 : f32
    %409 = vector.broadcast %cst_227 : f32 to vector<32x1xf32>
    %410 = arith.addf %406, %409 : vector<32x1xf32>
    %411 = math.rsqrt %410 : vector<32x1xf32>
    %412 = vector.broadcast %411 : vector<32x1xf32> to vector<32x32xf32>
    %413 = arith.mulf %408, %412 : vector<32x32xf32>
    %414 = vector.broadcast %276 : vector<1x32xf32> to vector<32x32xf32>
    %415 = arith.mulf %413, %414 : vector<32x32xf32>
    %416 = vector.broadcast %277 : vector<1x32xf32> to vector<32x32xf32>
    %417 = arith.addf %415, %416 : vector<32x32xf32>
    %cst_228 = arith.constant dense<0.000000e+00> : vector<32x64xf32>
    %418 = tpu.matmul %417, %282, %cst_228 {dimension_numbers = #tpu.dot_dimension_numbers<[1], [0], [0], [1], [0, 0, 1, 1], [], []>} : vector<32x32xf32>, vector<32x64xf32>, vector<32x64xf32> -> vector<32x64xf32>
    %419 = vector.broadcast %283 : vector<1x64xf32> to vector<32x64xf32>
    %420 = arith.addf %418, %419 : vector<32x64xf32>
    %cst_229 = arith.constant 5.000000e-01 : f32
    %421 = vector.broadcast %cst_229 : f32 to vector<32x64xf32>
    %422 = arith.mulf %421, %420 : vector<32x64xf32>
    %cst_230 = arith.constant 4.471500e-02 : f32
    %423 = vector.broadcast %cst_230 : f32 to vector<32x64xf32>
    %424 = arith.mulf %423, %420 : vector<32x64xf32>
    %425 = arith.mulf %424, %420 : vector<32x64xf32>
    %426 = arith.mulf %425, %420 : vector<32x64xf32>
    %427 = arith.addf %420, %426 : vector<32x64xf32>
    %cst_231 = arith.constant 0.797884583 : f32
    %428 = vector.broadcast %cst_231 : f32 to vector<32x64xf32>
    %429 = arith.mulf %428, %427 : vector<32x64xf32>
    %430 = math.tanh %429 : vector<32x64xf32>
    %cst_232 = arith.constant 1.000000e+00 : f32
    %431 = vector.broadcast %cst_232 : f32 to vector<32x64xf32>
    %432 = arith.addf %431, %430 : vector<32x64xf32>
    %433 = arith.mulf %422, %432 : vector<32x64xf32>
    %cst_233 = arith.constant dense<0.000000e+00> : vector<32x32xf32>
    %434 = tpu.matmul %433, %284, %cst_233 {dimension_numbers = #tpu.dot_dimension_numbers<[1], [0], [0], [1], [0, 0, 1, 1], [], []>} : vector<32x64xf32>, vector<64x32xf32>, vector<32x32xf32> -> vector<32x32xf32>
    %435 = vector.broadcast %285 : vector<1x32xf32> to vector<32x32xf32>
    %436 = arith.addf %434, %435 : vector<32x32xf32>
    %437 = arith.addf %395, %436 : vector<32x32xf32>
    %c928 = arith.constant 928 : index
    %c0_234 = arith.constant 0 : index
    %438 = vector.load %arg1[%c928, %c0_234] : memref<968x128xf32, #tpu.memory_space<vmem>>, vector<1x32xf32>
    %c929 = arith.constant 929 : index
    %c0_235 = arith.constant 0 : index
    %439 = vector.load %arg1[%c929, %c0_235] : memref<968x128xf32, #tpu.memory_space<vmem>>, vector<1x1xf32>
    %c930 = arith.constant 930 : index
    %c0_236 = arith.constant 0 : index
    %440 = vector.load %arg1[%c930, %c0_236] : memref<968x128xf32, #tpu.memory_space<vmem>>, vector<32x128xf32>
    %c962 = arith.constant 962 : index
    %c0_237 = arith.constant 0 : index
    %441 = vector.load %arg1[%c962, %c0_237] : memref<968x128xf32, #tpu.memory_space<vmem>>, vector<1x128xf32>
    %442 = vector.broadcast %438 : vector<1x32xf32> to vector<32x32xf32>
    %443 = arith.mulf %437, %442 : vector<32x32xf32>
    %cst_238 = arith.constant dense<0.000000e+00> : vector<32xf32>
    %444 = vector.multi_reduction <add>, %443, %cst_238 [1] : vector<32x32xf32> to vector<32xf32>
    %445 = vector.shape_cast %444 : vector<32xf32> to vector<32x1xf32>
    %446 = vector.broadcast %439 : vector<1x1xf32> to vector<32x1xf32>
    %447 = arith.addf %445, %446 : vector<32x1xf32>
    %448 = vector.shape_cast %447 : vector<32x1xf32> to vector<2x16x1xf32>
    %cst_239 = arith.constant dense<0xFF800000> : vector<2x1xf32>
    %449 = vector.multi_reduction <maximumf>, %448, %cst_239 [1] : vector<2x16x1xf32> to vector<2x1xf32>
    %450 = vector.shape_cast %449 : vector<2x1xf32> to vector<2x1x1xf32>
    %451 = vector.broadcast %450 : vector<2x1x1xf32> to vector<2x16x1xf32>
    %452 = arith.subf %448, %451 : vector<2x16x1xf32>
    %453 = math.exp %452 : vector<2x16x1xf32>
    %cst_240 = arith.constant dense<0.000000e+00> : vector<2x1xf32>
    %454 = vector.multi_reduction <add>, %453, %cst_240 [1] : vector<2x16x1xf32> to vector<2x1xf32>
    %455 = vector.shape_cast %454 : vector<2x1xf32> to vector<2x1x1xf32>
    %456 = vector.broadcast %455 : vector<2x1x1xf32> to vector<2x16x1xf32>
    %457 = arith.divf %453, %456 : vector<2x16x1xf32>
    %458 = vector.shape_cast %437 : vector<32x32xf32> to vector<2x16x32xf32>
    %459 = vector.broadcast %457 : vector<2x16x1xf32> to vector<2x16x32xf32>
    %460 = arith.mulf %459, %458 : vector<2x16x32xf32>
    %cst_241 = arith.constant dense<0.000000e+00> : vector<2x32xf32>
    %461 = vector.multi_reduction <add>, %460, %cst_241 [1] : vector<2x16x32xf32> to vector<2x32xf32>
    %cst_242 = arith.constant dense<0.000000e+00> : vector<2x128xf32>
    %462 = tpu.matmul %461, %440, %cst_242 {dimension_numbers = #tpu.dot_dimension_numbers<[1], [0], [0], [1], [0, 0, 1, 1], [], []>} : vector<2x32xf32>, vector<32x128xf32>, vector<2x128xf32> -> vector<2x128xf32>
    %463 = vector.broadcast %441 : vector<1x128xf32> to vector<2x128xf32>
    %464 = arith.addf %462, %463 : vector<2x128xf32>
    %c0_243 = arith.constant 0 : index
    %c0_244 = arith.constant 0 : index
    %465 = vector.load %arg2[%c0_243, %c0_244] : memref<2x128xf32, #tpu.memory_space<vmem>>, vector<2x128xf32>
    tpu.vector_store %arg2[%c0_243, %c0_244], %464 {strides = array<i32>} : memref<2x128xf32, #tpu.memory_space<vmem>>, vector<2x128xf32>,
    return
  }
}

</mosaic_0001>

<bundles_post_ra>
// kernel: our_cct_forward.1
= control target key start
LH: loop header
LB: loop body
LE: loop exit
PB: predicated region body
PF: predicated region fallthrough
CT: control target
= control target key end

     0   :  { %7 = vsyncpa [#allocation6], 0  ;;  %s8165_s0 = inlined_call_operand.vmem [shape: f32[40,64], index: 0, kind: input, shape index: {}]   ;;  %s8166_s1 = inlined_call_operand.hbm [shape: f32[968,128], index: 1, kind: input, shape index: {}]   ;;  %s8167_s2 = inlined_call_operand.hbm [shape: f32[2,128], index: 2, kind: output, shape index: {}]  }
   0x1   :  { %8 = vsyncpa [#allocation7], 0  ;;  %s7257_s9 = smov [#allocation5]  }
   0x2   :  { %s16_s10 = sshll.u32 %s7257_s9, 4  ;;  %s17_s10 = int_to_ptr.vmem [resolvable:$true] %s16_s10 }
   0x3   :  { %s7221_s11 = scalar_lea.vmem %s17_s10, 15488  ;;  %p7226_p1 = scmp.lt.s32.totalorder %s17_s10, %s17_s10 }
   0x4   :  { %p7222_p0 = scmp.ne.s32.totalorder %s17_s10, %s7221_s11  ;;  %p7227_p2 = scmp.lt.s32.totalorder %s7221_s11, %s7221_s11 }
   0x6   :  { %p7228_p3 = por %p7227_p2, %p7226_p1 }
   0x8   :  { %p7229_p4 = pnand %p7228_p3, %p7222_p0 }
   0xa   :  { %7232 = shalt.err (!%p7229_p4)
}
   0xb   :  { %s7258_s12 = smov 128   ;;  %s7259_s13 = smov 8  }
   0xc   :  { %22 = dma.hbm_to_vmem [thread:$0]  %s8166_s1, 15488, %s17_s10, [#allocation6], %s7258_s12, %s7258_s12, %s7259_s13  }
   0xd   :  { %7253 = dma.done.wait [#allocation6], 15488  }
   0xe   :  { %7254 = vsyncadd [#allocation6], 4294951808  ;;  %v53_v0 = vld [vmem:[#allocation5 + $0xf8] sm:$0xff]  ;;  %v52_v2 = vld [vmem:[#allocation5 + $0xf0] sm:$0xff]  ;;  %vm54_vm0 = vcmask 523264   ;;  %s7261_s11 = smov 96  }
   0xf   :  { %v45_v1 = vld [vmem:[#allocation5 + $0x38] sm:$0xff]  ;;  %6441 = vmatprep.subr.mxu0 %v53_v0  ;;  %v44_v3 = vld [vmem:[#allocation5 + $0x30] sm:$0xff]  ;;  %v51_v4 = vld [vmem:[#allocation5 + $0xe8] sm:$0xff]  ;;  %s7262_s12 = smov 64   ;;  %vm973_vm1 = vcmask 253952   ;;  %vm1171_vm2 = vcmask 261120  }
  0x10   :  { %6463 = vmatprep.subr.mxu1 %v45_v1  ;;  %6442 = vmatpush3.msra.mxu0 %v53_v0  ;;  %v43_v5 = vld [vmem:[#allocation5 + $0x28] sm:$0xff]  ;;  %v50_v6 = vld [vmem:[#allocation5 + $0xe0] sm:$0xff]  ;;  %v49_v8 = vld [vmem:[#allocation5 + $0xd8] sm:$0xff]  ;;  %vm1348_vm3 = vcmask 64512   ;;  %vm1525_vm4 = vcmask 130048   ;;  %s7263_s14 = smov 88  }
  0x11   :  { %6464 = vmatpush3.msra.mxu1 %v45_v1  ;;  %6443 = vmatprep.subr.mxu0 %v52_v2  ;;  %v42_v7 = vld [vmem:[#allocation5 + $0x20] sm:$0xff]  ;;  %v41_v9 = vld [vmem:[#allocation5 + $0x18] sm:$0xff]  ;;  %v48_v10 = vld [vmem:[#allocation5 + $0xd0] sm:$0xff]  ;;  %s7264_s15 = smov 120   ;;  %s7265_s1 = smov 56   ;;  %vm3012_vm5 = vcmask 195584  }
  0x12   :  { %6465 = vmatprep.subr.mxu1 %v44_v3  ;;  %6444 = vmatpush3.msra.mxu0 %v52_v2  ;;  %v40_v11 = vld [vmem:[#allocation5 + $0x10] sm:$0xff]  ;;  %v47_v12 = vld [vmem:[#allocation5 + $0xc8] sm:$0xff]  ;;  %v46_v14 = vld [vmem:[#allocation5 + $0xc0] sm:$0xff]  ;;  %s7266_s16 = smov 80   ;;  %s7267_s17 = smov 112   ;;  %vm5751_vm6 = vcmask 7168  }
  0x13   :  { %6466 = vmatpush3.msra.mxu1 %v44_v3  ;;  %6445 = vmatprep.subr.mxu0 %v51_v4  ;;  %v39_v13 = vld [vmem:[#allocation5 + $0x8] sm:$0xff]  ;;  %v38_v15 = vld [vmem:[#allocation5] sm:$0xff]  ;;  %v256_v20 = vld [vmem:[#allocation5 + $0x1b8] sm:$0xff]  ;;  %s7268_s18 = smov 48   ;;  %s7269_s19 = smov 72   ;;  %vm7276_vm7 = vmmov 0  }
  0x14   :  { %6467 = vmatprep.subr.mxu1 %v43_v5  ;;  %6446 = vmatpush3.msra.mxu0 %v51_v4  ;;  %v7300_v16 = vld [vmem:[%s8165_s0 + $0x1] sm:$0xff]  ;;  %v7310_v18 = vld [vmem:[%s8165_s0 + $0x9] sm:$0xff]  ;;  %v377_v21 = vld [vmem:[#allocation5 + $0x138] sm:$0xff]  ;;  %s7270_s20 = smov 104   ;;  %s7271_s21 = smov 40   ;;  %vm5854_vm8 = vcmask 1041409  }
  0x15   :  { %6468 = vmatpush3.msra.mxu1 %v43_v5  ;;  %6447 = vmatprep.subr.mxu0 %v50_v6  ;;  %v7305_v17 = vld [vmem:[%s8165_s0] sm:$0xff]  ;;  %v7315_v19 = vld [vmem:[%s8165_s0 + $0x8] sm:$0xff]  ;;  %v255_v22 = vld [vmem:[#allocation5 + $0x1b0] sm:$0xff]  ;;  %s7272_s22 = smov 16   ;;  %s7273_s23 = smov 24  }
  0x16   :  { %6469 = vmatprep.subr.mxu1 %v42_v7  ;;  %6448 = vmatpush3.msra.mxu0 %v50_v6  ;;  %v376_v23 = vld [vmem:[#allocation5 + $0x130] sm:$0xff]  ;;  %v254_v24 = vld [vmem:[#allocation5 + $0x1a8] sm:$0xff]  ;;  %v253_v26 = vld [vmem:[#allocation5 + $0x1a0] sm:$0xff] }
  0x17   :  { %6470 = vmatpush3.msra.mxu1 %v42_v7  ;;  %6449 = vmatprep.subr.mxu0 %v49_v8  ;;  %v375_v25 = vld [vmem:[#allocation5 + $0x128] sm:$0xff]  ;;  %v374_v27 = vld [vmem:[#allocation5 + $0x120] sm:$0xff]  ;;  %v252_v28 = vld [vmem:[#allocation5 + $0x198] sm:$0xff] }
  0x18   :  { %6471 = vmatprep.subr.mxu1 %v41_v9  ;;  %6450 = vmatpush3.msra.mxu0 %v49_v8  ;;  %v373_v29 = vld [vmem:[#allocation5 + $0x118] sm:$0xff]  ;;  %v7333_v31 = vld [vmem:[%s8165_s0 + $0x10] sm:$0xff]  ;;  %v250_v36 = vld [vmem:[#allocation5 + $0x188] sm:$0xff] }
  0x19   :  { %6472 = vmatpush3.msra.mxu1 %v41_v9  ;;  %6451 = vmatprep.subr.mxu0 %v48_v10  ;;  %v7328_v30 = vld [vmem:[%s8165_s0 + $0x11] sm:$0xff]  ;;  %v7338_v34 = vld [vmem:[%s8165_s0 + $0x19] sm:$0xff]  ;;  %v371_v37 = vld [vmem:[#allocation5 + $0x108] sm:$0xff] }
  0x1a   :  { %6473 = vmatprep.subr.mxu1 %v40_v11  ;;  %6452 = vmatpush3.msra.mxu0 %v48_v10  ;;  %v251_v32 = vld [vmem:[#allocation5 + $0x190] sm:$0xff]  ;;  %v7343_v35 = vld [vmem:[%s8165_s0 + $0x18] sm:$0xff]  ;;  %v249_v38 = vld [vmem:[#allocation5 + $0x180] sm:$0xff] }
  0x1b   :  { %6474 = vmatpush3.msra.mxu1 %v40_v11  ;;  %6453 = vmatprep.subr.mxu0 %v47_v12  ;;  %v372_v33 = vld [vmem:[#allocation5 + $0x110] sm:$0xff]  ;;  %v370_v39 = vld [vmem:[#allocation5 + $0x100] sm:$0xff]  ;;  %v369_v42 = vld [vmem:[#allocation5 + $0x78] sm:$0xff] }
  0x1c   :  { %6475 = vmatprep.subr.mxu1 %v39_v13  ;;  %6454 = vmatpush3.msra.mxu0 %v47_v12  ;;  %v7356_v40 = vld [vmem:[%s8165_s0 + $0x2] sm:$0xff]  ;;  %v7361_v41 = vld [vmem:[%s8165_s0 + $0xa] sm:$0xff]  ;;  %v555_v43 = vld [vmem:[#allocation5 + $0x1f8] sm:$0xff] }
  0x1d   :  { %6476 = vmatpush3.msra.mxu1 %v39_v13  ;;  %6455 = vmatprep.subr.mxu0 %v46_v14  ;;  %v368_v44 = vld [vmem:[#allocation5 + $0x70] sm:$0xff]  ;;  %v7379_v47 = vld [vmem:[%s8165_s0 + $0x1a] sm:$0xff]  ;;  %v367_v48 = vld [vmem:[#allocation5 + $0x68] sm:$0xff] }
  0x1e   :  { %6477 = vmatprep.subr.mxu1 %v38_v15  ;;  %6456 = vmatpush3.msra.mxu0 %v46_v14  ;;  %v554_v45 = vld [vmem:[#allocation5 + $0x1f0] sm:$0xff]  ;;  %v553_v49 = vld [vmem:[#allocation5 + $0x1e8] sm:$0xff]  ;;  %v366_v50 = vld [vmem:[#allocation5 + $0x60] sm:$0xff] }
  0x1f   :  { %6457 = vmatprep.mubr.msk.f32.mxu0 %vm54_vm0, %v7300_v16  ;;  %6478 = vmatpush3.msra.mxu1 %v38_v15  ;;  %v7374_v46 = vld [vmem:[%s8165_s0 + $0x12] sm:$0xff]  ;;  %v552_v51 = vld [vmem:[#allocation5 + $0x1e0] sm:$0xff]  ;;  %v363_v56 = vld [vmem:[#allocation5 + $0x48] sm:$0xff]  ;;  %s7260_s0 = smov 32  }
  0x20   :  { %6479 = vmatprep.mubr.msk.f32.mxu1 %vm54_vm0, %v7305_v17  ;;  %6458 = vmatmul.mubr.msk.f32.vlgmr.msra.gmra.mxu0 %vm54_vm0, %v7310_v18  ;;  %v365_v52 = vld [vmem:[#allocation5 + $0x58] sm:$0xff]  ;;  %v364_v54 = vld [vmem:[#allocation5 + $0x50] sm:$0xff]  ;;  %v549_v57 = vld [vmem:[#allocation5 + $0x1c8] sm:$0xff] }
  0x21   :  { %6480 = vmatmul.mubr.msk.f32.vlgmr.msra.gmra.mxu1 %vm54_vm0, %v7315_v19  ;;  %6485 = vmatprep.subr.mxu0 %v256_v20  ;;  %v551_v53 = vld [vmem:[#allocation5 + $0x1d8] sm:$0xff]  ;;  %v550_v55 = vld [vmem:[#allocation5 + $0x1d0] sm:$0xff]  ;;  %v362_v58 = vld [vmem:[#allocation5 + $0x40] sm:$0xff] }
  0x22   :  { %6507 = vmatprep.subr.mxu1 %v377_v21  ;;  %6486 = vmatpush3.msra.mxu0 %v256_v20  ;;  %v548_v59 = vld [vmem:[#allocation5 + $0x1c0] sm:$0xff]  ;;  %v668_v60 = vld [vmem:[#allocation5 + $0x178] sm:$0xff]  ;;  %v667_v62 = vld [vmem:[#allocation5 + $0x170] sm:$0xff] }
  0x23   :  { %6508 = vmatpush3.msra.mxu1 %v377_v21  ;;  %6487 = vmatprep.subr.mxu0 %v255_v22  ;;  %v660_v61 = vld [vmem:[#allocation5 + $0xb8] sm:$0xff]  ;;  %v659_v63 = vld [vmem:[#allocation5 + $0xb0] sm:$0xff]  ;;  %v666_v0 = vld [vmem:[#allocation5 + $0x168] sm:$0xff] }
  0x24   :  { %6509 = vmatprep.subr.mxu1 %v376_v23  ;;  %6488 = vmatpush3.msra.mxu0 %v255_v22  ;;  %v658_v1 = vld [vmem:[#allocation5 + $0xa8] sm:$0xff]  ;;  %v665_v2 = vld [vmem:[#allocation5 + $0x160] sm:$0xff]  ;;  %v664_v4 = vld [vmem:[#allocation5 + $0x158] sm:$0xff] }
  0x25   :  { %6510 = vmatpush3.msra.mxu1 %v376_v23  ;;  %6489 = vmatprep.subr.mxu0 %v254_v24  ;;  %v657_v3 = vld [vmem:[#allocation5 + $0xa0] sm:$0xff]  ;;  %v656_v5 = vld [vmem:[#allocation5 + $0x98] sm:$0xff]  ;;  %v663_v6 = vld [vmem:[#allocation5 + $0x150] sm:$0xff] }
  0x26   :  { %6511 = vmatprep.subr.mxu1 %v375_v25  ;;  %6490 = vmatpush3.msra.mxu0 %v254_v24  ;;  %v655_v7 = vld [vmem:[#allocation5 + $0x90] sm:$0xff]  ;;  %v662_v8 = vld [vmem:[#allocation5 + $0x148] sm:$0xff]  ;;  %v661_v10 = vld [vmem:[#allocation5 + $0x140] sm:$0xff] }
  0x27   :  { %6512 = vmatpush3.msra.mxu1 %v375_v25  ;;  %6491 = vmatprep.subr.mxu0 %v253_v26  ;;  %v654_v9 = vld [vmem:[#allocation5 + $0x88] sm:$0xff]  ;;  %v653_v11 = vld [vmem:[#allocation5 + $0x80] sm:$0xff]  ;;  %v846_v12 = vld [vmem:[#allocation5 + $0x238] sm:$0xff] }
  0x28   :  { %6513 = vmatprep.subr.mxu1 %v374_v27  ;;  %6492 = vmatpush3.msra.mxu0 %v253_v26  ;;  %v845_v13 = vld [vmem:[#allocation5 + $0x230] sm:$0xff]  ;;  %v844_v14 = vld [vmem:[#allocation5 + $0x228] sm:$0xff]  ;;  %v843_v15 = vld [vmem:[#allocation5 + $0x220] sm:$0xff] }
  0x29   :  { %6514 = vmatpush3.msra.mxu1 %v374_v27  ;;  %6493 = vmatprep.subr.mxu0 %v252_v28 }
  0x2a   :  { %6515 = vmatprep.subr.mxu1 %v373_v29  ;;  %6494 = vmatpush3.msra.mxu0 %v252_v28 }
  0x2b   :  { %6516 = vmatpush3.msra.mxu1 %v373_v29  ;;  %6460 = vmatprep.mubr.msk.f32.mxu0 %vm54_vm0, %v7328_v30 }
  0x2c   :  { %6482 = vmatprep.mubr.msk.f32.mxu1 %vm54_vm0, %v7333_v31  ;;  %6495 = vmatprep.subr.mxu0 %v251_v32 }
  0x2d   :  { %6517 = vmatprep.subr.mxu1 %v372_v33  ;;  %6461 = vmatmul.mubr.msk.f32.gmra.mxu0 %vm54_vm0, %v7338_v34 }
  0x2e   :  { %6483 = vmatmul.mubr.msk.f32.gmra.mxu1 %vm54_vm0, %v7343_v35  ;;  %6496 = vmatpush3.msra.mxu0 %v251_v32 }
  0x2f   :  { %6518 = vmatpush3.msra.mxu1 %v372_v33  ;;  %6497 = vmatprep.subr.mxu0 %v250_v36 }
  0x30   :  { %6519 = vmatprep.subr.mxu1 %v371_v37  ;;  %6498 = vmatpush3.msra.mxu0 %v250_v36 }
  0x31   :  { %6520 = vmatpush3.msra.mxu1 %v371_v37  ;;  %6499 = vmatprep.subr.mxu0 %v249_v38 }
  0x32   :  { %6521 = vmatprep.subr.mxu1 %v370_v39  ;;  %6500 = vmatpush3.msra.mxu0 %v249_v38 }
  0x33   :  { %6501 = vmatprep.mubr.msk.f32.mxu0 %vm54_vm0, %v7356_v40  ;;  %6522 = vmatpush3.msra.mxu1 %v370_v39 }
  0x34   :  { %6502 = vmatmul.mubr.msk.f32.vlgmr.msra.gmra.mxu0 %vm54_vm0, %v7361_v41  ;;  %6523 = vmatprep.mubr.msk.f32.mxu1 %vm54_vm0, %v7300_v16 }
  0x35   :  { %6529 = vmatprep.subr.mxu0 %v369_v42  ;;  %6551 = vmatprep.subr.mxu1 %v555_v43 }
  0x36   :  { %6524 = vmatmul.mubr.msk.f32.vlgmr.msra.gmra.mxu1 %vm54_vm0, %v7310_v18  ;;  %6530 = vmatpush3.msra.mxu0 %v369_v42 }
  0x37   :  { %6552 = vmatpush3.msra.mxu1 %v555_v43  ;;  %6531 = vmatprep.subr.mxu0 %v368_v44 }
  0x38   :  { %6553 = vmatprep.subr.mxu1 %v554_v45  ;;  %6504 = vmatprep.mubr.msk.f32.mxu0 %vm54_vm0, %v7374_v46 }
  0x39   :  { %6532 = vmatpush3.msra.mxu0 %v368_v44  ;;  %6554 = vmatpush3.msra.mxu1 %v554_v45 }
  0x3a   :  { %6505 = vmatmul.mubr.msk.f32.gmra.mxu0 %vm54_vm0, %v7379_v47  ;;  %6533 = vmatprep.subr.mxu0 %v367_v48 }
  0x3b   :  { %6555 = vmatprep.subr.mxu1 %v553_v49  ;;  %6534 = vmatpush3.msra.mxu0 %v367_v48 }
  0x3c   :  { %6556 = vmatpush3.msra.mxu1 %v553_v49  ;;  %6535 = vmatprep.subr.mxu0 %v366_v50 }
  0x3d   :  { %6557 = vmatprep.subr.mxu1 %v552_v51  ;;  %6536 = vmatpush3.msra.mxu0 %v366_v50 }
  0x3e   :  { %6558 = vmatpush3.msra.mxu1 %v552_v51  ;;  %6537 = vmatprep.subr.mxu0 %v365_v52 }
  0x3f   :  { %6559 = vmatprep.subr.mxu1 %v551_v53  ;;  %6538 = vmatpush3.msra.mxu0 %v365_v52 }
  0x40   :  { %6560 = vmatpush3.msra.mxu1 %v551_v53  ;;  %6539 = vmatprep.subr.mxu0 %v364_v54 }
  0x41   :  { %6561 = vmatprep.subr.mxu1 %v550_v55  ;;  %6540 = vmatpush3.msra.mxu0 %v364_v54 }
  0x42   :  { %6562 = vmatpush3.msra.mxu1 %v550_v55  ;;  %6526 = vmatprep.mubr.msk.f32.mxu1 %vm54_vm0, %v7328_v30 }
  0x43   :  { %6541 = vmatprep.subr.mxu0 %v363_v56  ;;  %6563 = vmatprep.subr.mxu1 %v549_v57 }
  0x44   :  { %6527 = vmatmul.mubr.msk.f32.gmra.mxu1 %vm54_vm0, %v7338_v34  ;;  %6542 = vmatpush3.msra.mxu0 %v363_v56 }
  0x45   :  { %6564 = vmatpush3.msra.mxu1 %v549_v57  ;;  %6543 = vmatprep.subr.mxu0 %v362_v58 }
  0x46   :  { %6565 = vmatprep.subr.mxu1 %v548_v59  ;;  %6544 = vmatpush3.msra.mxu0 %v362_v58 }
  0x47   :  { %6545 = vmatprep.mubr.msk.f32.mxu0 %vm54_vm0, %v7305_v17  ;;  %6566 = vmatpush3.msra.mxu1 %v548_v59 }
  0x48   :  { %6546 = vmatmul.mubr.msk.f32.vlgmr.msra.gmra.mxu0 %vm54_vm0, %v7315_v19  ;;  %6567 = vmatprep.mubr.msk.f32.mxu1 %vm54_vm0, %v7356_v40 }
  0x49   :  { %6573 = vmatprep.subr.mxu0 %v668_v60  ;;  %6595 = vmatprep.subr.mxu1 %v660_v61 }
  0x4a   :  { %6568 = vmatmul.mubr.msk.f32.vlgmr.msra.gmra.mxu1 %vm54_vm0, %v7361_v41  ;;  %6574 = vmatpush3.msra.mxu0 %v668_v60 }
  0x4b   :  { %6596 = vmatpush3.msra.mxu1 %v660_v61  ;;  %6575 = vmatprep.subr.mxu0 %v667_v62 }
  0x4c   :  { %6597 = vmatprep.subr.mxu1 %v659_v63  ;;  %6548 = vmatprep.mubr.msk.f32.mxu0 %vm54_vm0, %v7333_v31 }
  0x4d   :  { %6576 = vmatpush3.msra.mxu0 %v667_v62  ;;  %6598 = vmatpush3.msra.mxu1 %v659_v63 }
  0x4e   :  { %6549 = vmatmul.mubr.msk.f32.gmra.mxu0 %vm54_vm0, %v7343_v35  ;;  %6577 = vmatprep.subr.mxu0 %v666_v0 }
  0x4f   :  { %6599 = vmatprep.subr.mxu1 %v658_v1  ;;  %6570 = vmatprep.mubr.msk.f32.mxu1 %vm54_vm0, %v7374_v46 }
  0x50   :  { %6578 = vmatpush3.msra.mxu0 %v666_v0  ;;  %6600 = vmatpush3.msra.mxu1 %v658_v1 }
  0x51   :  { %6579 = vmatprep.subr.mxu0 %v665_v2  ;;  %6571 = vmatmul.mubr.msk.f32.gmra.mxu1 %vm54_vm0, %v7379_v47 }
  0x52   :  { %6601 = vmatprep.subr.mxu1 %v657_v3  ;;  %6580 = vmatpush3.msra.mxu0 %v665_v2 }
  0x53   :  { %6602 = vmatpush3.msra.mxu1 %v657_v3  ;;  %6581 = vmatprep.subr.mxu0 %v664_v4 }
  0x54   :  { %6603 = vmatprep.subr.mxu1 %v656_v5  ;;  %6582 = vmatpush3.msra.mxu0 %v664_v4 }
  0x55   :  { %6604 = vmatpush3.msra.mxu1 %v656_v5  ;;  %6583 = vmatprep.subr.mxu0 %v663_v6 }
  0x56   :  { %6605 = vmatprep.subr.mxu1 %v655_v7  ;;  %6584 = vmatpush3.msra.mxu0 %v663_v6 }
  0x57   :  { %6606 = vmatpush3.msra.mxu1 %v655_v7  ;;  %6585 = vmatprep.subr.mxu0 %v662_v8 }
  0x58   :  { %6607 = vmatprep.subr.mxu1 %v654_v9  ;;  %6586 = vmatpush3.msra.mxu0 %v662_v8 }
  0x59   :  { %6608 = vmatpush3.msra.mxu1 %v654_v9  ;;  %6587 = vmatprep.subr.mxu0 %v661_v10 }
  0x5a   :  { %6609 = vmatprep.subr.mxu1 %v653_v11  ;;  %6588 = vmatpush3.msra.mxu0 %v661_v10 }
  0x5b   :  { %6589 = vmatprep.mubr.msk.f32.mxu0 %vm54_vm0, %v7300_v16  ;;  %6610 = vmatpush3.msra.mxu1 %v653_v11  ;;  %v842_v16 = vld [vmem:[#allocation5 + $0x218] sm:$0xff] }
  0x5c   :  { %6611 = vmatprep.mubr.msk.f32.mxu1 %vm54_vm0, %v7305_v17  ;;  %6590 = vmatmul.mubr.msk.f32.vlgmr.msra.gmra.mxu0 %vm54_vm0, %v7310_v18  ;;  %v841_v17 = vld [vmem:[#allocation5 + $0x210] sm:$0xff]  ;;  %v840_v18 = vld [vmem:[#allocation5 + $0x208] sm:$0xff] }
  0x5d   :  { %6612 = vmatmul.mubr.msk.f32.vlgmr.msra.gmra.mxu1 %vm54_vm0, %v7315_v19  ;;  %6617 = vmatprep.subr.mxu0 %v846_v12  ;;  %v839_v19 = vld [vmem:[#allocation5 + $0x200] sm:$0xff] }
  0x5e   :  { %6592 = vmatprep.mubr.msk.f32.mxu0 %vm54_vm0, %v7328_v30  ;;  %6618 = vmatpush3.msra.mxu0 %v846_v12 }
  0x5f   :  { %6614 = vmatprep.mubr.msk.f32.mxu1 %vm54_vm0, %v7333_v31  ;;  %6619 = vmatprep.subr.mxu0 %v845_v13 }
  0x60   :  { %6620 = vmatpush3.msra.mxu0 %v845_v13 }
  0x61   :  { %6615 = vmatmul.mubr.msk.f32.gmra.mxu1 %vm54_vm0, %v7343_v35  ;;  %6621 = vmatprep.subr.mxu0 %v844_v14 }
  0x62   :  { %6593 = vmatmul.mubr.msk.f32.gmra.mxu0 %vm54_vm0, %v7338_v34 }
  0x63   :  { %6622 = vmatpush3.msra.mxu0 %v844_v14  ;;  %6633 = vmatprep.mubr.msk.f32.mxu0 %vm54_vm0, %v7356_v40 }
  0x64   :  { %6623 = vmatprep.subr.mxu0 %v843_v15 }
  0x65   :  { %6624 = vmatpush3.msra.mxu0 %v843_v15 }
  0x66   :  { %6625 = vmatprep.subr.mxu0 %v842_v16 }
  0x67   :  { %6626 = vmatpush3.msra.mxu0 %v842_v16 }
  0x68   :  { %6627 = vmatprep.subr.mxu0 %v841_v17 }
  0x69   :  { %6628 = vmatpush3.msra.mxu0 %v841_v17 }
  0x6a   :  { %6629 = vmatprep.subr.mxu0 %v840_v18 }
  0x6b   :  { %6630 = vmatpush3.msra.mxu0 %v840_v18 }
  0x6c   :  { %6631 = vmatprep.subr.mxu0 %v839_v19 }
  0x6d   :  { %6632 = vmatpush3.msra.mxu0 %v839_v19 }
  0x6e   :  { %6634 = vmatmul.mubr.msk.f32.vlgmr.msra.gmra.mxu0 %vm54_vm0, %v7361_v41 }
  0x6f   :  { %6636 = vmatprep.mubr.msk.f32.mxu0 %vm54_vm0, %v7374_v46 }
  0x72   :  { %6637 = vmatmul.mubr.msk.f32.gmra.mxu0 %vm54_vm0, %v7379_v47 }
  0xe0   :  { %v6459_v20 = vpop.f32.mrf.mxu0 }
  0xe1   :  { %v6481_v21 = vpop.f32.mrf.mxu1 }
  0xe2   :  { %v133_v22 = vpop.f32.mrf.mxu0  ;;  %v236_v49 = vadd.f32 %v6481_v21, %v6459_v20 }
  0xe3   :  { %v230_v24 = vpop.f32.mrf.mxu1 }
  0xe4   :  { %v231_v53 = vadd.f32 %v230_v24, %v133_v22 }
  0xed   :  { %v6462_v23 = vpop.f32.mrf.mxu0 }
  0xee   :  { %v6484_v25 = vpop.f32.mrf.mxu1 }
  0xef   :  { %v143_v26 = vpop.f32.mrf.mxu0  ;;  %v246_v58 = vadd.f32 %v6484_v25, %v6462_v23 }
  0xf0   :  { %v240_v27 = vpop.f32.mrf.mxu1 }
  0xf1   :  { %v241_v63 = vadd.f32 %v240_v27, %v143_v26 }
  0xf4   :  { %v6503_v28 = vpop.f32.mrf.mxu0 }
  0xf5   :  { %v355_v54 = vadd.f32 %v6503_v28, %v236_v49 }
  0xf6   :  { %v6525_v29 = vpop.f32.mrf.mxu1  ;;  %v335_v30 = vpop.f32.mrf.mxu0 }
  0xf7   :  { %v354_v59 = vadd.f32 %v335_v30, %v231_v53  ;;  %v359_v2 = vmax.f32 %v355_v54, 0.0 }
  0xf8   :  { %v444_v31 = vpop.f32.mrf.mxu1 }
  0xf9   :  { %v358_v9 = vmax.f32 %v354_v59, 0.0 }
  0xfa   :  { %v6506_v32 = vpop.f32.mrf.mxu0 }
  0xfb   :  { %v357_v3 = vadd.f32 %v6506_v32, %v246_v58 }
  0xfc   :  { %v345_v34 = vpop.f32.mrf.mxu0 }
  0xfd   :  { %v356_v10 = vadd.f32 %v345_v34, %v241_v63  ;;  %v361_v18 = vmax.f32 %v357_v3, 0.0 }
  0xff   :  { %v360_v26 = vmax.f32 %v356_v10, 0.0 }
 0x104   :  { %v6528_v33 = vpop.f32.mrf.mxu1 }
 0x106   :  { %v454_v35 = vpop.f32.mrf.mxu1 }
 0x108   :  { %v6547_v36 = vpop.f32.mrf.mxu0 }
 0x109   :  { %v535_v44 = vadd.f32 %v6547_v36, %v6525_v29 }
 0x10a   :  { %v529_v37 = vpop.f32.mrf.mxu0  ;;  %v6569_v38 = vpop.f32.mrf.mxu1 }
 0x10b   :  { %v530_v46 = vadd.f32 %v529_v37, %v444_v31  ;;  %v642_v50 = vadd.f32 %v6569_v38, %v535_v44 }
 0x10c   :  { %v622_v40 = vpop.f32.mrf.mxu1 }
 0x10d   :  { %v641_v55 = vadd.f32 %v622_v40, %v530_v46  ;;  %v646_v60 = vmax.f32 %v642_v50, 0.0 }
 0x10e   :  { %v6550_v39 = vpop.f32.mrf.mxu0 }
 0x10f   :  { %v545_v52 = vadd.f32 %v6550_v39, %v6528_v33  ;;  %v645_v4 = vmax.f32 %v641_v55, 0.0  ;;  %v650_v11 = vmax.f32 %v359_v2, %v646_v60 }
 0x110   :  { %v539_v41 = vpop.f32.mrf.mxu0 }
 0x111   :  { %v6572_v42 = vpop.f32.mrf.mxu1  ;;  %v540_v56 = vadd.f32 %v539_v41, %v454_v35  ;;  %v649_v19 = vmax.f32 %v358_v9, %v645_v4 }
 0x112   :  { %v644_v0 = vadd.f32 %v6572_v42, %v545_v52 }
 0x113   :  { %v632_v45 = vpop.f32.mrf.mxu1 }
 0x114   :  { %v643_v5 = vadd.f32 %v632_v45, %v540_v56  ;;  %v648_v14 = vmax.f32 %v644_v0, 0.0 }
 0x116   :  { %v647_v20 = vmax.f32 %v643_v5, 0.0  ;;  %v652_v28 = vmax.f32 %v361_v18, %v648_v14 }
 0x118   :  { %v651_v32 = vmax.f32 %v360_v26, %v647_v20 }
 0x11c   :  { %v6591_v43 = vpop.f32.mrf.mxu0 }
 0x11d   :  { %v6613_v47 = vpop.f32.mrf.mxu1 }
 0x11e   :  { %v735_v48 = vpop.f32.mrf.mxu0  ;;  %v826_v1 = vadd.f32 %v6613_v47, %v6591_v43 }
 0x11f   :  { %v820_v57 = vpop.f32.mrf.mxu1 }
 0x120   :  { %v821_v7 = vadd.f32 %v820_v57, %v735_v48 }
 0x121   :  { %v6616_v61 = vpop.f32.mrf.mxu1 }
 0x122   :  { %v6594_v51 = vpop.f32.mrf.mxu0 }
 0x123   :  { %v830_v12 = vpop.f32.mrf.mxu1  ;;  %v836_v15 = vadd.f32 %v6616_v61, %v6594_v51 }
 0x124   :  { %v745_v62 = vpop.f32.mrf.mxu0 }
 0x125   :  { %v831_v22 = vadd.f32 %v830_v12, %v745_v62 }
 0x12e   :  { %v6635_v6 = vpop.f32.mrf.mxu0 }
 0x12f   :  { %v933_v8 = vadd.f32 %v6635_v6, %v826_v1 }
 0x130   :  { %v913_v13 = vpop.f32.mrf.mxu0 }
 0x131   :  { %v937_v16 = vmax.f32 %v933_v8, 0.0  ;;  %v932_v17 = vadd.f32 %v913_v13, %v821_v7 }
 0x132   :  { %v6638_v21 = vpop.f32.mrf.mxu0 }
 0x133   :  { %v941_v23 = vmax.f32 %v650_v11, %v937_v16  ;;  %v936_v24 = vmax.f32 %v932_v17, 0.0  ;;  %v935_v25 = vadd.f32 %v6638_v21, %v836_v15 }
 0x134   :  { %v923_v27 = vpop.f32.mrf.mxu0 }
 0x135   :  { %945 = vst [vmem:[#allocation2 + $0x8] sm:$0xff] %v941_v23  ;;  %v940_v29 = vmax.f32 %v649_v19, %v936_v24  ;;  %v939_v30 = vmax.f32 %v935_v25, 0.0  ;;  %v934_v31 = vadd.f32 %v923_v27, %v831_v22 }
 0x137   :  { %944 = vst [vmem:[#allocation2] sm:$0xff] %v940_v29  ;;  %v943_v33 = vmax.f32 %v652_v28, %v939_v30  ;;  %v938_v34 = vmax.f32 %v934_v31, 0.0 }
 0x139   :  { %947 = vst [vmem:[#allocation2 + $0x18] sm:$0xff] %v943_v33  ;;  %v942_v35 = vmax.f32 %v651_v32, %v938_v34 }
 0x13b   :  { %946 = vst [vmem:[#allocation2 + $0x10] sm:$0xff] %v942_v35 }
 0x13e   :  { %v952_v36 = vld [vmem:[#allocation2 + $0x1] sm:$0xff] }
 0x13f   :  { %v956_v37 = vmax.f32 %v940_v29, %v952_v36  ;;  %v960_v40 = vld [vmem:[#allocation2 + $0x2] sm:$0xff] }
 0x140   :  { %v951_v38 = vld [vmem:[#allocation2 + $0x18] sm:$0xf]  ;;  %v1133_v29 = vld [vmem:[#allocation5 + $0x240] sm:$0xff] }
 0x141   :  { %v955_v39 = vld [vmem:[#allocation2 + $0x19] sm:$0xf]  ;;  %v964_v41 = vmax.f32 %v956_v37, %v960_v40 }
 0x142   :  { %v959_v42 = vmax.f32 %v951_v38, %v955_v39  ;;  %v953_v43 = vld [vmem:[#allocation2 + $0x9] sm:$0xff]  ;;  %v954_v44 = vld [vmem:[#allocation2 + $0x11] sm:$0xff]  ;;  %v963_v45 = vld [vmem:[#allocation2 + $0x1a] sm:$0xf] }
 0x143   :  { %968 = vst [vmem:[#allocation3] sm:$0xff] %v964_v41  ;;  %v957_v47 = vmax.f32 %v941_v23, %v953_v43  ;;  %v958_v48 = vmax.f32 %v942_v35, %v954_v44  ;;  %v961_v49 = vld [vmem:[#allocation2 + $0xa] sm:$0xff]  ;;  %v962_v50 = vld [vmem:[#allocation2 + $0x12] sm:$0xff] }
 0x144   :  { %v967_v46 = vmax.f32 %v959_v42, %v963_v45  ;;  %v1134_v41 = vld [vmem:[#allocation5 + $0x248] sm:$0xff] }
 0x145   :  { %v965_v51 = vmax.f32 %v957_v47, %v961_v49  ;;  %v966_v52 = vmax.f32 %v958_v48, %v962_v50 }
 0x146   :  { %971 = vst [vmem:[#allocation3 + $0x18] sm:$0xf] %v967_v46 }
 0x147   :  { %969 = vst [vmem:[#allocation3 + $0x8] sm:$0xff] %v965_v51  ;;  %970 = vst [vmem:[#allocation3 + $0x10] sm:$0xff] %v966_v52 }
 0x14a   :  { %v987_v53 = vld [vmem:[#allocation3] sm:$0x1]  ;;  %v995_v55 = vld [vmem:[#allocation3 + $0x3] sm:$0x1]  ;;  %v1013_v61 = vld [vmem:[#allocation3 + $0x6] sm:$0x1] }
 0x14b   :  { %v975_v54 = vld [vmem:[#allocation3] sm:$0x1]  ;;  %989 = vrot.lane.b32.xlu1 %v987_v53, %s7260_s0  ;;  %v1007_v57 = vld [vmem:[#allocation3 + $0x3] sm:$0x1]  ;;  %1014 = vst.msk [vmem:[#allocation4 + $0x8] sm:$0x1] %vm973_vm1, %v1013_v61 }
 0x14c   :  { %977 = vrot.lane.b32.xlu0 %v975_v54, %s7261_s11  ;;  %v981_v56 = vld [vmem:[#allocation3] sm:$0x1]  ;;  %v1001_v58 = vld [vmem:[#allocation3 + $0x3] sm:$0x1]  ;;  %v1021_v3 = vld [vmem:[#allocation3 + $0x6] sm:$0x1] }
 0x14d   :  { %v972_v59 = vld [vmem:[#allocation3] sm:$0x1]  ;;  %v993_v60 = vld [vmem:[#allocation3 + $0x3] sm:$0x1]  ;;  %v1113_v2 = vld [vmem:[#allocation3 + $0x19] sm:$0x1] }
 0x14e   :  { %974 = vst.msk [vmem:[#allocation4] sm:$0x1] %vm973_vm1, %v972_v59  ;;  %994 = vst.msk [vmem:[#allocation4 + $0x4] sm:$0x1] %vm973_vm1, %v993_v60  ;;  %v1033_v62 = vld [vmem:[#allocation3 + $0x9] sm:$0x1] }
 0x14f   :  { %997 = vrot.lane.b32.xlu1 %v995_v55, %s7261_s11  ;;  %v1053_v63 = vld [vmem:[#allocation3 + $0x10] sm:$0x1]  ;;  %1034 = vst.msk [vmem:[#allocation4 + $0xc] sm:$0x1] %vm973_vm1, %v1033_v62  ;;  %v1073_v0 = vld [vmem:[#allocation3 + $0x13] sm:$0x1] }
 0x150   :  { %983 = vrot.lane.b32.xlu0 %v981_v56, %s7262_s12  ;;  %1054 = vst.msk [vmem:[#allocation4 + $0x10] sm:$0x1] %vm973_vm1, %v1053_v63  ;;  %v1093_v1 = vld [vmem:[#allocation3 + $0x16] sm:$0x1]  ;;  %1074 = vst.msk [vmem:[#allocation4 + $0x14] sm:$0x1] %vm973_vm1, %v1073_v0 }
 0x151   :  { %1094 = vst.msk [vmem:[#allocation4 + $0x18] sm:$0x1] %vm973_vm1, %v1093_v1  ;;  %1114 = vst.msk [vmem:[#allocation4 + $0x1c] sm:$0x1] %vm973_vm1, %v1113_v2  ;;  %v1015_v4 = vld [vmem:[#allocation3 + $0x6] sm:$0x1] }
 0x152   :  { %v1115_v5 = vld [vmem:[#allocation3 + $0x19] sm:$0x1]  ;;  %v1027_v6 = vld [vmem:[#allocation3 + $0x6] sm:$0x1]  ;;  %v1035_v7 = vld [vmem:[#allocation3 + $0x9] sm:$0x1] }
 0x153   :  { %1009 = vrot.lane.b32.xlu1 %v1007_v57, %s7260_s0  ;;  %v1041_v8 = vld [vmem:[#allocation3 + $0x9] sm:$0x1]  ;;  %v1055_v10 = vld [vmem:[#allocation3 + $0x10] sm:$0x1]  ;;  %v1075_v13 = vld [vmem:[#allocation3 + $0x13] sm:$0x1] }
 0x154   :  { %1003 = vrot.lane.b32.xlu0 %v1001_v58, %s7262_s12  ;;  %v1047_v9 = vld [vmem:[#allocation3 + $0x9] sm:$0x1]  ;;  %v1061_v11 = vld [vmem:[#allocation3 + $0x10] sm:$0x1]  ;;  %v1081_v14 = vld [vmem:[#allocation3 + $0x13] sm:$0x1] }
 0x155   :  { %v1067_v12 = vld [vmem:[#allocation3 + $0x10] sm:$0x1]  ;;  %v1087_v15 = vld [vmem:[#allocation3 + $0x13] sm:$0x1]  ;;  %v1095_v16 = vld [vmem:[#allocation3 + $0x16] sm:$0x1] }
 0x156   :  { %v1101_v17 = vld [vmem:[#allocation3 + $0x16] sm:$0x1]  ;;  %v1127_v19 = vld [vmem:[#allocation3 + $0x19] sm:$0x1] }
 0x157   :  { %1023 = vrot.lane.b32.xlu1 %v1021_v3, %s7262_s12  ;;  %v1107_v18 = vld [vmem:[#allocation3 + $0x16] sm:$0x1]  ;;  %v1121_v20 = vld [vmem:[#allocation3 + $0x19] sm:$0x1] }
 0x158   :  { %1017 = vrot.lane.b32.xlu0 %v1015_v4, %s7261_s11 }
 0x15b   :  { %1117 = vrot.lane.b32.xlu1 %v1115_v5, %s7261_s11 }
 0x15c   :  { %1029 = vrot.lane.b32.xlu0 %v1027_v6, %s7260_s0 }
 0x15f   :  { %1037 = vrot.lane.b32.xlu1 %v1035_v7, %s7261_s11 }
 0x160   :  { %1043 = vrot.lane.b32.xlu0 %v1041_v8, %s7262_s12 }
 0x163   :  { %1049 = vrot.lane.b32.xlu1 %v1047_v9, %s7260_s0 }
 0x164   :  { %1057 = vrot.lane.b32.xlu0 %v1055_v10, %s7261_s11 }
 0x167   :  { %1063 = vrot.lane.b32.xlu1 %v1061_v11, %s7262_s12 }
 0x168   :  { %1069 = vrot.lane.b32.xlu0 %v1067_v12, %s7260_s0 }
 0x16b   :  { %1077 = vrot.lane.b32.xlu1 %v1075_v13, %s7261_s11 }
 0x16c   :  { %1083 = vrot.lane.b32.xlu0 %v1081_v14, %s7262_s12 }
 0x16f   :  { %1089 = vrot.lane.b32.xlu1 %v1087_v15, %s7260_s0  ;;  %v1150_v15 = vld [vmem:[#allocation5 + $0x26c] sm:$0xff] }
 0x170   :  { %1097 = vrot.lane.b32.xlu0 %v1095_v16, %s7261_s11  ;;  %v1149_v16 = vld [vmem:[#allocation5 + $0x264] sm:$0xff]  ;;  %6639 = vmatprep.subr.mxu1 %v1150_v15 }
 0x171   :  { %6640 = vmatpush3.msra.mxu1 %v1150_v15 }
 0x172   :  { %6641 = vmatprep.subr.mxu1 %v1149_v16 }
 0x173   :  { %1103 = vrot.lane.b32.xlu1 %v1101_v17, %s7262_s12  ;;  %v1148_v17 = vld [vmem:[#allocation5 + $0x25c] sm:$0xff]  ;;  %6642 = vmatpush3.msra.mxu1 %v1149_v16 }
 0x174   :  { %1109 = vrot.lane.b32.xlu0 %v1107_v18, %s7260_s0  ;;  %v1147_v18 = vld [vmem:[#allocation5 + $0x254] sm:$0xff]  ;;  %6643 = vmatprep.subr.mxu1 %v1148_v17 }
 0x175   :  { %6644 = vmatpush3.msra.mxu1 %v1148_v17 }
 0x176   :  { %6645 = vmatprep.subr.mxu1 %v1147_v18 }
 0x177   :  { %1129 = vrot.lane.b32.xlu1 %v1127_v19, %s7260_s0  ;;  %6646 = vmatpush3.msra.mxu1 %v1147_v18 }
 0x178   :  { %1123 = vrot.lane.b32.xlu0 %v1121_v20, %s7262_s12 }
 0x1bd   :  { %v990_v21 = vpop.permute.xlu1 %989 }
 0x1be   :  { %v978_v22 = vpop.permute.xlu0 %977  ;;  %992 = vst.msk [vmem:[#allocation4 + $0x3] sm:$0x1] %vm973_vm1, %v990_v21 }
 0x1bf   :  { %980 = vst.msk [vmem:[#allocation4 + $0x1] sm:$0x1] %vm973_vm1, %v978_v22 }
 0x1c1   :  { %v998_v23 = vpop.permute.xlu1 %997 }
 0x1c2   :  { %v984_v24 = vpop.permute.xlu0 %983  ;;  %1000 = vst.msk [vmem:[#allocation4 + $0x5] sm:$0x1] %vm973_vm1, %v998_v23 }
 0x1c3   :  { %986 = vst.msk [vmem:[#allocation4 + $0x2] sm:$0x1] %vm973_vm1, %v984_v24 }
 0x1c5   :  { %v1010_v25 = vpop.permute.xlu1 %1009 }
 0x1c6   :  { %v1004_v26 = vpop.permute.xlu0 %1003  ;;  %1012 = vst.msk [vmem:[#allocation4 + $0x7] sm:$0x1] %vm973_vm1, %v1010_v25  ;;  %v5980_v25 = vld [vmem:[#allocation5 + $0x250] ss:$0 sm:$0xff] }
 0x1c7   :  { %1006 = vst.msk [vmem:[#allocation4 + $0x6] sm:$0x1] %vm973_vm1, %v1004_v26 }
 0x1c9   :  { %v1024_v27 = vpop.permute.xlu1 %1023 }
 0x1ca   :  { %v1018_v28 = vpop.permute.xlu0 %1017  ;;  %1026 = vst.msk [vmem:[#allocation4 + $0xa] sm:$0x1] %vm973_vm1, %v1024_v27 }
 0x1cb   :  { %1020 = vst.msk [vmem:[#allocation4 + $0x9] sm:$0x1] %vm973_vm1, %v1018_v28  ;;  %v5981_v28 = vld [vmem:[#allocation5 + $0x251] ss:$0 sm:$0xff] }
 0x1cd   :  { %v1118_v30 = vpop.permute.xlu1 %1117 }
 0x1ce   :  { %v1030_v31 = vpop.permute.xlu0 %1029  ;;  %v1135_v32 = vld [vmem:[#allocation4] sm:$0xff]  ;;  %1120 = vst.msk [vmem:[#allocation4 + $0x1d] sm:$0x1] %vm973_vm1, %v1118_v30 }
 0x1cf   :  { %1032 = vst.msk [vmem:[#allocation4 + $0xb] sm:$0x1] %vm973_vm1, %v1030_v31  ;;  %v7471_v33 = vadd.f32 %v1135_v32, %v1133_v29 }
 0x1d1   :  { %v1172_v34 = vsel %vm1171_vm2, %v7471_v33, 0.0  ;;  %v1038_v35 = vpop.permute.xlu1 %1037 }
 0x1d2   :  { %v1044_v36 = vpop.permute.xlu0 %1043  ;;  %1173 = vadd.xlane.f32.xlu0 %v1172_v34  ;;  %1040 = vst.msk [vmem:[#allocation4 + $0xd] sm:$0x1] %vm973_vm1, %v1038_v35 }
 0x1d3   :  { %1046 = vst.msk [vmem:[#allocation4 + $0xe] sm:$0x1] %vm973_vm1, %v1044_v36 }
 0x1d5   :  { %v1050_v37 = vpop.permute.xlu1 %1049 }
 0x1d6   :  { %v1058_v38 = vpop.permute.xlu0 %1057  ;;  %1052 = vst.msk [vmem:[#allocation4 + $0xf] sm:$0x1] %vm973_vm1, %v1050_v37 }
 0x1d7   :  { %1060 = vst.msk [vmem:[#allocation4 + $0x11] sm:$0x1] %vm973_vm1, %v1058_v38 }
 0x1d9   :  { %v1064_v39 = vpop.permute.xlu1 %1063 }
 0x1da   :  { %v1070_v40 = vpop.permute.xlu0 %1069  ;;  %1066 = vst.msk [vmem:[#allocation4 + $0x12] sm:$0x1] %vm973_vm1, %v1064_v39 }
 0x1db   :  { %1072 = vst.msk [vmem:[#allocation4 + $0x13] sm:$0x1] %vm973_vm1, %v1070_v40 }
 0x1dd   :  { %v1078_v42 = vpop.permute.xlu1 %1077  ;;  %v1136_v44 = vld [vmem:[#allocation4 + $0x8] sm:$0xff] }
 0x1de   :  { %v1084_v43 = vpop.permute.xlu0 %1083  ;;  %1080 = vst.msk [vmem:[#allocation4 + $0x15] sm:$0x1] %vm973_vm1, %v1078_v42  ;;  %v7483_v45 = vadd.f32 %v1136_v44, %v1134_v41 }
 0x1df   :  { %1086 = vst.msk [vmem:[#allocation4 + $0x16] sm:$0x1] %vm973_vm1, %v1084_v43 }
 0x1e0   :  { %v1175_v46 = vsel %vm1171_vm2, %v7483_v45, 0.0 }
 0x1e1   :  { %v1090_v47 = vpop.permute.xlu1 %1089  ;;  %1176 = vadd.xlane.f32.xlu1 %v1175_v46 }
 0x1e2   :  { %v1098_v48 = vpop.permute.xlu0 %1097  ;;  %1092 = vst.msk [vmem:[#allocation4 + $0x17] sm:$0x1] %vm973_vm1, %v1090_v47 }
 0x1e3   :  { %1100 = vst.msk [vmem:[#allocation4 + $0x19] sm:$0x1] %vm973_vm1, %v1098_v48 }
 0x1e5   :  { %v1104_v49 = vpop.permute.xlu1 %1103 }
 0x1e6   :  { %v1110_v50 = vpop.permute.xlu0 %1109  ;;  %1106 = vst.msk [vmem:[#allocation4 + $0x1a] sm:$0x1] %vm973_vm1, %v1104_v49 }
 0x1e7   :  { %1112 = vst.msk [vmem:[#allocation4 + $0x1b] sm:$0x1] %vm973_vm1, %v1110_v50 }
 0x1e9   :  { %v1130_v51 = vpop.permute.xlu1 %1129  ;;  %v1137_v53 = vld [vmem:[#allocation4 + $0x10] sm:$0xff] }
 0x1ea   :  { %v1124_v52 = vpop.permute.xlu0 %1123  ;;  %1132 = vst.msk [vmem:[#allocation4 + $0x1f] sm:$0x1] %vm973_vm1, %v1130_v51  ;;  %v7493_v54 = vadd.f32 %v1137_v53, %v1133_v29  ;;  %v5982_v51 = vld [vmem:[#allocation5 + $0x274] ss:$0 sm:$0xff] }
 0x1eb   :  { %1126 = vst.msk [vmem:[#allocation4 + $0x1e] sm:$0x1] %vm973_vm1, %v1124_v52 }
 0x1ec   :  { %v1178_v55 = vsel %vm1171_vm2, %v7493_v54, 0.0 }
 0x1ed   :  { %1179 = vadd.xlane.f32.xlu0 %v1178_v55 }
 0x1f2   :  { %v1138_v56 = vld [vmem:[#allocation4 + $0x18] sm:$0xff] }
 0x1f3   :  { %v7497_v57 = vadd.f32 %v1138_v56, %v1134_v41 }
 0x1f5   :  { %v1181_v58 = vsel %vm1171_vm2, %v7497_v57, 0.0 }
 0x1f6   :  { %1182 = vadd.xlane.f32.xlu0 %v1181_v58 }
 0x25b   :  { %v1174_v59 = vpop.xlane.xlu0 %1173 }
 0x25c   :  { %v1185_v60 = vmul.f32 0.03125, %v1174_v59 }
 0x25e   :  { %v1189_v61 = vsub.f32 %v7471_v33, %v1185_v60 }
 0x260   :  { %v1193_v62 = vmul.f32 %v1189_v61, %v1189_v61 }
 0x262   :  { %v1197_v63 = vsel %vm1171_vm2, %v1193_v62, 0.0 }
 0x263   :  { %1198 = vadd.xlane.f32.xlu1 %v1197_v63 }
 0x26a   :  { %v1177_v0 = vpop.xlane.xlu1 %1176 }
 0x26b   :  { %v1186_v1 = vmul.f32 0.03125, %v1177_v0 }
 0x26d   :  { %v1190_v2 = vsub.f32 %v7483_v45, %v1186_v1 }
 0x26f   :  { %v1194_v3 = vmul.f32 %v1190_v2, %v1190_v2 }
 0x271   :  { %v1200_v4 = vsel %vm1171_vm2, %v1194_v3, 0.0 }
 0x272   :  { %1201 = vadd.xlane.f32.xlu0 %v1200_v4 }
 0x276   :  { %v1180_v5 = vpop.xlane.xlu0 %1179 }
 0x277   :  { %v1187_v6 = vmul.f32 0.03125, %v1180_v5 }
 0x279   :  { %v1191_v7 = vsub.f32 %v7493_v54, %v1187_v6 }
 0x27b   :  { %v1195_v8 = vmul.f32 %v1191_v7, %v1191_v7 }
 0x27d   :  { %v1203_v9 = vsel %vm1171_vm2, %v1195_v8, 0.0 }
 0x27e   :  { %1204 = vadd.xlane.f32.xlu1 %v1203_v9 }
 0x27f   :  { %v1183_v10 = vpop.xlane.xlu0 %1182 }
 0x280   :  { %v1188_v11 = vmul.f32 0.03125, %v1183_v10 }
 0x282   :  { %v1192_v12 = vsub.f32 %v7497_v57, %v1188_v11 }
 0x284   :  { %v1196_v13 = vmul.f32 %v1192_v12, %v1192_v12 }
 0x286   :  { %v1206_v14 = vsel %vm1171_vm2, %v1196_v13, 0.0 }
 0x287   :  { %1207 = vadd.xlane.f32.xlu0 %v1206_v14 }
 0x2ec   :  { %v1199_v19 = vpop.xlane.xlu1 %1198 }
 0x2ed   :  { %v1209_v20 = vmul.f32 0.03125, %v1199_v19 }
 0x2ef   :  { %v1213_v21 = vadd.f32 1e-05, %v1209_v20 }
 0x2f1   :  { %7025 = vrsqrt.f32 %v1213_v21 }
 0x2fb   :  { %v1202_v22 = vpop.xlane.xlu0 %1201 }
 0x2fc   :  { %v1210_v23 = vmul.f32 0.03125, %v1202_v22 }
 0x2fe   :  { %v7026_v24 = vpop.eup %7025  ;;  %v1214_v26 = vadd.f32 1e-05, %v1210_v23 }
 0x2ff   :  { %v1221_v27 = vmul.f32 %v7026_v24, %v1189_v61 }
 0x300   :  { %7027 = vrsqrt.f32 %v1214_v26 }
 0x301   :  { %v1229_v29 = vmul.f32 %v5980_v25, %v1221_v27 }
 0x303   :  { %v1237_v30 = vadd.f32 %v5981_v28, %v1229_v29 }
 0x305   :  { %6647 = vmatprep.mubr.msk.f32.mxu1 %vm1171_vm2, %v1237_v30 }
 0x307   :  { %v1205_v31 = vpop.xlane.xlu1 %1204 }
 0x308   :  { %v1211_v32 = vmul.f32 0.03125, %v1205_v31 }
 0x30a   :  { %v1215_v34 = vadd.f32 1e-05, %v1211_v32 }
 0x30c   :  { %7029 = vrsqrt.f32 %v1215_v34 }
 0x30d   :  { %v7028_v35 = vpop.eup %7027 }
 0x30e   :  { %v1222_v36 = vmul.f32 %v7028_v35, %v1190_v2 }
 0x310   :  { %v1208_v37 = vpop.xlane.xlu0 %1207  ;;  %v1230_v38 = vmul.f32 %v5980_v25, %v1222_v36 }
 0x311   :  { %v1212_v39 = vmul.f32 0.03125, %v1208_v37 }
 0x312   :  { %v1238_v40 = vadd.f32 %v5981_v28, %v1230_v38 }
 0x313   :  { %v1216_v41 = vadd.f32 1e-05, %v1212_v39 }
 0x314   :  { %6648 = vmatmul.mubr.msk.f32.vlgmr.msra.gmra.mxu1 %vm1171_vm2, %v1238_v40 }
 0x315   :  { %7031 = vrsqrt.f32 %v1216_v41 }
 0x319   :  { %v7030_v42 = vpop.eup %7029 }
 0x31a   :  { %v1223_v43 = vmul.f32 %v7030_v42, %v1191_v7 }
 0x31c   :  { %v1231_v44 = vmul.f32 %v5980_v25, %v1223_v43 }
 0x31e   :  { %v1239_v46 = vadd.f32 %v5981_v28, %v1231_v44 }
 0x320   :  { %6650 = vmatprep.mubr.msk.f32.mxu1 %vm1171_vm2, %v1239_v46 }
 0x322   :  { %v7032_v47 = vpop.eup %7031 }
 0x323   :  { %v1224_v48 = vmul.f32 %v7032_v47, %v1192_v12 }
 0x325   :  { %v1232_v49 = vmul.f32 %v5980_v25, %v1224_v48 }
 0x327   :  { %v1240_v50 = vadd.f32 %v5981_v28, %v1232_v49 }
 0x329   :  { %6651 = vmatmul.mubr.msk.f32.gmra.mxu1 %vm1171_vm2, %v1240_v50 }
 0x3d4   :  { %v6649_v52 = vpop.f32.mrf.mxu1 }
 0x3d5   :  { %v7513_v53 = vadd.f32 %v6649_v52, %v5982_v51 }
 0x3d6   :  { %v1323_v55 = vpop.f32.mrf.mxu1 }
 0x3d7   :  { %v7515_v56 = vadd.f32 %v5982_v51, %v1323_v55  ;;  %1346 = vrot.lane.b32.xlu1 %v7513_v53, %s7261_s11 }
 0x3d9   :  { %1344 = vrot.lane.b32.xlu0 %v7515_v56, %s7261_s11  ;;  %6657 = vmatprep.mubr.msk.f32.mxu1 %vm1348_vm3, %v7515_v56 }
 0x3e9   :  { %v6652_v58 = vpop.f32.mrf.mxu1 }
 0x3ea   :  { %v7523_v59 = vadd.f32 %v6652_v58, %v5982_v51 }
 0x3eb   :  { %v1333_v60 = vpop.f32.mrf.mxu1 }
 0x3ec   :  { %1436 = vrot.lane.b32.xlu1 %v7523_v59, %s7261_s11  ;;  %v7527_v61 = vadd.f32 %v5982_v51, %v1333_v60 }
 0x3f0   :  { %1434 = vrot.lane.b32.xlu1 %v7527_v61, %s7261_s11 }
 0x449   :  { %v1347_v62 = vpop.permute.xlu1 %1346 }
 0x44a   :  { %6653 = vmatprep.subr.msk.mxu1 %vm1348_vm3, %v1347_v62 }
 0x44b   :  { %6654 = vmatpush3.xpose.msk.msra.mxu1 %vm1348_vm3, %v1347_v62  ;;  %v1345_v63 = vpop.permute.xlu0 %1344 }
 0x44c   :  { %6655 = vmatprep.subr.msk.mxu1 %vm1348_vm3, %v1345_v63 }
 0x44f   :  { %6656 = vmatpush3.xpose.msk.msra.mxu1 %vm1348_vm3, %v1345_v63 }
 0x452   :  { %6658 = vmatmul.mubr.msk.f32.vlgmr.msra.gmra.mxu1 %vm1348_vm3, %v7513_v53 }
 0x453   :  { %6664 = vmatprep.mubr.msk.f32.mxu1 %vm1348_vm3, %v7527_v61 }
 0x45e   :  { %v1437_v0 = vpop.permute.xlu1 %1436 }
 0x45f   :  { %6660 = vmatprep.subr.msk.mxu1 %vm1348_vm3, %v1437_v0 }
 0x460   :  { %6661 = vmatpush3.xpose.msk.msra.mxu1 %vm1348_vm3, %v1437_v0 }
 0x462   :  { %v1435_v1 = vpop.permute.xlu1 %1434 }
 0x463   :  { %6662 = vmatprep.subr.msk.mxu1 %vm1348_vm3, %v1435_v1 }
 0x464   :  { %6663 = vmatpush3.xpose.msk.msra.mxu1 %vm1348_vm3, %v1435_v1 }
 0x467   :  { %6665 = vmatmul.mubr.msk.f32.vlgmr.msra.gmra.mxu1 %vm1348_vm3, %v7523_v59 }
 0x512   :  { %v6659_v2 = vpop.f32.mrf.mxu1 }
 0x513   :  { %v1522_v3 = vmul.f32 0.35355338, %v6659_v2 }
 0x514   :  { %v1423_v4 = vpop.f32.mrf.mxu1 }
 0x515   :  { %v1521_v5 = vmul.f32 0.35355338, %v1423_v4  ;;  %v1529_v6 = vsel %vm1525_vm4, %v1522_v3, -inf }
 0x516   :  { %1530 = vmax.xlane.f32.xlu1 %v1529_v6 }
 0x517   :  { %v1526_v7 = vsel %vm1525_vm4, %v1521_v5, -inf }
 0x518   :  { %1527 = vmax.xlane.f32.xlu0 %v1526_v7 }
 0x527   :  { %v6666_v8 = vpop.f32.mrf.mxu1  ;;  %1572 = vrot.lane.b32.xlu1 %v7513_v53, %s7262_s12 }
 0x528   :  { %v1524_v11 = vmul.f32 0.35355338, %v6666_v8 }
 0x529   :  { %v1512_v9 = vpop.f32.mrf.mxu1 }
 0x52a   :  { %v1523_v10 = vmul.f32 0.35355338, %v1512_v9  ;;  %v1535_v13 = vsel %vm1525_vm4, %v1524_v11, -inf }
 0x52b   :  { %1659 = vrot.lane.b32.xlu1 %v7523_v59, %s7262_s12 }
 0x52c   :  { %v1532_v12 = vsel %vm1525_vm4, %v1523_v10, -inf }
 0x52d   :  { %1533 = vmax.xlane.f32.xlu0 %v1532_v12 }
 0x52f   :  { %1750 = vrot.lane.b32.xlu1 %v7513_v53, %s7263_s14 }
 0x531   :  { %1536 = vmax.xlane.f32.xlu0 %v1535_v13 }
 0x533   :  { %1748 = vrot.lane.b32.xlu1 %v7515_v56, %s7263_s14 }
 0x537   :  { %1744 = vrot.lane.b32.xlu1 %v7515_v56, %s7264_s15 }
 0x547   :  { %1570 = vrot.lane.b32.xlu0 %v7515_v56, %s7262_s12 }
 0x54b   :  { %1657 = vrot.lane.b32.xlu0 %v7527_v61, %s7262_s12 }
 0x54f   :  { %1841 = vrot.lane.b32.xlu0 %v7523_v59, %s7263_s14 }
 0x59f   :  { %v1531_v14 = vpop.xlane.xlu1 %1530 }
 0x5a0   :  { %v1539_v15 = vsub.f32 %v1522_v3, %v1531_v14 }
 0x5a1   :  { %v1528_v16 = vpop.xlane.xlu0 %1527 }
 0x5a2   :  { %v1544_v17 = vmul.f32 1.442695, %v1539_v15  ;;  %v1538_v18 = vsub.f32 %v1521_v5, %v1528_v16 }
 0x5a3   :  { %v1573_v19 = vpop.permute.xlu1 %1572 }
 0x5a4   :  { %7033 = vpow2.f32 %v1544_v17  ;;  %v1542_v20 = vmul.f32 1.442695, %v1538_v18  ;;  %6667 = vmatprep.subr.mxu1 %v1573_v19 }
 0x5a5   :  { %6668 = vmatpush3.msra.mxu1 %v1573_v19 }
 0x5a6   :  { %7035 = vpow2.f32 %v1542_v20 }
 0x5a7   :  { %v1660_v21 = vpop.permute.xlu1 %1659 }
 0x5ab   :  { %v1751_v22 = vpop.permute.xlu1 %1750 }
 0x5ac   :  { %6681 = vmatprep.subr.msk.mxu0 %vm1348_vm3, %v1751_v22 }
 0x5ad   :  { %6682 = vmatpush3.xpose.msk.msra.mxu0 %vm1348_vm3, %v1751_v22 }
 0x5af   :  { %v1749_v23 = vpop.permute.xlu1 %1748 }
 0x5b0   :  { %6683 = vmatprep.subr.msk.mxu0 %vm1348_vm3, %v1749_v23 }
 0x5b1   :  { %v7034_v24 = vpop.eup %7033  ;;  %6684 = vmatpush3.xpose.msk.msra.mxu0 %vm1348_vm3, %v1749_v23 }
 0x5b2   :  { %v1553_v25 = vsel %vm1525_vm4, %v7034_v24, 0.0 }
 0x5b3   :  { %v7036_v26 = vpop.eup %7035  ;;  %v1745_v27 = vpop.permute.xlu1 %1744  ;;  %1554 = vadd.xlane.f32.xlu0 %v1553_v25 }
 0x5b4   :  { %6685 = vmatprep.mubr.msk.f32.mxu0 %vm1348_vm3, %v1745_v27  ;;  %v1550_v28 = vsel %vm1525_vm4, %v7036_v26, 0.0 }
 0x5b5   :  { %1551 = vadd.xlane.f32.xlu1 %v1550_v28 }
 0x5b6   :  { %v1534_v29 = vpop.xlane.xlu0 %1533 }
 0x5b7   :  { %v1540_v37 = vsub.f32 %v1523_v10, %v1534_v29 }
 0x5b9   :  { %v1546_v38 = vmul.f32 1.442695, %v1540_v37 }
 0x5ba   :  { %v1537_v30 = vpop.xlane.xlu0 %1536 }
 0x5bb   :  { %v1541_v31 = vsub.f32 %v1524_v11, %v1537_v30 }
 0x5bd   :  { %v1548_v32 = vmul.f32 1.442695, %v1541_v31 }
 0x5be   :  { %v1571_v34 = vpop.permute.xlu0 %1570 }
 0x5bf   :  { %7037 = vpow2.f32 %v1548_v32  ;;  %6669 = vmatprep.subr.mxu1 %v1571_v34 }
 0x5c0   :  { %6670 = vmatpush3.msra.mxu1 %v1571_v34  ;;  %7039 = vpow2.f32 %v1546_v38 }
 0x5c1   :  { %6674 = vmatprep.subr.mxu1 %v1660_v21 }
 0x5c2   :  { %v1658_v41 = vpop.permute.xlu0 %1657 }
 0x5c6   :  { %1839 = vrot.lane.b32.xlu1 %v7527_v61, %s7263_s14  ;;  %v1842_v42 = vpop.permute.xlu0 %1841 }
 0x5cc   :  { %v7038_v35 = vpop.eup %7037 }
 0x5cd   :  { %v1559_v36 = vsel %vm1525_vm4, %v7038_v35, 0.0  ;;  %v7040_v39 = vpop.eup %7039 }
 0x5ce   :  { %1560 = vadd.xlane.f32.xlu0 %v1559_v36  ;;  %v1556_v40 = vsel %vm1525_vm4, %v7040_v39, 0.0 }
 0x5e4   :  { %1746 = vrot.lane.b32.xlu0 %v7513_v53, %s7264_s15 }
 0x5e8   :  { %1835 = vrot.lane.b32.xlu0 %v7527_v61, %s7264_s15 }
 0x5ea   :  { %1557 = vadd.xlane.f32.xlu1 %v1556_v40 }
 0x5fb   :  { %1837 = vrot.lane.b32.xlu1 %v7523_v59, %s7264_s15 }
 0x63c   :  { %v1555_v43 = vpop.xlane.xlu0 %1554 }
 0x63d   :  { %7041 = vrcp.f32 %v1555_v43 }
 0x63e   :  { %v1552_v44 = vpop.xlane.xlu1 %1551 }
 0x63f   :  { %7043 = vrcp.f32 %v1552_v44 }
 0x642   :  { %v1840_v52 = vpop.permute.xlu1 %1839 }
 0x64a   :  { %v7042_v46 = vpop.eup %7041 }
 0x64b   :  { %v1565_v49 = vmul.f32 %v7042_v46, %v7034_v24 }
 0x64c   :  { %v7044_v47 = vpop.eup %7043 }
 0x64d   :  { %v1563_v48 = vmul.f32 %v7044_v47, %v7036_v26 }
 0x64f   :  { %6671 = vmatprep.mubr.msk.f32.mxu1 %vm1525_vm4, %v1563_v48 }
 0x650   :  { %6672 = vmatmul.mubr.msk.f32.vlgmr.msra.gmra.mxu1 %vm1525_vm4, %v1565_v49 }
 0x651   :  { %6675 = vmatpush3.msra.mxu1 %v1660_v21 }
 0x652   :  { %6676 = vmatprep.subr.mxu1 %v1658_v41 }
 0x653   :  { %6677 = vmatpush3.msra.mxu1 %v1658_v41 }
 0x654   :  { %6688 = vmatprep.subr.msk.mxu1 %vm1348_vm3, %v1842_v42 }
 0x657   :  { %v1561_v50 = vpop.xlane.xlu0 %1560 }
 0x658   :  { %7045 = vrcp.f32 %v1561_v50 }
 0x65b   :  { %v1747_v51 = vpop.permute.xlu0 %1746 }
 0x65c   :  { %6686 = vmatmul.mubr.msk.f32.vlgmr.msra.gmra.mxu0 %vm1348_vm3, %v1747_v51 }
 0x65f   :  { %v1836_v0 = vpop.permute.xlu0 %1835 }
 0x665   :  { %v7046_v58 = vpop.eup %7045 }
 0x666   :  { %v1569_v63 = vmul.f32 %v7046_v58, %v7038_v35 }
 0x673   :  { %v1558_v55 = vpop.xlane.xlu1 %1557 }
 0x674   :  { %7047 = vrcp.f32 %v1558_v55 }
 0x677   :  { %v1838_v1 = vpop.permute.xlu1 %1837 }
 0x681   :  { %v7048_v60 = vpop.eup %7047 }
 0x682   :  { %v1567_v62 = vmul.f32 %v7048_v60, %v7040_v39 }
 0x684   :  { %6678 = vmatprep.mubr.msk.f32.mxu1 %vm1525_vm4, %v1567_v62 }
 0x685   :  { %6679 = vmatmul.mubr.msk.f32.vlgmr.msra.gmra.mxu1 %vm1525_vm4, %v1569_v63 }
 0x686   :  { %6689 = vmatpush3.xpose.msk.msra.mxu1 %vm1348_vm3, %v1842_v42  ;;  %6692 = vmatprep.mubr.msk.f32.mxu1 %vm1348_vm3, %v1836_v0 }
 0x687   :  { %6690 = vmatprep.subr.msk.mxu1 %vm1348_vm3, %v1840_v52 }
 0x68a   :  { %6691 = vmatpush3.xpose.msk.msra.mxu1 %vm1348_vm3, %v1840_v52 }
 0x68d   :  { %6693 = vmatmul.mubr.msk.f32.vlgmr.msra.gmra.mxu1 %vm1348_vm3, %v1838_v1 }
 0x710   :  { %v7595_v8 = vpop.f32.mrf.mxu1 }
 0x712   :  { %v7597_v9 = vpop.f32.mrf.mxu1 }
 0x71c   :  { %v6687_v2 = vpop.f32.mrf.mxu0 }
 0x71d   :  { %v1927_v3 = vmul.f32 0.35355338, %v6687_v2 }
 0x71e   :  { %v1826_v4 = vpop.f32.mrf.mxu0 }
 0x71f   :  { %v1926_v5 = vmul.f32 0.35355338, %v1826_v4  ;;  %v1933_v6 = vsel %vm1525_vm4, %v1927_v3, -inf }
 0x720   :  { %1934 = vmax.xlane.f32.xlu1 %v1933_v6 }
 0x721   :  { %v1930_v7 = vsel %vm1525_vm4, %v1926_v5, -inf }
 0x722   :  { %1931 = vmax.xlane.f32.xlu0 %v1930_v7 }
 0x745   :  { %v7599_v10 = vpop.f32.mrf.mxu1 }
 0x747   :  { %v7601_v11 = vpop.f32.mrf.mxu1 }
 0x74d   :  { %v6694_v12 = vpop.f32.mrf.mxu1 }
 0x74e   :  { %v1929_v15 = vmul.f32 0.35355338, %v6694_v12 }
 0x74f   :  { %v1917_v13 = vpop.f32.mrf.mxu1 }
 0x750   :  { %v1928_v14 = vmul.f32 0.35355338, %v1917_v13  ;;  %v1939_v17 = vsel %vm1525_vm4, %v1929_v15, -inf }
 0x752   :  { %v1936_v16 = vsel %vm1525_vm4, %v1928_v14, -inf }
 0x753   :  { %1937 = vmax.xlane.f32.xlu0 %v1936_v16 }
 0x757   :  { %1940 = vmax.xlane.f32.xlu0 %v1939_v17 }
 0x7a9   :  { %v1935_v18 = vpop.xlane.xlu1 %1934 }
 0x7aa   :  { %v1943_v19 = vsub.f32 %v1927_v3, %v1935_v18 }
 0x7ab   :  { %v1932_v20 = vpop.xlane.xlu0 %1931 }
 0x7ac   :  { %v1948_v21 = vmul.f32 1.442695, %v1943_v19  ;;  %v1942_v22 = vsub.f32 %v1926_v5, %v1932_v20 }
 0x7ae   :  { %7049 = vpow2.f32 %v1948_v21  ;;  %v1946_v23 = vmul.f32 1.442695, %v1942_v22 }
 0x7b0   :  { %7051 = vpow2.f32 %v1946_v23 }
 0x7bb   :  { %v7050_v24 = vpop.eup %7049 }
 0x7bc   :  { %v1957_v25 = vsel %vm1525_vm4, %v7050_v24, 0.0 }
 0x7bd   :  { %v7052_v26 = vpop.eup %7051  ;;  %1958 = vadd.xlane.f32.xlu0 %v1957_v25 }
 0x7be   :  { %v1954_v27 = vsel %vm1525_vm4, %v7052_v26, 0.0 }
 0x7bf   :  { %1955 = vadd.xlane.f32.xlu1 %v1954_v27 }
 0x7d0   :  { %1976 = vrot.lane.b32.xlu1 %v7513_v53, %s7265_s1 }
 0x7d3   :  { %1974 = vrot.lane.b32.xlu0 %v7515_v56, %s7265_s1 }
 0x7d4   :  { %2063 = vrot.lane.b32.xlu1 %v7523_v59, %s7265_s1 }
 0x7d7   :  { %2061 = vrot.lane.b32.xlu0 %v7527_v61, %s7265_s1 }
 0x7d8   :  { %2154 = vrot.lane.b32.xlu1 %v7513_v53, %s7266_s16 }
 0x7db   :  { %2245 = vrot.lane.b32.xlu0 %v7523_v59, %s7266_s16 }
 0x7dc   :  { %2152 = vrot.lane.b32.xlu1 %v7515_v56, %s7266_s16  ;;  %v1938_v28 = vpop.xlane.xlu0 %1937 }
 0x7dd   :  { %v1944_v32 = vsub.f32 %v1928_v14, %v1938_v28 }
 0x7df   :  { %v1950_v34 = vmul.f32 1.442695, %v1944_v32 }
 0x7e0   :  { %2148 = vrot.lane.b32.xlu1 %v7515_v56, %s7267_s17  ;;  %v1941_v29 = vpop.xlane.xlu0 %1940 }
 0x7e1   :  { %v1945_v30 = vsub.f32 %v1929_v15, %v1941_v29 }
 0x7e3   :  { %v1952_v31 = vmul.f32 1.442695, %v1945_v30 }
 0x7e4   :  { %2243 = vrot.lane.b32.xlu1 %v7527_v61, %s7266_s16 }
 0x7e5   :  { %7053 = vpow2.f32 %v1952_v31 }
 0x7e6   :  { %7055 = vpow2.f32 %v1950_v34 }
 0x7f2   :  { %v7054_v35 = vpop.eup %7053 }
 0x7f3   :  { %v1963_v36 = vsel %vm1525_vm4, %v7054_v35, 0.0  ;;  %v7056_v37 = vpop.eup %7055 }
 0x7f4   :  { %v1960_v38 = vsel %vm1525_vm4, %v7056_v37, 0.0 }
 0x7fa   :  { %1964 = vadd.xlane.f32.xlu0 %v1963_v36 }
 0x808   :  { %1961 = vadd.xlane.f32.xlu1 %v1960_v38 }
 0x810   :  { %2150 = vrot.lane.b32.xlu0 %v7513_v53, %s7267_s17 }
 0x814   :  { %2239 = vrot.lane.b32.xlu0 %v7527_v61, %s7267_s17 }
 0x819   :  { %2241 = vrot.lane.b32.xlu1 %v7523_v59, %s7267_s17 }
 0x846   :  { %v1959_v39 = vpop.xlane.xlu0 %1958 }
 0x847   :  { %7057 = vrcp.f32 %v1959_v39 }
 0x848   :  { %v1956_v40 = vpop.xlane.xlu1 %1955 }
 0x849   :  { %7059 = vrcp.f32 %v1956_v40 }
 0x84a   :  { %v1975_v41 = vpop.permute.xlu0 %1974 }
 0x84c   :  { %v1977_v42 = vpop.permute.xlu1 %1976 }
 0x84d   :  { %6695 = vmatprep.subr.mxu0 %v1977_v42 }
 0x84e   :  { %6696 = vmatpush3.msra.mxu0 %v1977_v42  ;;  %v2062_v43 = vpop.permute.xlu0 %2061 }
 0x84f   :  { %6697 = vmatprep.subr.mxu0 %v1975_v41 }
 0x850   :  { %v2064_v44 = vpop.permute.xlu1 %2063  ;;  %6698 = vmatpush3.msra.mxu0 %v1975_v41 }
 0x851   :  { %6702 = vmatprep.subr.mxu1 %v2064_v44 }
 0x852   :  { %6703 = vmatpush3.msra.mxu1 %v2064_v44  ;;  %v2246_v46 = vpop.permute.xlu0 %2245 }
 0x853   :  { %6704 = vmatprep.subr.mxu1 %v2062_v43 }
 0x854   :  { %v2155_v47 = vpop.permute.xlu1 %2154  ;;  %6705 = vmatpush3.msra.mxu1 %v2062_v43  ;;  %v7058_v48 = vpop.eup %7057 }
 0x855   :  { %6709 = vmatprep.subr.msk.mxu0 %vm1348_vm3, %v2155_v47  ;;  %6716 = vmatprep.subr.msk.mxu1 %vm1348_vm3, %v2246_v46  ;;  %v1969_v52 = vmul.f32 %v7058_v48, %v7050_v24 }
 0x856   :  { %v7060_v49 = vpop.eup %7059 }
 0x857   :  { %v1967_v50 = vmul.f32 %v7060_v49, %v7052_v26 }
 0x858   :  { %v2153_v51 = vpop.permute.xlu1 %2152 }
 0x859   :  { %6699 = vmatprep.mubr.msk.f32.mxu0 %vm1525_vm4, %v1967_v50 }
 0x85a   :  { %6700 = vmatmul.mubr.msk.f32.vlgmr.msra.gmra.mxu0 %vm1525_vm4, %v1969_v52 }
 0x85b   :  { %6710 = vmatpush3.xpose.msk.msra.mxu0 %vm1348_vm3, %v2155_v47 }
 0x85c   :  { %6711 = vmatprep.subr.msk.mxu0 %vm1348_vm3, %v2153_v51  ;;  %v2149_v55 = vpop.permute.xlu1 %2148 }
 0x85d   :  { %6713 = vmatprep.mubr.msk.f32.mxu0 %vm1348_vm3, %v2149_v55 }
 0x85f   :  { %6712 = vmatpush3.xpose.msk.msra.mxu0 %vm1348_vm3, %v2153_v51 }
 0x860   :  { %v2244_v62 = vpop.permute.xlu1 %2243 }
 0x883   :  { %v1965_v58 = vpop.xlane.xlu0 %1964 }
 0x884   :  { %7061 = vrcp.f32 %v1965_v58 }
 0x887   :  { %v2151_v60 = vpop.permute.xlu0 %2150 }
 0x888   :  { %6714 = vmatmul.mubr.msk.f32.vlgmr.msra.gmra.mxu0 %vm1348_vm3, %v2151_v60 }
 0x88b   :  { %v2240_v4 = vpop.permute.xlu0 %2239 }
 0x891   :  { %v1962_v63 = vpop.xlane.xlu1 %1961  ;;  %v7062_v0 = vpop.eup %7061 }
 0x892   :  { %7063 = vrcp.f32 %v1962_v63  ;;  %v1973_v3 = vmul.f32 %v7062_v0, %v7054_v35 }
 0x895   :  { %v2242_v5 = vpop.permute.xlu1 %2241 }
 0x89f   :  { %v7064_v1 = vpop.eup %7063 }
 0x8a0   :  { %v1971_v2 = vmul.f32 %v7064_v1, %v7056_v37 }
 0x8a2   :  { %6706 = vmatprep.mubr.msk.f32.mxu1 %vm1525_vm4, %v1971_v2 }
 0x8a3   :  { %6707 = vmatmul.mubr.msk.f32.vlgmr.msra.gmra.mxu1 %vm1525_vm4, %v1973_v3 }
 0x8a4   :  { %6717 = vmatpush3.xpose.msk.msra.mxu1 %vm1348_vm3, %v2246_v46  ;;  %6720 = vmatprep.mubr.msk.f32.mxu1 %vm1348_vm3, %v2240_v4 }
 0x8a5   :  { %6718 = vmatprep.subr.msk.mxu1 %vm1348_vm3, %v2244_v62 }
 0x8a8   :  { %6719 = vmatpush3.xpose.msk.msra.mxu1 %vm1348_vm3, %v2244_v62 }
 0x8ab   :  { %6721 = vmatmul.mubr.msk.f32.vlgmr.msra.gmra.mxu1 %vm1348_vm3, %v2242_v5 }
 0x91a   :  { %v7649_v6 = vpop.f32.mrf.mxu0 }
 0x91c   :  { %v7651_v7 = vpop.f32.mrf.mxu0 }
 0x948   :  { %v6715_v12 = vpop.f32.mrf.mxu0 }
 0x949   :  { %v2331_v13 = vmul.f32 0.35355338, %v6715_v12 }
 0x94a   :  { %v2230_v14 = vpop.f32.mrf.mxu0 }
 0x94b   :  { %v2330_v15 = vmul.f32 0.35355338, %v2230_v14  ;;  %v2337_v16 = vsel %vm1525_vm4, %v2331_v13, -inf }
 0x94c   :  { %2338 = vmax.xlane.f32.xlu1 %v2337_v16 }
 0x94d   :  { %v2334_v17 = vsel %vm1525_vm4, %v2330_v15, -inf }
 0x94e   :  { %2335 = vmax.xlane.f32.xlu0 %v2334_v17 }
 0x963   :  { %v7655_v18 = vpop.f32.mrf.mxu1 }
 0x965   :  { %v7657_v19 = vpop.f32.mrf.mxu1 }
 0x96b   :  { %v6722_v20 = vpop.f32.mrf.mxu1 }
 0x96c   :  { %v2333_v23 = vmul.f32 0.35355338, %v6722_v20 }
 0x96d   :  { %v2321_v21 = vpop.f32.mrf.mxu1 }
 0x96e   :  { %v2332_v22 = vmul.f32 0.35355338, %v2321_v21  ;;  %v2343_v25 = vsel %vm1525_vm4, %v2333_v23, -inf }
 0x970   :  { %v2340_v24 = vsel %vm1525_vm4, %v2332_v22, -inf }
 0x971   :  { %2341 = vmax.xlane.f32.xlu0 %v2340_v24 }
 0x975   :  { %2344 = vmax.xlane.f32.xlu0 %v2343_v25 }
 0x9d5   :  { %v2339_v26 = vpop.xlane.xlu1 %2338 }
 0x9d6   :  { %v2347_v27 = vsub.f32 %v2331_v13, %v2339_v26 }
 0x9d7   :  { %v2336_v28 = vpop.xlane.xlu0 %2335 }
 0x9d8   :  { %v2352_v29 = vmul.f32 1.442695, %v2347_v27  ;;  %v2346_v30 = vsub.f32 %v2330_v15, %v2336_v28 }
 0x9da   :  { %7065 = vpow2.f32 %v2352_v29  ;;  %v2350_v31 = vmul.f32 1.442695, %v2346_v30 }
 0x9dc   :  { %7067 = vpow2.f32 %v2350_v31 }
 0x9e7   :  { %v7066_v32 = vpop.eup %7065 }
 0x9e8   :  { %v2361_v34 = vsel %vm1525_vm4, %v7066_v32, 0.0 }
 0x9e9   :  { %v7068_v35 = vpop.eup %7067  ;;  %2362 = vadd.xlane.f32.xlu0 %v2361_v34 }
 0x9ea   :  { %v2358_v36 = vsel %vm1525_vm4, %v7068_v35, 0.0 }
 0x9eb   :  { %2359 = vadd.xlane.f32.xlu1 %v2358_v36 }
 0x9fa   :  { %v2342_v37 = vpop.xlane.xlu0 %2341 }
 0x9fb   :  { %v2348_v41 = vsub.f32 %v2332_v22, %v2342_v37 }
 0x9fc   :  { %2380 = vrot.lane.b32.xlu1 %v7513_v53, %s7268_s18 }
 0x9fd   :  { %v2354_v42 = vmul.f32 1.442695, %v2348_v41 }
 0x9fe   :  { %v2345_v38 = vpop.xlane.xlu0 %2344 }
 0x9ff   :  { %2378 = vrot.lane.b32.xlu0 %v7515_v56, %s7268_s18  ;;  %v2349_v39 = vsub.f32 %v2333_v23, %v2345_v38 }
 0xa00   :  { %2467 = vrot.lane.b32.xlu1 %v7523_v59, %s7268_s18 }
 0xa01   :  { %v2356_v40 = vmul.f32 1.442695, %v2349_v39 }
 0xa03   :  { %2465 = vrot.lane.b32.xlu0 %v7527_v61, %s7268_s18  ;;  %7069 = vpow2.f32 %v2356_v40 }
 0xa04   :  { %2558 = vrot.lane.b32.xlu1 %v7513_v53, %s7269_s19  ;;  %7071 = vpow2.f32 %v2354_v42 }
 0xa07   :  { %2649 = vrot.lane.b32.xlu0 %v7523_v59, %s7269_s19 }
 0xa08   :  { %2556 = vrot.lane.b32.xlu1 %v7515_v56, %s7269_s19 }
 0xa0c   :  { %2552 = vrot.lane.b32.xlu1 %v7515_v56, %s7270_s20 }
 0xa10   :  { %2647 = vrot.lane.b32.xlu1 %v7527_v61, %s7269_s19  ;;  %v7070_v43 = vpop.eup %7069 }
 0xa11   :  { %v2367_v44 = vsel %vm1525_vm4, %v7070_v43, 0.0  ;;  %v7072_v46 = vpop.eup %7071 }
 0xa12   :  { %v2364_v47 = vsel %vm1525_vm4, %v7072_v46, 0.0 }
 0xa26   :  { %2368 = vadd.xlane.f32.xlu0 %v2367_v44 }
 0xa34   :  { %2365 = vadd.xlane.f32.xlu1 %v2364_v47 }
 0xa3c   :  { %2554 = vrot.lane.b32.xlu0 %v7513_v53, %s7270_s20 }
 0xa40   :  { %2643 = vrot.lane.b32.xlu0 %v7527_v61, %s7270_s20 }
 0xa45   :  { %2645 = vrot.lane.b32.xlu1 %v7523_v59, %s7270_s20 }
 0xa72   :  { %v2363_v48 = vpop.xlane.xlu0 %2362 }
 0xa73   :  { %7073 = vrcp.f32 %v2363_v48 }
 0xa74   :  { %v2360_v49 = vpop.xlane.xlu1 %2359 }
 0xa75   :  { %7075 = vrcp.f32 %v2360_v49 }
 0xa76   :  { %v2379_v50 = vpop.permute.xlu0 %2378 }
 0xa78   :  { %v2381_v51 = vpop.permute.xlu1 %2380 }
 0xa79   :  { %6723 = vmatprep.subr.mxu0 %v2381_v51 }
 0xa7a   :  { %6724 = vmatpush3.msra.mxu0 %v2381_v51  ;;  %v2466_v52 = vpop.permute.xlu0 %2465 }
 0xa7b   :  { %6725 = vmatprep.subr.mxu0 %v2379_v50 }
 0xa7c   :  { %v2468_v55 = vpop.permute.xlu1 %2467  ;;  %6726 = vmatpush3.msra.mxu0 %v2379_v50 }
 0xa7d   :  { %6730 = vmatprep.subr.mxu1 %v2468_v55 }
 0xa7e   :  { %6731 = vmatpush3.msra.mxu1 %v2468_v55  ;;  %v2650_v58 = vpop.permute.xlu0 %2649 }
 0xa7f   :  { %6732 = vmatprep.subr.mxu1 %v2466_v52 }
 0xa80   :  { %v2559_v60 = vpop.permute.xlu1 %2558  ;;  %6733 = vmatpush3.msra.mxu1 %v2466_v52  ;;  %v7074_v62 = vpop.eup %7073 }
 0xa81   :  { %6737 = vmatprep.subr.msk.mxu0 %vm1348_vm3, %v2559_v60  ;;  %6744 = vmatprep.subr.msk.mxu1 %vm1348_vm3, %v2650_v58  ;;  %v2373_v2 = vmul.f32 %v7074_v62, %v7066_v32 }
 0xa82   :  { %v7076_v63 = vpop.eup %7075 }
 0xa83   :  { %v2371_v0 = vmul.f32 %v7076_v63, %v7068_v35 }
 0xa84   :  { %v2557_v1 = vpop.permute.xlu1 %2556 }
 0xa85   :  { %6727 = vmatprep.mubr.msk.f32.mxu0 %vm1525_vm4, %v2371_v0 }
 0xa86   :  { %6728 = vmatmul.mubr.msk.f32.vlgmr.msra.gmra.mxu0 %vm1525_vm4, %v2373_v2 }
 0xa87   :  { %6738 = vmatpush3.xpose.msk.msra.mxu0 %vm1348_vm3, %v2559_v60 }
 0xa88   :  { %6739 = vmatprep.subr.msk.mxu0 %vm1348_vm3, %v2557_v1  ;;  %v2553_v3 = vpop.permute.xlu1 %2552 }
 0xa89   :  { %6741 = vmatprep.mubr.msk.f32.mxu0 %vm1348_vm3, %v2553_v3 }
 0xa8b   :  { %6740 = vmatpush3.xpose.msk.msra.mxu0 %vm1348_vm3, %v2557_v1 }
 0xa8c   :  { %v2648_v12 = vpop.permute.xlu1 %2647 }
 0xaaf   :  { %v2369_v4 = vpop.xlane.xlu0 %2368 }
 0xab0   :  { %7077 = vrcp.f32 %v2369_v4 }
 0xab3   :  { %v2555_v5 = vpop.permute.xlu0 %2554 }
 0xab4   :  { %6742 = vmatmul.mubr.msk.f32.vlgmr.msra.gmra.mxu0 %vm1348_vm3, %v2555_v5 }
 0xab7   :  { %v2644_v20 = vpop.permute.xlu0 %2643 }
 0xabd   :  { %v2366_v13 = vpop.xlane.xlu1 %2365  ;;  %v7078_v14 = vpop.eup %7077 }
 0xabe   :  { %7079 = vrcp.f32 %v2366_v13  ;;  %v2377_v17 = vmul.f32 %v7078_v14, %v7070_v43 }
 0xac1   :  { %v2646_v21 = vpop.permute.xlu1 %2645 }
 0xacb   :  { %v7080_v15 = vpop.eup %7079 }
 0xacc   :  { %v2375_v16 = vmul.f32 %v7080_v15, %v7072_v46 }
 0xace   :  { %6734 = vmatprep.mubr.msk.f32.mxu1 %vm1525_vm4, %v2375_v16 }
 0xacf   :  { %6735 = vmatmul.mubr.msk.f32.vlgmr.msra.gmra.mxu1 %vm1525_vm4, %v2377_v17 }
 0xad0   :  { %6745 = vmatpush3.xpose.msk.msra.mxu1 %vm1348_vm3, %v2650_v58  ;;  %6748 = vmatprep.mubr.msk.f32.mxu1 %vm1348_vm3, %v2644_v20  ;;  %v1155_v20 = vld [vmem:[#allocation5 + $0x28d] sm:$0xff] }
 0xad1   :  { %6746 = vmatprep.subr.msk.mxu1 %vm1348_vm3, %v2648_v12 }
 0xad4   :  { %6747 = vmatpush3.xpose.msk.msra.mxu1 %vm1348_vm3, %v2648_v12 }
 0xad7   :  { %6749 = vmatmul.mubr.msk.f32.vlgmr.msra.gmra.mxu1 %vm1348_vm3, %v2646_v21  ;;  %v1154_v21 = vld [vmem:[#allocation5 + $0x285] sm:$0xff] }
 0xb46   :  { %v6729_v22 = vpop.f32.mrf.mxu0 }
 0xb48   :  { %v2456_v23 = vpop.f32.mrf.mxu0 }
 0xb74   :  { %v6743_v24 = vpop.f32.mrf.mxu0 }
 0xb75   :  { %v2735_v25 = vmul.f32 0.35355338, %v6743_v24 }
 0xb76   :  { %v2634_v26 = vpop.f32.mrf.mxu0 }
 0xb77   :  { %v2734_v27 = vmul.f32 0.35355338, %v2634_v26  ;;  %v2741_v28 = vsel %vm1525_vm4, %v2735_v25, -inf }
 0xb78   :  { %2742 = vmax.xlane.f32.xlu1 %v2741_v28 }
 0xb79   :  { %v2738_v29 = vsel %vm1525_vm4, %v2734_v27, -inf }
 0xb7a   :  { %2739 = vmax.xlane.f32.xlu0 %v2738_v29 }
 0xb8f   :  { %v7707_v30 = vpop.f32.mrf.mxu1 }
 0xb91   :  { %v7709_v31 = vpop.f32.mrf.mxu1 }
 0xb97   :  { %v6750_v32 = vpop.f32.mrf.mxu1 }
 0xb98   :  { %v2737_v36 = vmul.f32 0.35355338, %v6750_v32 }
 0xb99   :  { %v2725_v34 = vpop.f32.mrf.mxu1 }
 0xb9a   :  { %v2736_v35 = vmul.f32 0.35355338, %v2725_v34  ;;  %v2747_v38 = vsel %vm1525_vm4, %v2737_v36, -inf }
 0xb9c   :  { %v2744_v37 = vsel %vm1525_vm4, %v2736_v35, -inf }
 0xb9d   :  { %2745 = vmax.xlane.f32.xlu0 %v2744_v37 }
 0xba1   :  { %2748 = vmax.xlane.f32.xlu0 %v2747_v38 }
 0xc01   :  { %v2743_v39 = vpop.xlane.xlu1 %2742 }
 0xc02   :  { %v2751_v40 = vsub.f32 %v2735_v25, %v2743_v39 }
 0xc03   :  { %v2740_v41 = vpop.xlane.xlu0 %2739 }
 0xc04   :  { %v2756_v42 = vmul.f32 1.442695, %v2751_v40  ;;  %v2750_v43 = vsub.f32 %v2734_v27, %v2740_v41 }
 0xc06   :  { %7081 = vpow2.f32 %v2756_v42  ;;  %v2754_v44 = vmul.f32 1.442695, %v2750_v43 }
 0xc08   :  { %7083 = vpow2.f32 %v2754_v44 }
 0xc13   :  { %v7082_v46 = vpop.eup %7081 }
 0xc14   :  { %v2765_v47 = vsel %vm1525_vm4, %v7082_v46, 0.0 }
 0xc15   :  { %v7084_v48 = vpop.eup %7083  ;;  %2766 = vadd.xlane.f32.xlu0 %v2765_v47 }
 0xc16   :  { %v2762_v49 = vsel %vm1525_vm4, %v7084_v48, 0.0 }
 0xc17   :  { %2763 = vadd.xlane.f32.xlu1 %v2762_v49 }
 0xc26   :  { %v2746_v50 = vpop.xlane.xlu0 %2745 }
 0xc27   :  { %v2752_v58 = vsub.f32 %v2736_v35, %v2746_v50  ;;  %v6035_v50 = vld [vmem:[#allocation5 + $0x295] ss:$0 sm:$0xff] }
 0xc28   :  { %2784 = vrot.lane.b32.xlu1 %v7513_v53, %s7271_s21 }
 0xc29   :  { %v2758_v60 = vmul.f32 1.442695, %v2752_v58 }
 0xc2a   :  { %v2749_v51 = vpop.xlane.xlu0 %2748 }
 0xc2b   :  { %v2753_v52 = vsub.f32 %v2737_v36, %v2749_v51 }
 0xc2c   :  { %2871 = vrot.lane.b32.xlu1 %v7523_v59, %s7271_s21 }
 0xc2d   :  { %v2760_v55 = vmul.f32 1.442695, %v2753_v52 }
 0xc2f   :  { %7085 = vpow2.f32 %v2760_v55 }
 0xc30   :  { %7087 = vpow2.f32 %v2758_v60 }
 0xc3c   :  { %v7086_v62 = vpop.eup %7085 }
 0xc3d   :  { %v2771_v63 = vsel %vm1525_vm4, %v7086_v62, 0.0  ;;  %v7088_v0 = vpop.eup %7087 }
 0xc3e   :  { %2772 = vadd.xlane.f32.xlu0 %v2771_v63  ;;  %v2768_v1 = vsel %vm1525_vm4, %v7088_v0, 0.0 }
 0xc50   :  { %2769 = vadd.xlane.f32.xlu1 %v2768_v1 }
 0xc54   :  { %2782 = vrot.lane.b32.xlu0 %v7515_v56, %s7271_s21 }
 0xc58   :  { %2960 = vrot.lane.b32.xlu0 %v7651_v7, %s7259_s13 }
 0xc5c   :  { %2976 = vrot.lane.b32.xlu0 %v2456_v23, %s7272_s22  ;;  %v1152_v23 = vld [vmem:[#allocation5 + $0x275] sm:$0xff] }
 0xc61   :  { %2869 = vrot.lane.b32.xlu1 %v7527_v61, %s7271_s21 }
 0xc65   :  { %2962 = vrot.lane.b32.xlu1 %v7649_v6, %s7259_s13 }
 0xc69   :  { %2978 = vrot.lane.b32.xlu1 %v6729_v22, %s7272_s22  ;;  %v1153_v22 = vld [vmem:[#allocation5 + $0x27d] sm:$0xff] }
 0xc9e   :  { %v2767_v3 = vpop.xlane.xlu0 %2766 }
 0xca0   :  { %v2764_v53 = vpop.xlane.xlu1 %2763 }
 0xca1   :  { %7089 = vrcp.f32 %v2764_v53 }
 0xca2   :  { %7091 = vrcp.f32 %v2767_v3 }
 0xca4   :  { %v2785_v59 = vpop.permute.xlu1 %2784 }
 0xca5   :  { %6751 = vmatprep.subr.mxu0 %v2785_v59 }
 0xca6   :  { %6752 = vmatpush3.msra.mxu0 %v2785_v59 }
 0xca8   :  { %v2872_v56 = vpop.permute.xlu1 %2871 }
 0xca9   :  { %6758 = vmatprep.subr.mxu1 %v2872_v56 }
 0xcaa   :  { %6759 = vmatpush3.msra.mxu1 %v2872_v56 }
 0xcae   :  { %v7090_v7 = vpop.eup %7089 }
 0xcaf   :  { %v2775_v2 = vmul.f32 %v7090_v7, %v7084_v48  ;;  %v7092_v4 = vpop.eup %7091 }
 0xcb0   :  { %v2777_v6 = vmul.f32 %v7092_v4, %v7082_v46 }
 0xcb1   :  { %6755 = vmatprep.mubr.msk.f32.mxu0 %vm1525_vm4, %v2775_v2 }
 0xcc7   :  { %v2773_v61 = vpop.xlane.xlu0 %2772 }
 0xcc8   :  { %7093 = vrcp.f32 %v2773_v61 }
 0xccb   :  { %v2783_v5 = vpop.permute.xlu0 %2782 }
 0xccc   :  { %6753 = vmatprep.subr.mxu0 %v2783_v5 }
 0xccd   :  { %6754 = vmatpush3.msra.mxu0 %v2783_v5 }
 0xcce   :  { %6756 = vmatmul.mubr.msk.f32.vlgmr.msra.gmra.mxu0 %vm1525_vm4, %v2777_v6  ;;  %6765 = vmatprep.subr.mxu0 %v1155_v20 }
 0xccf   :  { %6766 = vmatpush3.msra.mxu0 %v1155_v20  ;;  %v2961_v29 = vpop.permute.xlu0 %2960 }
 0xcd0   :  { %6767 = vmatprep.subr.mxu0 %v1154_v21 }
 0xcd1   :  { %6768 = vmatpush3.msra.mxu0 %v1154_v21 }
 0xcd2   :  { %6769 = vmatprep.subr.mxu0 %v1153_v22 }
 0xcd3   :  { %6770 = vmatpush3.msra.mxu0 %v1153_v22  ;;  %v2977_v34 = vpop.permute.xlu0 %2976 }
 0xcd4   :  { %6771 = vmatprep.subr.mxu0 %v1152_v23 }
 0xcd5   :  { %v7094_v14 = vpop.eup %7093  ;;  %6772 = vmatpush3.msra.mxu0 %v1152_v23 }
 0xcd6   :  { %v2781_v17 = vmul.f32 %v7094_v14, %v7086_v62  ;;  %v1159_v14 = vld [vmem:[#allocation5 + $0x2a6] sm:$0xff] }
 0xcd9   :  { %v2770_v12 = vpop.xlane.xlu1 %2769 }
 0xcda   :  { %7095 = vrcp.f32 %v2770_v12 }
 0xcdd   :  { %v2870_v13 = vpop.permute.xlu1 %2869 }
 0xcde   :  { %6760 = vmatprep.subr.mxu1 %v2870_v13 }
 0xcdf   :  { %6761 = vmatpush3.msra.mxu1 %v2870_v13  ;;  %v1160_v13 = vld [vmem:[#allocation5 + $0x2ae] sm:$0xff] }
 0xce0   :  { %6779 = vmatprep.subr.mxu1 %v1160_v13 }
 0xce1   :  { %v2963_v28 = vpop.permute.xlu1 %2962 }
 0xce5   :  { %v2979_v32 = vpop.permute.xlu1 %2978 }
 0xce7   :  { %v7096_v15 = vpop.eup %7095 }
 0xce8   :  { %v2779_v16 = vmul.f32 %v7096_v15, %v7088_v0  ;;  %v1158_v15 = vld [vmem:[#allocation5 + $0x29e] sm:$0xff] }
 0xcea   :  { %6762 = vmatprep.mubr.msk.f32.mxu1 %vm1525_vm4, %v2779_v16  ;;  %v1157_v16 = vld [vmem:[#allocation5 + $0x296] sm:$0xff] }
 0xceb   :  { %6763 = vmatmul.mubr.msk.f32.vlgmr.msra.gmra.mxu1 %vm1525_vm4, %v2781_v17 }
 0xcec   :  { %6780 = vmatpush3.msra.mxu1 %v1160_v13 }
 0xced   :  { %6781 = vmatprep.subr.mxu1 %v1159_v14 }
 0xcee   :  { %6782 = vmatpush3.msra.mxu1 %v1159_v14 }
 0xcef   :  { %6783 = vmatprep.subr.mxu1 %v1158_v15 }
 0xcf0   :  { %6784 = vmatpush3.msra.mxu1 %v1158_v15 }
 0xcf1   :  { %6785 = vmatprep.subr.mxu1 %v1157_v16 }
 0xcf2   :  { %6786 = vmatpush3.msra.mxu1 %v1157_v16 }
 0xd8e   :  { %v6757_v24 = vpop.f32.mrf.mxu0 }
 0xd8f   :  { %2994 = vrot.lane.b32.xlu1 %v6757_v24, %s7273_s23 }
 0xd90   :  { %v2860_v25 = vpop.f32.mrf.mxu0 }
 0xd91   :  { %2992 = vrot.lane.b32.xlu0 %v2860_v25, %s7273_s23 }
 0xd93   :  { %2966 = vrot.lane.b32.xlu1 %v7655_v18, %s7259_s13  ;;  %v3004_v18 = vsel %vm1348_vm3, %v7597_v9, %v2961_v29 }
 0xd95   :  { %2964 = vrot.lane.b32.xlu0 %v7657_v19, %s7259_s13 }
 0xd97   :  { %2982 = vrot.lane.b32.xlu1 %v7707_v30, %s7272_s22  ;;  %v3008_v30 = vsel %vm1525_vm4, %v3004_v18, %v2977_v34 }
 0xd99   :  { %2980 = vrot.lane.b32.xlu0 %v7709_v31, %s7272_s22  ;;  %v3005_v31 = vsel %vm1348_vm3, %v7595_v8, %v2963_v28 }
 0xd9a   :  { %v3009_v36 = vsel %vm1525_vm4, %v3005_v31, %v2979_v32 }
 0xdab   :  { %v6764_v26 = vpop.f32.mrf.mxu1 }
 0xdac   :  { %2998 = vrot.lane.b32.xlu1 %v6764_v26, %s7273_s23 }
 0xdad   :  { %v2947_v27 = vpop.f32.mrf.mxu1 }
 0xdae   :  { %2996 = vrot.lane.b32.xlu0 %v2947_v27, %s7273_s23 }
 0xe01   :  { %v2995_v19 = vpop.permute.xlu1 %2994 }
 0xe02   :  { %v3014_v38 = vsel %vm3012_vm5, %v3009_v36, %v2995_v19 }
 0xe03   :  { %v2993_v35 = vpop.permute.xlu0 %2992 }
 0xe04   :  { %v3013_v37 = vsel %vm3012_vm5, %v3008_v30, %v2993_v35  ;;  %v6040_v35 = vld [vmem:[#allocation5 + $0x252] ss:$0 sm:$0xff] }
 0xe05   :  { %6773 = vmatprep.mubr.msk.f32.mxu0 %vm1171_vm2, %v3013_v37  ;;  %v2967_v39 = vpop.permute.xlu1 %2966 }
 0xe06   :  { %6774 = vmatmul.mubr.msk.f32.vlgmr.msra.gmra.mxu0 %vm1171_vm2, %v3014_v38  ;;  %v3007_v8 = vsel %vm1348_vm3, %v7599_v10, %v2967_v39 }
 0xe07   :  { %v2965_v9 = vpop.permute.xlu0 %2964 }
 0xe08   :  { %v3006_v42 = vsel %vm1348_vm3, %v7601_v11, %v2965_v9  ;;  %v6041_v9 = vld [vmem:[#allocation5 + $0x253] ss:$0 sm:$0xff] }
 0xe09   :  { %v2983_v40 = vpop.permute.xlu1 %2982 }
 0xe0a   :  { %v3011_v47 = vsel %vm1525_vm4, %v3007_v8, %v2983_v40 }
 0xe0b   :  { %v2981_v41 = vpop.permute.xlu0 %2980 }
 0xe0c   :  { %v3010_v44 = vsel %vm1525_vm4, %v3006_v42, %v2981_v41 }
 0xe1e   :  { %v2999_v43 = vpop.permute.xlu1 %2998 }
 0xe1f   :  { %v3016_v49 = vsel %vm3012_vm5, %v3011_v47, %v2999_v43 }
 0xe20   :  { %v2997_v46 = vpop.permute.xlu0 %2996 }
 0xe21   :  { %v3015_v48 = vsel %vm3012_vm5, %v3010_v44, %v2997_v46 }
 0xe22   :  { %6776 = vmatprep.mubr.msk.f32.mxu0 %vm1171_vm2, %v3015_v48 }
 0xe23   :  { %6777 = vmatmul.mubr.msk.f32.gmra.mxu0 %vm1171_vm2, %v3016_v49 }
 0xec6   :  { %v6775_v51 = vpop.f32.mrf.mxu0 }
 0xec7   :  { %v3105_v11 = vadd.f32 %v6775_v51, %v6035_v50 }
 0xec8   :  { %v3099_v52 = vpop.f32.mrf.mxu0 }
 0xec9   :  { %v7768_v55 = vadd.f32 %v3105_v11, %v7483_v45  ;;  %v3100_v10 = vadd.f32 %v6035_v50, %v3099_v52 }
 0xecb   :  { %v7771_v58 = vadd.f32 %v3100_v10, %v7471_v33  ;;  %v3125_v60 = vsel %vm1171_vm2, %v7768_v55, 0.0 }
 0xecc   :  { %3126 = vadd.xlane.f32.xlu1 %v3125_v60 }
 0xecd   :  { %v3122_v62 = vsel %vm1171_vm2, %v7771_v58, 0.0 }
 0xece   :  { %3123 = vadd.xlane.f32.xlu0 %v3122_v62 }
 0xee3   :  { %v6778_v63 = vpop.f32.mrf.mxu0 }
 0xee4   :  { %v3115_v1 = vadd.f32 %v6778_v63, %v6035_v50  ;;  %v1169_v63 = vld [vmem:[#allocation5 + $0x2ef] sm:$0xff] }
 0xee5   :  { %v3109_v0 = vpop.f32.mrf.mxu0  ;;  %6793 = vmatprep.subr.mxu0 %v1169_v63 }
 0xee6   :  { %v3110_v53 = vadd.f32 %v6035_v50, %v3109_v0  ;;  %v7781_v45 = vadd.f32 %v3115_v1, %v7497_v57  ;;  %6794 = vmatpush3.msra.mxu0 %v1169_v63  ;;  %v1168_v0 = vld [vmem:[#allocation5 + $0x2e7] sm:$0xff]  ;;  %v1167_v1 = vld [vmem:[#allocation5 + $0x2df] sm:$0xff] }
 0xee7   :  { %6795 = vmatprep.subr.mxu0 %v1168_v0 }
 0xee8   :  { %v7778_v59 = vadd.f32 %v3110_v53, %v7493_v54  ;;  %v3131_v56 = vsel %vm1171_vm2, %v7781_v45, 0.0  ;;  %6796 = vmatpush3.msra.mxu0 %v1168_v0  ;;  %v1166_v53 = vld [vmem:[#allocation5 + $0x2d7] sm:$0xff] }
 0xee9   :  { %6797 = vmatprep.subr.mxu0 %v1167_v1 }
 0xeea   :  { %v3128_v33 = vsel %vm1171_vm2, %v7778_v59, 0.0  ;;  %6798 = vmatpush3.msra.mxu0 %v1167_v1 }
 0xeeb   :  { %3129 = vadd.xlane.f32.xlu0 %v3128_v33  ;;  %v1165_v33 = vld [vmem:[#allocation5 + $0x2cf] sm:$0xff]  ;;  %6799 = vmatprep.subr.mxu0 %v1166_v53 }
 0xeec   :  { %6800 = vmatpush3.msra.mxu0 %v1166_v53 }
 0xeed   :  { %6801 = vmatprep.subr.mxu0 %v1165_v33 }
 0xeee   :  { %6802 = vmatpush3.msra.mxu0 %v1165_v33 }
 0xeef   :  { %3132 = vadd.xlane.f32.xlu0 %v3131_v56  ;;  %v1164_v56 = vld [vmem:[#allocation5 + $0x2c7] sm:$0xff] }
 0xef0   :  { %6803 = vmatprep.subr.mxu0 %v1164_v56 }
 0xef1   :  { %6804 = vmatpush3.msra.mxu0 %v1164_v56 }
 0xf55   :  { %v3127_v7 = vpop.xlane.xlu1 %3126 }
 0xf56   :  { %v3135_v2 = vmul.f32 0.03125, %v3127_v7  ;;  %v1163_v7 = vld [vmem:[#allocation5 + $0x2bf] sm:$0xff] }
 0xf57   :  { %v3124_v3 = vpop.xlane.xlu0 %3123  ;;  %6805 = vmatprep.subr.mxu0 %v1163_v7 }
 0xf58   :  { %v3139_v61 = vsub.f32 %v7768_v55, %v3135_v2  ;;  %v3134_v4 = vmul.f32 0.03125, %v3124_v3  ;;  %v1162_v2 = vld [vmem:[#allocation5 + $0x2b7] sm:$0xff]  ;;  %6806 = vmatpush3.msra.mxu0 %v1163_v7  ;;  %v6042_v3 = vld [vmem:[#allocation5 + $0x2b6] ss:$0 sm:$0xff] }
 0xf59   :  { %6807 = vmatprep.subr.mxu0 %v1162_v2 }
 0xf5a   :  { %v3138_v54 = vsub.f32 %v7771_v58, %v3134_v4  ;;  %v3143_v5 = vmul.f32 %v3139_v61, %v3139_v61  ;;  %6808 = vmatpush3.msra.mxu0 %v1162_v2 }
 0xf5c   :  { %v3149_v57 = vsel %vm1171_vm2, %v3143_v5, 0.0  ;;  %v3142_v6 = vmul.f32 %v3138_v54, %v3138_v54 }
 0xf5d   :  { %3150 = vadd.xlane.f32.xlu0 %v3149_v57 }
 0xf5e   :  { %v3146_v12 = vsel %vm1171_vm2, %v3142_v6, 0.0 }
 0xf5f   :  { %3147 = vadd.xlane.f32.xlu1 %v3146_v12 }
 0xf74   :  { %v3130_v17 = vpop.xlane.xlu0 %3129 }
 0xf75   :  { %v3136_v20 = vmul.f32 0.03125, %v3130_v17 }
 0xf77   :  { %v3140_v21 = vsub.f32 %v7778_v59, %v3136_v20 }
 0xf78   :  { %v3133_v22 = vpop.xlane.xlu0 %3132 }
 0xf79   :  { %v3137_v23 = vmul.f32 0.03125, %v3133_v22  ;;  %v3144_v24 = vmul.f32 %v3140_v21, %v3140_v21 }
 0xf7b   :  { %v3141_v25 = vsub.f32 %v7781_v45, %v3137_v23  ;;  %v3152_v26 = vsel %vm1171_vm2, %v3144_v24, 0.0 }
 0xf7c   :  { %3153 = vadd.xlane.f32.xlu1 %v3152_v26 }
 0xf7d   :  { %v3145_v27 = vmul.f32 %v3141_v25, %v3141_v25 }
 0xf7f   :  { %v3155_v28 = vsel %vm1171_vm2, %v3145_v27, 0.0 }
 0xf80   :  { %3156 = vadd.xlane.f32.xlu0 %v3155_v28 }
 0xfe6   :  { %v3151_v29 = vpop.xlane.xlu0 %3150 }
 0xfe7   :  { %v3159_v32 = vmul.f32 0.03125, %v3151_v29 }
 0xfe8   :  { %v3148_v34 = vpop.xlane.xlu1 %3147 }
 0xfe9   :  { %v3163_v18 = vadd.f32 1e-05, %v3159_v32  ;;  %v3158_v19 = vmul.f32 0.03125, %v3148_v34 }
 0xfeb   :  { %7097 = vrsqrt.f32 %v3163_v18  ;;  %v3162_v30 = vadd.f32 1e-05, %v3158_v19 }
 0xfed   :  { %7099 = vrsqrt.f32 %v3162_v30 }
 0xff8   :  { %v7098_v31 = vpop.eup %7097 }
 0xff9   :  { %v3171_v36 = vmul.f32 %v7098_v31, %v3139_v61 }
 0xffa   :  { %v7100_v37 = vpop.eup %7099 }
 0xffb   :  { %v3170_v38 = vmul.f32 %v7100_v37, %v3138_v54  ;;  %v3179_v39 = vmul.f32 %v6040_v35, %v3171_v36 }
 0xffd   :  { %v3178_v40 = vmul.f32 %v6040_v35, %v3170_v38  ;;  %v3187_v42 = vadd.f32 %v6041_v9, %v3179_v39 }
 0xfff   :  { %v3186_v41 = vadd.f32 %v6041_v9, %v3178_v40 }
0x1001   :  { %6787 = vmatprep.mubr.msk.f32.mxu1 %vm1171_vm2, %v3186_v41 }
0x1002   :  { %6788 = vmatmul.mubr.msk.f32.vlgmr.msra.gmra.mxu1 %vm1171_vm2, %v3187_v42 }
0x1005   :  { %v3154_v43 = vpop.xlane.xlu1 %3153 }
0x1006   :  { %v3160_v8 = vmul.f32 0.03125, %v3154_v43 }
0x1008   :  { %v3164_v44 = vadd.f32 1e-05, %v3160_v8 }
0x1009   :  { %v3157_v46 = vpop.xlane.xlu0 %3156 }
0x100a   :  { %7101 = vrsqrt.f32 %v3164_v44  ;;  %v3161_v47 = vmul.f32 0.03125, %v3157_v46 }
0x100c   :  { %v3165_v48 = vadd.f32 1e-05, %v3161_v47 }
0x100e   :  { %7103 = vrsqrt.f32 %v3165_v48 }
0x1017   :  { %v7102_v49 = vpop.eup %7101 }
0x1018   :  { %v3172_v50 = vmul.f32 %v7102_v49, %v3140_v21 }
0x101a   :  { %v3180_v51 = vmul.f32 %v6040_v35, %v3172_v50  ;;  %v6047_v50 = vld [vmem:[#allocation5 + $0x2f7] ss:$0 sm:$0xff] }
0x101b   :  { %v7104_v11 = vpop.eup %7103 }
0x101c   :  { %v3188_v52 = vadd.f32 %v6041_v9, %v3180_v51  ;;  %v3173_v10 = vmul.f32 %v7104_v11, %v3141_v25 }
0x101e   :  { %6790 = vmatprep.mubr.msk.f32.mxu1 %vm1171_vm2, %v3188_v52  ;;  %v3181_v60 = vmul.f32 %v6040_v35, %v3173_v10 }
0x1020   :  { %v3189_v62 = vadd.f32 %v6041_v9, %v3181_v60 }
0x1022   :  { %6791 = vmatmul.mubr.msk.f32.gmra.mxu1 %vm1171_vm2, %v3189_v62 }
0x10c2   :  { %v6789_v61 = vpop.f32.mrf.mxu1 }
0x10c3   :  { %v3278_v4 = vadd.f32 %v6789_v61, %v6042_v3 }
0x10c4   :  { %v3272_v54 = vpop.f32.mrf.mxu1 }
0x10c5   :  { %v3296_v5 = vmul.f32 0.044715, %v3278_v4  ;;  %v3273_v57 = vadd.f32 %v6042_v3, %v3272_v54  ;;  %v3292_v27 = vmul.f32 0.5, %v3278_v4 }
0x10c7   :  { %v3300_v6 = vmul.f32 %v3296_v5, %v3278_v4  ;;  %v3295_v12 = vmul.f32 0.044715, %v3273_v57  ;;  %v3291_v25 = vmul.f32 0.5, %v3273_v57 }
0x10c9   :  { %v3304_v13 = vmul.f32 %v3300_v6, %v3278_v4  ;;  %v3299_v14 = vmul.f32 %v3295_v12, %v3273_v57 }
0x10cb   :  { %v3308_v15 = vadd.f32 %v3304_v13, %v3278_v4  ;;  %v3303_v16 = vmul.f32 %v3299_v14, %v3273_v57 }
0x10cd   :  { %v3312_v17 = vmul.f32 0.7978846, %v3308_v15  ;;  %v3307_v20 = vadd.f32 %v3303_v16, %v3273_v57 }
0x10cf   :  { %7105 = vtanh.f32 %v3312_v17  ;;  %v3311_v21 = vmul.f32 0.7978846, %v3307_v20  ;;  %v3439_v20 = vld [vmem:[#allocation5 + $0x314] sm:$0xff] }
0x10d0   :  { %6815 = vmatprep.subr.mxu1 %v3439_v20 }
0x10d1   :  { %7107 = vtanh.f32 %v3311_v21  ;;  %v3438_v21 = vld [vmem:[#allocation5 + $0x30c] sm:$0xff]  ;;  %6816 = vmatpush3.msra.mxu1 %v3439_v20 }
0x10d2   :  { %6817 = vmatprep.subr.mxu1 %v3438_v21 }
0x10d3   :  { %6818 = vmatpush3.msra.mxu1 %v3438_v21 }
0x10dc   :  { %v7106_v22 = vpop.eup %7105 }
0x10dd   :  { %v3320_v24 = vadd.f32 1.0, %v7106_v22 }
0x10de   :  { %v7108_v23 = vpop.eup %7107 }
0x10df   :  { %v3319_v26 = vadd.f32 1.0, %v7108_v23  ;;  %v3324_v29 = vmul.f32 %v3320_v24, %v3292_v27  ;;  %v3437_v24 = vld [vmem:[#allocation5 + $0x304] sm:$0xff]  ;;  %v3436_v27 = vld [vmem:[#allocation5 + $0x2fc] sm:$0xff] }
0x10e0   :  { %6819 = vmatprep.subr.mxu1 %v3437_v24 }
0x10e1   :  { %v3323_v28 = vmul.f32 %v3319_v26, %v3291_v25  ;;  %6820 = vmatpush3.msra.mxu1 %v3437_v24 }
0x10e2   :  { %v6792_v32 = vpop.f32.mrf.mxu1  ;;  %6821 = vmatprep.subr.mxu1 %v3436_v27 }
0x10e3   :  { %v3288_v34 = vadd.f32 %v6792_v32, %v6042_v3  ;;  %6809 = vmatprep.mubr.msk.f32.mxu0 %vm54_vm0, %v3323_v28  ;;  %6822 = vmatpush3.msra.mxu1 %v3436_v27 }
0x10e4   :  { %6810 = vmatmul.mubr.msk.f32.vlgmr.msra.gmra.mxu0 %vm54_vm0, %v3324_v29  ;;  %v3282_v18 = vpop.f32.mrf.mxu1 }
0x10e5   :  { %v3298_v19 = vmul.f32 0.044715, %v3288_v34  ;;  %v3283_v30 = vadd.f32 %v6042_v3, %v3282_v18  ;;  %v3294_v47 = vmul.f32 0.5, %v3288_v34 }
0x10e7   :  { %v3302_v31 = vmul.f32 %v3298_v19, %v3288_v34  ;;  %v3297_v35 = vmul.f32 0.044715, %v3283_v30  ;;  %v3293_v44 = vmul.f32 0.5, %v3283_v30 }
0x10e9   :  { %v3306_v36 = vmul.f32 %v3302_v31, %v3288_v34  ;;  %v3301_v37 = vmul.f32 %v3297_v35, %v3283_v30 }
0x10eb   :  { %v3310_v38 = vadd.f32 %v3306_v36, %v3288_v34  ;;  %v3305_v39 = vmul.f32 %v3301_v37, %v3283_v30  ;;  %v6052_v36 = vld [vmem:[#allocation5 + $0x2f8] ss:$0 sm:$0xff] }
0x10ed   :  { %v3309_v9 = vadd.f32 %v3305_v39, %v3283_v30  ;;  %v3314_v40 = vmul.f32 0.7978846, %v3310_v38 }
0x10ef   :  { %v3313_v41 = vmul.f32 0.7978846, %v3309_v9  ;;  %7109 = vtanh.f32 %v3314_v40  ;;  %v6053_v9 = vld [vmem:[#allocation5 + $0x2f9] ss:$0 sm:$0xff] }
0x10f1   :  { %7111 = vtanh.f32 %v3313_v41 }
0x10fc   :  { %v7110_v42 = vpop.eup %7109 }
0x10fd   :  { %v3322_v8 = vadd.f32 1.0, %v7110_v42 }
0x10fe   :  { %v7112_v43 = vpop.eup %7111 }
0x10ff   :  { %v3321_v46 = vadd.f32 1.0, %v7112_v43  ;;  %v3326_v49 = vmul.f32 %v3322_v8, %v3294_v47 }
0x1101   :  { %v3325_v48 = vmul.f32 %v3321_v46, %v3293_v44 }
0x1103   :  { %6812 = vmatprep.mubr.msk.f32.mxu0 %vm54_vm0, %v3325_v48 }
0x1104   :  { %6813 = vmatmul.mubr.msk.f32.gmra.mxu0 %vm54_vm0, %v3326_v49 }
0x11a4   :  { %v6811_v51 = vpop.f32.mrf.mxu0 }
0x11a5   :  { %v3415_v11 = vadd.f32 %v6811_v51, %v6047_v50 }
0x11a6   :  { %v3409_v52 = vpop.f32.mrf.mxu0 }
0x11a7   :  { %v7804_v10 = vadd.f32 %v3415_v11, %v7768_v55  ;;  %v3410_v60 = vadd.f32 %v6047_v50, %v3409_v52 }
0x11a9   :  { %v7807_v62 = vadd.f32 %v3410_v60, %v7771_v58  ;;  %v3463_v63 = vsel %vm1171_vm2, %v7804_v10, 0.0 }
0x11aa   :  { %3464 = vadd.xlane.f32.xlu0 %v3463_v63 }
0x11ab   :  { %v3460_v0 = vsel %vm1171_vm2, %v7807_v62, 0.0 }
0x11ac   :  { %3461 = vadd.xlane.f32.xlu1 %v3460_v0 }
0x11c4   :  { %v6814_v1 = vpop.f32.mrf.mxu0 }
0x11c5   :  { %v3425_v53 = vadd.f32 %v6814_v1, %v6047_v50  ;;  %v6054_v1 = vld [vmem:[#allocation5 + $0x31c] ss:$0 sm:$0xff] }
0x11c6   :  { %v3419_v33 = vpop.f32.mrf.mxu0 }
0x11c7   :  { %v7814_v56 = vadd.f32 %v3425_v53, %v7781_v45  ;;  %v3420_v55 = vadd.f32 %v6047_v50, %v3419_v33 }
0x11c9   :  { %v7817_v7 = vadd.f32 %v3420_v55, %v7778_v59  ;;  %v3469_v58 = vsel %vm1171_vm2, %v7814_v56, 0.0 }
0x11ca   :  { %3470 = vadd.xlane.f32.xlu0 %v3469_v58 }
0x11cb   :  { %v3466_v2 = vsel %vm1171_vm2, %v7817_v7, 0.0 }
0x11cc   :  { %3467 = vadd.xlane.f32.xlu1 %v3466_v2 }
0x1233   :  { %v3465_v3 = vpop.xlane.xlu0 %3464 }
0x1234   :  { %v3473_v61 = vmul.f32 0.03125, %v3465_v3 }
0x1235   :  { %v3462_v4 = vpop.xlane.xlu1 %3461 }
0x1236   :  { %v3477_v54 = vsub.f32 %v7804_v10, %v3473_v61  ;;  %v3472_v5 = vmul.f32 0.03125, %v3462_v4 }
0x1238   :  { %v3476_v45 = vsub.f32 %v7807_v62, %v3472_v5  ;;  %v3481_v57 = vmul.f32 %v3477_v54, %v3477_v54 }
0x123a   :  { %v3487_v59 = vsel %vm1171_vm2, %v3481_v57, 0.0  ;;  %v3480_v6 = vmul.f32 %v3476_v45, %v3476_v45 }
0x123b   :  { %3488 = vadd.xlane.f32.xlu0 %v3487_v59 }
0x123c   :  { %v3484_v12 = vsel %vm1171_vm2, %v3480_v6, 0.0 }
0x123d   :  { %3485 = vadd.xlane.f32.xlu1 %v3484_v12 }
0x1253   :  { %v3471_v13 = vpop.xlane.xlu0 %3470 }
0x1254   :  { %v3475_v14 = vmul.f32 0.03125, %v3471_v13 }
0x1255   :  { %v3468_v15 = vpop.xlane.xlu1 %3467 }
0x1256   :  { %v3479_v16 = vsub.f32 %v7814_v56, %v3475_v14  ;;  %v3474_v17 = vmul.f32 0.03125, %v3468_v15 }
0x1258   :  { %v3478_v22 = vsub.f32 %v7817_v7, %v3474_v17  ;;  %v3483_v23 = vmul.f32 %v3479_v16, %v3479_v16 }
0x125a   :  { %v3493_v25 = vsel %vm1171_vm2, %v3483_v23, 0.0  ;;  %v3482_v26 = vmul.f32 %v3478_v22, %v3478_v22 }
0x125b   :  { %3494 = vadd.xlane.f32.xlu0 %v3493_v25 }
0x125c   :  { %v3490_v28 = vsel %vm1171_vm2, %v3482_v26, 0.0 }
0x125d   :  { %3491 = vadd.xlane.f32.xlu1 %v3490_v28 }
0x12c4   :  { %v3489_v29 = vpop.xlane.xlu0 %3488 }
0x12c5   :  { %v3497_v32 = vmul.f32 0.03125, %v3489_v29 }
0x12c6   :  { %v3486_v34 = vpop.xlane.xlu1 %3485 }
0x12c7   :  { %v3501_v18 = vadd.f32 1e-05, %v3497_v32  ;;  %v3496_v19 = vmul.f32 0.03125, %v3486_v34 }
0x12c9   :  { %7113 = vrsqrt.f32 %v3501_v18  ;;  %v3500_v30 = vadd.f32 1e-05, %v3496_v19 }
0x12cb   :  { %7115 = vrsqrt.f32 %v3500_v30 }
0x12d6   :  { %v7114_v31 = vpop.eup %7113 }
0x12d7   :  { %v3509_v35 = vmul.f32 %v7114_v31, %v3477_v54 }
0x12d8   :  { %v7116_v37 = vpop.eup %7115 }
0x12d9   :  { %v3508_v38 = vmul.f32 %v7116_v37, %v3476_v45  ;;  %v3517_v39 = vmul.f32 %v6052_v36, %v3509_v35 }
0x12db   :  { %v3516_v40 = vmul.f32 %v6052_v36, %v3508_v38  ;;  %v3525_v42 = vadd.f32 %v6053_v9, %v3517_v39 }
0x12dd   :  { %v3524_v41 = vadd.f32 %v6053_v9, %v3516_v40 }
0x12df   :  { %6823 = vmatprep.mubr.msk.f32.mxu1 %vm1171_vm2, %v3524_v41 }
0x12e0   :  { %6824 = vmatmul.mubr.msk.f32.vlgmr.msra.gmra.mxu1 %vm1171_vm2, %v3525_v42 }
0x12e4   :  { %v3495_v43 = vpop.xlane.xlu0 %3494 }
0x12e5   :  { %v3499_v8 = vmul.f32 0.03125, %v3495_v43 }
0x12e6   :  { %v3492_v44 = vpop.xlane.xlu1 %3491 }
0x12e7   :  { %v3503_v46 = vadd.f32 1e-05, %v3499_v8  ;;  %v3498_v47 = vmul.f32 0.03125, %v3492_v44 }
0x12e9   :  { %7117 = vrsqrt.f32 %v3503_v46  ;;  %v3502_v48 = vadd.f32 1e-05, %v3498_v47 }
0x12eb   :  { %7119 = vrsqrt.f32 %v3502_v48 }
0x12f6   :  { %v7118_v49 = vpop.eup %7117 }
0x12f7   :  { %v3511_v50 = vmul.f32 %v7118_v49, %v3479_v16 }
0x12f8   :  { %v7120_v51 = vpop.eup %7119 }
0x12f9   :  { %v3510_v11 = vmul.f32 %v7120_v51, %v3478_v22  ;;  %v3519_v52 = vmul.f32 %v6052_v36, %v3511_v50 }
0x12fb   :  { %v3518_v60 = vmul.f32 %v6052_v36, %v3510_v11  ;;  %v3527_v0 = vadd.f32 %v6053_v9, %v3519_v52 }
0x12fd   :  { %v3526_v63 = vadd.f32 %v6053_v9, %v3518_v60 }
0x12ff   :  { %6826 = vmatprep.mubr.msk.f32.mxu1 %vm1171_vm2, %v3526_v63 }
0x1300   :  { %6827 = vmatmul.mubr.msk.f32.gmra.mxu1 %vm1171_vm2, %v3527_v0 }
0x13a0   :  { %v6825_v53 = vpop.f32.mrf.mxu1 }
0x13a1   :  { %v7835_v33 = vadd.f32 %v6825_v53, %v6054_v1 }
0x13a2   :  { %v3610_v55 = vpop.f32.mrf.mxu1 }
0x13a3   :  { %v7837_v58 = vadd.f32 %v6054_v1, %v3610_v55  ;;  %3633 = vrot.lane.b32.xlu1 %v7835_v33, %s7261_s11 }
0x13a5   :  { %3631 = vrot.lane.b32.xlu0 %v7837_v58, %s7261_s11  ;;  %6833 = vmatprep.mubr.msk.f32.mxu1 %vm1348_vm3, %v7837_v58 }
0x13c0   :  { %v6828_v2 = vpop.f32.mrf.mxu1 }
0x13c1   :  { %v7845_v3 = vadd.f32 %v6828_v2, %v6054_v1 }
0x13c2   :  { %v3620_v61 = vpop.f32.mrf.mxu1 }
0x13c3   :  { %v7847_v4 = vadd.f32 %v6054_v1, %v3620_v61  ;;  %3722 = vrot.lane.b32.xlu1 %v7845_v3, %s7261_s11 }
0x13c5   :  { %6840 = vmatprep.mubr.msk.f32.mxu0 %vm1348_vm3, %v7847_v4 }
0x13c7   :  { %3720 = vrot.lane.b32.xlu1 %v7847_v4, %s7261_s11 }
0x1415   :  { %v3634_v54 = vpop.permute.xlu1 %3633 }
0x1416   :  { %6829 = vmatprep.subr.msk.mxu1 %vm1348_vm3, %v3634_v54 }
0x1417   :  { %6830 = vmatpush3.xpose.msk.msra.mxu1 %vm1348_vm3, %v3634_v54  ;;  %v3632_v5 = vpop.permute.xlu0 %3631 }
0x1418   :  { %6831 = vmatprep.subr.msk.mxu1 %vm1348_vm3, %v3632_v5 }
0x141b   :  { %6832 = vmatpush3.xpose.msk.msra.mxu1 %vm1348_vm3, %v3632_v5 }
0x141e   :  { %6834 = vmatmul.mubr.msk.f32.vlgmr.msra.gmra.mxu1 %vm1348_vm3, %v7835_v33 }
0x1435   :  { %v3723_v45 = vpop.permute.xlu1 %3722 }
0x1436   :  { %6836 = vmatprep.subr.msk.mxu0 %vm1348_vm3, %v3723_v45 }
0x1437   :  { %6837 = vmatpush3.xpose.msk.msra.mxu0 %vm1348_vm3, %v3723_v45 }
0x1439   :  { %v3721_v57 = vpop.permute.xlu1 %3720 }
0x143a   :  { %6838 = vmatprep.subr.msk.mxu0 %vm1348_vm3, %v3721_v57 }
0x143b   :  { %6839 = vmatpush3.xpose.msk.msra.mxu0 %vm1348_vm3, %v3721_v57 }
0x143e   :  { %6841 = vmatmul.mubr.msk.f32.vlgmr.msra.gmra.mxu0 %vm1348_vm3, %v7845_v3 }
0x14de   :  { %v6835_v59 = vpop.f32.mrf.mxu1 }
0x14df   :  { %v3808_v6 = vmul.f32 0.35355338, %v6835_v59 }
0x14e0   :  { %v3709_v12 = vpop.f32.mrf.mxu1 }
0x14e1   :  { %v3807_v13 = vmul.f32 0.35355338, %v3709_v12  ;;  %v3814_v14 = vsel %vm1525_vm4, %v3808_v6, -inf }
0x14e2   :  { %3815 = vmax.xlane.f32.xlu1 %v3814_v14 }
0x14e3   :  { %v3811_v15 = vsel %vm1525_vm4, %v3807_v13, -inf }
0x14e4   :  { %3812 = vmax.xlane.f32.xlu0 %v3811_v15 }
0x14fe   :  { %v6842_v16 = vpop.f32.mrf.mxu0 }
0x14ff   :  { %v3810_v21 = vmul.f32 0.35355338, %v6842_v16 }
0x1500   :  { %v3798_v17 = vpop.f32.mrf.mxu0 }
0x1501   :  { %v3809_v20 = vmul.f32 0.35355338, %v3798_v17  ;;  %v3820_v23 = vsel %vm1525_vm4, %v3810_v21, -inf }
0x1503   :  { %v3817_v22 = vsel %vm1525_vm4, %v3809_v20, -inf }
0x1504   :  { %3818 = vmax.xlane.f32.xlu0 %v3817_v22 }
0x1508   :  { %3821 = vmax.xlane.f32.xlu0 %v3820_v23 }
0x156b   :  { %v3816_v24 = vpop.xlane.xlu1 %3815 }
0x156c   :  { %v3824_v25 = vsub.f32 %v3808_v6, %v3816_v24 }
0x156d   :  { %v3813_v26 = vpop.xlane.xlu0 %3812 }
0x156e   :  { %v3829_v27 = vmul.f32 1.442695, %v3824_v25  ;;  %v3823_v28 = vsub.f32 %v3807_v13, %v3813_v26 }
0x1570   :  { %7121 = vpow2.f32 %v3829_v27  ;;  %v3827_v29 = vmul.f32 1.442695, %v3823_v28 }
0x1572   :  { %7123 = vpow2.f32 %v3827_v29 }
0x157d   :  { %v7122_v32 = vpop.eup %7121 }
0x157e   :  { %v3838_v34 = vsel %vm1525_vm4, %v7122_v32, 0.0 }
0x157f   :  { %v7124_v18 = vpop.eup %7123  ;;  %3839 = vadd.xlane.f32.xlu0 %v3838_v34 }
0x1580   :  { %v3835_v19 = vsel %vm1525_vm4, %v7124_v18, 0.0 }
0x1581   :  { %3836 = vadd.xlane.f32.xlu1 %v3835_v19 }
0x158d   :  { %v3819_v30 = vpop.xlane.xlu0 %3818 }
0x158e   :  { %v3825_v37 = vsub.f32 %v3809_v20, %v3819_v30 }
0x1590   :  { %v3831_v38 = vmul.f32 1.442695, %v3825_v37 }
0x1591   :  { %v3822_v31 = vpop.xlane.xlu0 %3821 }
0x1592   :  { %3857 = vrot.lane.b32.xlu1 %v7835_v33, %s7262_s12  ;;  %v3826_v35 = vsub.f32 %v3810_v21, %v3822_v31 }
0x1594   :  { %v3833_v36 = vmul.f32 1.442695, %v3826_v35 }
0x1595   :  { %3855 = vrot.lane.b32.xlu0 %v7837_v58, %s7262_s12 }
0x1596   :  { %3944 = vrot.lane.b32.xlu1 %v7845_v3, %s7262_s12  ;;  %7125 = vpow2.f32 %v3833_v36 }
0x1597   :  { %7127 = vpow2.f32 %v3831_v38 }
0x1599   :  { %3942 = vrot.lane.b32.xlu0 %v7847_v4, %s7262_s12 }
0x159a   :  { %4035 = vrot.lane.b32.xlu1 %v7835_v33, %s7263_s14 }
0x159d   :  { %4126 = vrot.lane.b32.xlu0 %v7845_v3, %s7263_s14 }
0x159e   :  { %4033 = vrot.lane.b32.xlu1 %v7837_v58, %s7263_s14 }
0x15a2   :  { %4029 = vrot.lane.b32.xlu1 %v7837_v58, %s7264_s15 }
0x15a3   :  { %v7126_v39 = vpop.eup %7125 }
0x15a4   :  { %v3844_v9 = vsel %vm1525_vm4, %v7126_v39, 0.0  ;;  %v7128_v40 = vpop.eup %7127 }
0x15a5   :  { %v3841_v41 = vsel %vm1525_vm4, %v7128_v40, 0.0 }
0x15a6   :  { %4124 = vrot.lane.b32.xlu1 %v7847_v4, %s7263_s14 }
0x15bc   :  { %3845 = vadd.xlane.f32.xlu0 %v3844_v9 }
0x15ca   :  { %3842 = vadd.xlane.f32.xlu1 %v3841_v41 }
0x15d2   :  { %4031 = vrot.lane.b32.xlu0 %v7835_v33, %s7264_s15 }
0x15d6   :  { %4120 = vrot.lane.b32.xlu0 %v7847_v4, %s7264_s15 }
0x15db   :  { %4122 = vrot.lane.b32.xlu1 %v7845_v3, %s7264_s15 }
0x1608   :  { %v3840_v42 = vpop.xlane.xlu0 %3839 }
0x1609   :  { %7129 = vrcp.f32 %v3840_v42 }
0x160a   :  { %v3837_v43 = vpop.xlane.xlu1 %3836 }
0x160b   :  { %7131 = vrcp.f32 %v3837_v43 }
0x160c   :  { %v3856_v44 = vpop.permute.xlu0 %3855 }
0x160e   :  { %v3858_v8 = vpop.permute.xlu1 %3857 }
0x160f   :  { %6843 = vmatprep.subr.mxu1 %v3858_v8 }
0x1610   :  { %6844 = vmatpush3.msra.mxu1 %v3858_v8  ;;  %v3943_v50 = vpop.permute.xlu0 %3942 }
0x1611   :  { %6845 = vmatprep.subr.mxu1 %v3856_v44 }
0x1612   :  { %v3945_v46 = vpop.permute.xlu1 %3944  ;;  %6846 = vmatpush3.msra.mxu1 %v3856_v44 }
0x1613   :  { %6850 = vmatprep.subr.mxu1 %v3945_v46 }
0x1614   :  { %v4127_v63 = vpop.permute.xlu0 %4126 }
0x1616   :  { %v4036_v47 = vpop.permute.xlu1 %4035  ;;  %v7130_v48 = vpop.eup %7129 }
0x1617   :  { %6857 = vmatprep.subr.msk.mxu0 %vm1348_vm3, %v4036_v47  ;;  %v3850_v52 = vmul.f32 %v7130_v48, %v7122_v32 }
0x1618   :  { %v7132_v49 = vpop.eup %7131  ;;  %6858 = vmatpush3.xpose.msk.msra.mxu0 %vm1348_vm3, %v4036_v47 }
0x1619   :  { %v3848_v51 = vmul.f32 %v7132_v49, %v7124_v18 }
0x161a   :  { %v4034_v11 = vpop.permute.xlu1 %4033 }
0x161b   :  { %6847 = vmatprep.mubr.msk.f32.mxu1 %vm1525_vm4, %v3848_v51  ;;  %6859 = vmatprep.subr.msk.mxu0 %vm1348_vm3, %v4034_v11 }
0x161c   :  { %6848 = vmatmul.mubr.msk.f32.vlgmr.msra.gmra.mxu1 %vm1525_vm4, %v3850_v52  ;;  %6860 = vmatpush3.xpose.msk.msra.mxu0 %vm1348_vm3, %v4034_v11 }
0x161d   :  { %6851 = vmatpush3.msra.mxu1 %v3945_v46 }
0x161e   :  { %6852 = vmatprep.subr.mxu1 %v3943_v50  ;;  %v4030_v60 = vpop.permute.xlu1 %4029 }
0x161f   :  { %6853 = vmatpush3.msra.mxu1 %v3943_v50  ;;  %6861 = vmatprep.mubr.msk.f32.mxu0 %vm1348_vm3, %v4030_v60 }
0x1620   :  { %6864 = vmatprep.subr.msk.mxu1 %vm1348_vm3, %v4127_v63 }
0x1622   :  { %v4125_v53 = vpop.permute.xlu1 %4124 }
0x1645   :  { %v3846_v0 = vpop.xlane.xlu0 %3845 }
0x1646   :  { %7133 = vrcp.f32 %v3846_v0 }
0x1649   :  { %v4032_v1 = vpop.permute.xlu0 %4031 }
0x164a   :  { %6862 = vmatmul.mubr.msk.f32.vlgmr.msra.gmra.mxu0 %vm1348_vm3, %v4032_v1 }
0x164d   :  { %v4121_v45 = vpop.permute.xlu0 %4120 }
0x1653   :  { %v3843_v55 = vpop.xlane.xlu1 %3842  ;;  %v7134_v2 = vpop.eup %7133 }
0x1654   :  { %7135 = vrcp.f32 %v3843_v55  ;;  %v3854_v5 = vmul.f32 %v7134_v2, %v7126_v39 }
0x1657   :  { %v4123_v57 = vpop.permute.xlu1 %4122 }
0x1661   :  { %v7136_v61 = vpop.eup %7135 }
0x1662   :  { %v3852_v54 = vmul.f32 %v7136_v61, %v7128_v40 }
0x1664   :  { %6854 = vmatprep.mubr.msk.f32.mxu1 %vm1525_vm4, %v3852_v54 }
0x1665   :  { %6855 = vmatmul.mubr.msk.f32.vlgmr.msra.gmra.mxu1 %vm1525_vm4, %v3854_v5 }
0x1666   :  { %6865 = vmatpush3.xpose.msk.msra.mxu1 %vm1348_vm3, %v4127_v63  ;;  %6868 = vmatprep.mubr.msk.f32.mxu1 %vm1348_vm3, %v4121_v45 }
0x1667   :  { %6866 = vmatprep.subr.msk.mxu1 %vm1348_vm3, %v4125_v53 }
0x166a   :  { %6867 = vmatpush3.xpose.msk.msra.mxu1 %vm1348_vm3, %v4125_v53 }
0x166d   :  { %6869 = vmatmul.mubr.msk.f32.vlgmr.msra.gmra.mxu1 %vm1348_vm3, %v4123_v57 }
0x16dc   :  { %v7917_v16 = vpop.f32.mrf.mxu1 }
0x16de   :  { %v7919_v17 = vpop.f32.mrf.mxu1 }
0x170a   :  { %v6863_v59 = vpop.f32.mrf.mxu0 }
0x170b   :  { %v4212_v6 = vmul.f32 0.35355338, %v6863_v59 }
0x170c   :  { %v4111_v12 = vpop.f32.mrf.mxu0 }
0x170d   :  { %v4211_v13 = vmul.f32 0.35355338, %v4111_v12  ;;  %v4218_v14 = vsel %vm1525_vm4, %v4212_v6, -inf }
0x170e   :  { %4219 = vmax.xlane.f32.xlu1 %v4218_v14 }
0x170f   :  { %v4215_v15 = vsel %vm1525_vm4, %v4211_v13, -inf }
0x1710   :  { %4216 = vmax.xlane.f32.xlu0 %v4215_v15 }
0x1725   :  { %v7921_v20 = vpop.f32.mrf.mxu1 }
0x1727   :  { %v7923_v21 = vpop.f32.mrf.mxu1 }
0x172d   :  { %v6870_v22 = vpop.f32.mrf.mxu1 }
0x172e   :  { %v4214_v25 = vmul.f32 0.35355338, %v6870_v22 }
0x172f   :  { %v4202_v23 = vpop.f32.mrf.mxu1 }
0x1730   :  { %v4213_v24 = vmul.f32 0.35355338, %v4202_v23  ;;  %v4224_v27 = vsel %vm1525_vm4, %v4214_v25, -inf }
0x1732   :  { %v4221_v26 = vsel %vm1525_vm4, %v4213_v24, -inf }
0x1733   :  { %4222 = vmax.xlane.f32.xlu0 %v4221_v26 }
0x1737   :  { %4225 = vmax.xlane.f32.xlu0 %v4224_v27 }
0x1797   :  { %v4220_v28 = vpop.xlane.xlu1 %4219 }
0x1798   :  { %v4228_v29 = vsub.f32 %v4212_v6, %v4220_v28 }
0x1799   :  { %v4217_v32 = vpop.xlane.xlu0 %4216 }
0x179a   :  { %v4233_v34 = vmul.f32 1.442695, %v4228_v29  ;;  %v4227_v18 = vsub.f32 %v4211_v13, %v4217_v32 }
0x179c   :  { %7137 = vpow2.f32 %v4233_v34  ;;  %v4231_v19 = vmul.f32 1.442695, %v4227_v18 }
0x179e   :  { %7139 = vpow2.f32 %v4231_v19 }
0x17a9   :  { %v7138_v30 = vpop.eup %7137 }
0x17aa   :  { %v4242_v31 = vsel %vm1525_vm4, %v7138_v30, 0.0 }
0x17ab   :  { %v7140_v35 = vpop.eup %7139  ;;  %4243 = vadd.xlane.f32.xlu0 %v4242_v31 }
0x17ac   :  { %v4239_v36 = vsel %vm1525_vm4, %v7140_v35, 0.0 }
0x17ad   :  { %4240 = vadd.xlane.f32.xlu1 %v4239_v36 }
0x17bc   :  { %v4223_v37 = vpop.xlane.xlu0 %4222 }
0x17bd   :  { %v4229_v40 = vsub.f32 %v4213_v24, %v4223_v37 }
0x17be   :  { %4261 = vrot.lane.b32.xlu1 %v7835_v33, %s7265_s1 }
0x17bf   :  { %v4235_v41 = vmul.f32 1.442695, %v4229_v40 }
0x17c0   :  { %v4226_v38 = vpop.xlane.xlu0 %4225 }
0x17c1   :  { %4259 = vrot.lane.b32.xlu0 %v7837_v58, %s7265_s1  ;;  %v4230_v39 = vsub.f32 %v4214_v25, %v4226_v38 }
0x17c2   :  { %4348 = vrot.lane.b32.xlu1 %v7845_v3, %s7265_s1 }
0x17c3   :  { %v4237_v9 = vmul.f32 1.442695, %v4230_v39 }
0x17c5   :  { %4346 = vrot.lane.b32.xlu0 %v7847_v4, %s7265_s1  ;;  %7141 = vpow2.f32 %v4237_v9 }
0x17c6   :  { %4439 = vrot.lane.b32.xlu1 %v7835_v33, %s7266_s16  ;;  %7143 = vpow2.f32 %v4235_v41 }
0x17c9   :  { %4530 = vrot.lane.b32.xlu0 %v7845_v3, %s7266_s16 }
0x17ca   :  { %4437 = vrot.lane.b32.xlu1 %v7837_v58, %s7266_s16 }
0x17ce   :  { %4433 = vrot.lane.b32.xlu1 %v7837_v58, %s7267_s17 }
0x17d2   :  { %4528 = vrot.lane.b32.xlu1 %v7847_v4, %s7266_s16  ;;  %v7142_v42 = vpop.eup %7141 }
0x17d3   :  { %v4248_v43 = vsel %vm1525_vm4, %v7142_v42, 0.0  ;;  %v7144_v8 = vpop.eup %7143 }
0x17d4   :  { %v4245_v44 = vsel %vm1525_vm4, %v7144_v8, 0.0 }
0x17e8   :  { %4249 = vadd.xlane.f32.xlu0 %v4248_v43 }
0x17f6   :  { %4246 = vadd.xlane.f32.xlu1 %v4245_v44 }
0x17fe   :  { %4435 = vrot.lane.b32.xlu0 %v7835_v33, %s7267_s17 }
0x1802   :  { %4524 = vrot.lane.b32.xlu0 %v7847_v4, %s7267_s17 }
0x1807   :  { %4526 = vrot.lane.b32.xlu1 %v7845_v3, %s7267_s17 }
0x1834   :  { %v4244_v46 = vpop.xlane.xlu0 %4243 }
0x1835   :  { %7145 = vrcp.f32 %v4244_v46 }
0x1836   :  { %v4241_v47 = vpop.xlane.xlu1 %4240 }
0x1837   :  { %7147 = vrcp.f32 %v4241_v47 }
0x1838   :  { %v4260_v48 = vpop.permute.xlu0 %4259 }
0x183a   :  { %v4262_v49 = vpop.permute.xlu1 %4261 }
0x183b   :  { %6871 = vmatprep.subr.mxu0 %v4262_v49 }
0x183c   :  { %6872 = vmatpush3.msra.mxu0 %v4262_v49  ;;  %v4347_v50 = vpop.permute.xlu0 %4346 }
0x183d   :  { %6873 = vmatprep.subr.mxu0 %v4260_v48 }
0x183e   :  { %v4349_v51 = vpop.permute.xlu1 %4348  ;;  %6874 = vmatpush3.msra.mxu0 %v4260_v48 }
0x183f   :  { %6878 = vmatprep.subr.mxu1 %v4349_v51 }
0x1840   :  { %6879 = vmatpush3.msra.mxu1 %v4349_v51  ;;  %v4531_v11 = vpop.permute.xlu0 %4530 }
0x1841   :  { %6880 = vmatprep.subr.mxu1 %v4347_v50 }
0x1842   :  { %v4440_v52 = vpop.permute.xlu1 %4439  ;;  %6881 = vmatpush3.msra.mxu1 %v4347_v50  ;;  %v7146_v60 = vpop.eup %7145 }
0x1843   :  { %6885 = vmatprep.subr.msk.mxu0 %vm1348_vm3, %v4440_v52  ;;  %6892 = vmatprep.subr.msk.mxu1 %vm1348_vm3, %v4531_v11  ;;  %v4254_v53 = vmul.f32 %v7146_v60, %v7138_v30 }
0x1844   :  { %v7148_v63 = vpop.eup %7147 }
0x1845   :  { %v4252_v0 = vmul.f32 %v7148_v63, %v7140_v35 }
0x1846   :  { %v4438_v1 = vpop.permute.xlu1 %4437 }
0x1847   :  { %6875 = vmatprep.mubr.msk.f32.mxu0 %vm1525_vm4, %v4252_v0 }
0x1848   :  { %6876 = vmatmul.mubr.msk.f32.vlgmr.msra.gmra.mxu0 %vm1525_vm4, %v4254_v53 }
0x1849   :  { %6886 = vmatpush3.xpose.msk.msra.mxu0 %vm1348_vm3, %v4440_v52 }
0x184a   :  { %6887 = vmatprep.subr.msk.mxu0 %vm1348_vm3, %v4438_v1  ;;  %v4434_v55 = vpop.permute.xlu1 %4433 }
0x184b   :  { %6889 = vmatprep.mubr.msk.f32.mxu0 %vm1348_vm3, %v4434_v55 }
0x184d   :  { %6888 = vmatpush3.xpose.msk.msra.mxu0 %vm1348_vm3, %v4438_v1 }
0x184e   :  { %v4529_v54 = vpop.permute.xlu1 %4528 }
0x1871   :  { %v4250_v2 = vpop.xlane.xlu0 %4249 }
0x1872   :  { %7149 = vrcp.f32 %v4250_v2 }
0x1875   :  { %v4436_v61 = vpop.permute.xlu0 %4435 }
0x1876   :  { %6890 = vmatmul.mubr.msk.f32.vlgmr.msra.gmra.mxu0 %vm1348_vm3, %v4436_v61 }
0x1879   :  { %v4525_v12 = vpop.permute.xlu0 %4524 }
0x187f   :  { %v4247_v5 = vpop.xlane.xlu1 %4246  ;;  %v7150_v45 = vpop.eup %7149 }
0x1880   :  { %7151 = vrcp.f32 %v4247_v5  ;;  %v4258_v6 = vmul.f32 %v7150_v45, %v7142_v42 }
0x1883   :  { %v4527_v13 = vpop.permute.xlu1 %4526 }
0x188d   :  { %v7152_v57 = vpop.eup %7151 }
0x188e   :  { %v4256_v59 = vmul.f32 %v7152_v57, %v7144_v8 }
0x1890   :  { %6882 = vmatprep.mubr.msk.f32.mxu1 %vm1525_vm4, %v4256_v59 }
0x1891   :  { %6883 = vmatmul.mubr.msk.f32.vlgmr.msra.gmra.mxu1 %vm1525_vm4, %v4258_v6 }
0x1892   :  { %6893 = vmatpush3.xpose.msk.msra.mxu1 %vm1348_vm3, %v4531_v11  ;;  %6896 = vmatprep.mubr.msk.f32.mxu1 %vm1348_vm3, %v4525_v12 }
0x1893   :  { %6894 = vmatprep.subr.msk.mxu1 %vm1348_vm3, %v4529_v54 }
0x1896   :  { %6895 = vmatpush3.xpose.msk.msra.mxu1 %vm1348_vm3, %v4529_v54 }
0x1899   :  { %6897 = vmatmul.mubr.msk.f32.vlgmr.msra.gmra.mxu1 %vm1348_vm3, %v4527_v13 }
0x1908   :  { %v7971_v14 = vpop.f32.mrf.mxu0 }
0x190a   :  { %v7973_v15 = vpop.f32.mrf.mxu0 }
0x1936   :  { %v6891_v22 = vpop.f32.mrf.mxu0 }
0x1937   :  { %v4616_v23 = vmul.f32 0.35355338, %v6891_v22 }
0x1938   :  { %v4515_v24 = vpop.f32.mrf.mxu0 }
0x1939   :  { %v4615_v25 = vmul.f32 0.35355338, %v4515_v24  ;;  %v4622_v26 = vsel %vm1525_vm4, %v4616_v23, -inf }
0x193a   :  { %4623 = vmax.xlane.f32.xlu1 %v4622_v26 }
0x193b   :  { %v4619_v27 = vsel %vm1525_vm4, %v4615_v25, -inf }
0x193c   :  { %4620 = vmax.xlane.f32.xlu0 %v4619_v27 }
0x1951   :  { %v7977_v28 = vpop.f32.mrf.mxu1 }
0x1953   :  { %v7979_v29 = vpop.f32.mrf.mxu1 }
0x1959   :  { %v6898_v32 = vpop.f32.mrf.mxu1 }
0x195a   :  { %v4618_v19 = vmul.f32 0.35355338, %v6898_v32 }
0x195b   :  { %v4606_v34 = vpop.f32.mrf.mxu1 }
0x195c   :  { %v4617_v18 = vmul.f32 0.35355338, %v4606_v34  ;;  %v4628_v31 = vsel %vm1525_vm4, %v4618_v19, -inf }
0x195e   :  { %v4625_v30 = vsel %vm1525_vm4, %v4617_v18, -inf }
0x195f   :  { %4626 = vmax.xlane.f32.xlu0 %v4625_v30 }
0x1963   :  { %4629 = vmax.xlane.f32.xlu0 %v4628_v31 }
0x19c3   :  { %v4624_v35 = vpop.xlane.xlu1 %4623 }
0x19c4   :  { %v4632_v36 = vsub.f32 %v4616_v23, %v4624_v35 }
0x19c5   :  { %v4621_v37 = vpop.xlane.xlu0 %4620 }
0x19c6   :  { %v4637_v38 = vmul.f32 1.442695, %v4632_v36  ;;  %v4631_v39 = vsub.f32 %v4615_v25, %v4621_v37 }
0x19c8   :  { %7153 = vpow2.f32 %v4637_v38  ;;  %v4635_v9 = vmul.f32 1.442695, %v4631_v39 }
0x19ca   :  { %7155 = vpow2.f32 %v4635_v9 }
0x19d5   :  { %v7154_v40 = vpop.eup %7153 }
0x19d6   :  { %v4646_v41 = vsel %vm1525_vm4, %v7154_v40, 0.0 }
0x19d7   :  { %v7156_v42 = vpop.eup %7155  ;;  %4647 = vadd.xlane.f32.xlu0 %v4646_v41 }
0x19d8   :  { %v4643_v43 = vsel %vm1525_vm4, %v7156_v42, 0.0 }
0x19d9   :  { %4644 = vadd.xlane.f32.xlu1 %v4643_v43 }
0x19e8   :  { %v4627_v8 = vpop.xlane.xlu0 %4626 }
0x19e9   :  { %v4633_v48 = vsub.f32 %v4617_v18, %v4627_v8 }
0x19ea   :  { %4665 = vrot.lane.b32.xlu1 %v7835_v33, %s7268_s18 }
0x19eb   :  { %v4639_v49 = vmul.f32 1.442695, %v4633_v48 }
0x19ec   :  { %v4630_v44 = vpop.xlane.xlu0 %4629 }
0x19ed   :  { %4663 = vrot.lane.b32.xlu0 %v7837_v58, %s7268_s18  ;;  %v4634_v46 = vsub.f32 %v4618_v19, %v4630_v44 }
0x19ee   :  { %4752 = vrot.lane.b32.xlu1 %v7845_v3, %s7268_s18 }
0x19ef   :  { %v4641_v47 = vmul.f32 1.442695, %v4634_v46 }
0x19f1   :  { %4750 = vrot.lane.b32.xlu0 %v7847_v4, %s7268_s18  ;;  %7157 = vpow2.f32 %v4641_v47 }
0x19f2   :  { %4843 = vrot.lane.b32.xlu1 %v7835_v33, %s7269_s19  ;;  %7159 = vpow2.f32 %v4639_v49 }
0x19f5   :  { %4934 = vrot.lane.b32.xlu0 %v7845_v3, %s7269_s19 }
0x19f6   :  { %4841 = vrot.lane.b32.xlu1 %v7837_v58, %s7269_s19 }
0x19fa   :  { %4837 = vrot.lane.b32.xlu1 %v7837_v58, %s7270_s20 }
0x19fe   :  { %4932 = vrot.lane.b32.xlu1 %v7847_v4, %s7269_s19  ;;  %v7158_v50 = vpop.eup %7157 }
0x19ff   :  { %v4652_v51 = vsel %vm1525_vm4, %v7158_v50, 0.0  ;;  %v7160_v11 = vpop.eup %7159 }
0x1a00   :  { %v4649_v52 = vsel %vm1525_vm4, %v7160_v11, 0.0 }
0x1a14   :  { %4653 = vadd.xlane.f32.xlu0 %v4652_v51 }
0x1a22   :  { %4650 = vadd.xlane.f32.xlu1 %v4649_v52 }
0x1a2a   :  { %4839 = vrot.lane.b32.xlu0 %v7835_v33, %s7270_s20 }
0x1a2e   :  { %4928 = vrot.lane.b32.xlu0 %v7847_v4, %s7270_s20 }
0x1a33   :  { %4930 = vrot.lane.b32.xlu1 %v7845_v3, %s7270_s20 }
0x1a60   :  { %v4648_v60 = vpop.xlane.xlu0 %4647 }
0x1a61   :  { %7161 = vrcp.f32 %v4648_v60 }
0x1a62   :  { %v4645_v63 = vpop.xlane.xlu1 %4644 }
0x1a63   :  { %7163 = vrcp.f32 %v4645_v63 }
0x1a64   :  { %v4664_v0 = vpop.permute.xlu0 %4663 }
0x1a66   :  { %v4666_v1 = vpop.permute.xlu1 %4665 }
0x1a67   :  { %6899 = vmatprep.subr.mxu0 %v4666_v1 }
0x1a68   :  { %6900 = vmatpush3.msra.mxu0 %v4666_v1  ;;  %v4751_v53 = vpop.permute.xlu0 %4750 }
0x1a69   :  { %6901 = vmatprep.subr.mxu0 %v4664_v0 }
0x1a6a   :  { %v4753_v55 = vpop.permute.xlu1 %4752  ;;  %6902 = vmatpush3.msra.mxu0 %v4664_v0 }
0x1a6b   :  { %6906 = vmatprep.subr.mxu1 %v4753_v55 }
0x1a6c   :  { %6907 = vmatpush3.msra.mxu1 %v4753_v55  ;;  %v4935_v2 = vpop.permute.xlu0 %4934 }
0x1a6d   :  { %6908 = vmatprep.subr.mxu1 %v4751_v53 }
0x1a6e   :  { %v4844_v61 = vpop.permute.xlu1 %4843  ;;  %6909 = vmatpush3.msra.mxu1 %v4751_v53  ;;  %v7162_v54 = vpop.eup %7161 }
0x1a6f   :  { %6913 = vmatprep.subr.msk.mxu0 %vm1348_vm3, %v4844_v61  ;;  %6920 = vmatprep.subr.msk.mxu1 %vm1348_vm3, %v4935_v2  ;;  %v4658_v59 = vmul.f32 %v7162_v54, %v7154_v40 }
0x1a70   :  { %v7164_v5 = vpop.eup %7163 }
0x1a71   :  { %v4656_v45 = vmul.f32 %v7164_v5, %v7156_v42 }
0x1a72   :  { %v4842_v57 = vpop.permute.xlu1 %4841 }
0x1a73   :  { %6903 = vmatprep.mubr.msk.f32.mxu0 %vm1525_vm4, %v4656_v45 }
0x1a74   :  { %6904 = vmatmul.mubr.msk.f32.vlgmr.msra.gmra.mxu0 %vm1525_vm4, %v4658_v59 }
0x1a75   :  { %6914 = vmatpush3.xpose.msk.msra.mxu0 %vm1348_vm3, %v4844_v61 }
0x1a76   :  { %6915 = vmatprep.subr.msk.mxu0 %vm1348_vm3, %v4842_v57  ;;  %v4838_v6 = vpop.permute.xlu1 %4837 }
0x1a77   :  { %6917 = vmatprep.mubr.msk.f32.mxu0 %vm1348_vm3, %v4838_v6 }
0x1a79   :  { %6916 = vmatpush3.xpose.msk.msra.mxu0 %vm1348_vm3, %v4842_v57 }
0x1a7a   :  { %v4933_v22 = vpop.permute.xlu1 %4932 }
0x1a9d   :  { %v4654_v12 = vpop.xlane.xlu0 %4653 }
0x1a9e   :  { %7165 = vrcp.f32 %v4654_v12 }
0x1aa1   :  { %v4840_v13 = vpop.permute.xlu0 %4839 }
0x1aa2   :  { %6918 = vmatmul.mubr.msk.f32.vlgmr.msra.gmra.mxu0 %vm1348_vm3, %v4840_v13 }
0x1aa5   :  { %v4929_v32 = vpop.permute.xlu0 %4928 }
0x1aab   :  { %v4651_v23 = vpop.xlane.xlu1 %4650  ;;  %v7166_v24 = vpop.eup %7165 }
0x1aac   :  { %7167 = vrcp.f32 %v4651_v23  ;;  %v4662_v27 = vmul.f32 %v7166_v24, %v7158_v50 }
0x1aaf   :  { %v4931_v34 = vpop.permute.xlu1 %4930 }
0x1ab9   :  { %v7168_v25 = vpop.eup %7167 }
0x1aba   :  { %v4660_v26 = vmul.f32 %v7168_v25, %v7160_v11 }
0x1abc   :  { %6910 = vmatprep.mubr.msk.f32.mxu1 %vm1525_vm4, %v4660_v26 }
0x1abd   :  { %6911 = vmatmul.mubr.msk.f32.vlgmr.msra.gmra.mxu1 %vm1525_vm4, %v4662_v27 }
0x1abe   :  { %6921 = vmatpush3.xpose.msk.msra.mxu1 %vm1348_vm3, %v4935_v2  ;;  %6924 = vmatprep.mubr.msk.f32.mxu1 %vm1348_vm3, %v4929_v32  ;;  %v3444_v32 = vld [vmem:[#allocation5 + $0x335] sm:$0xff] }
0x1abf   :  { %6922 = vmatprep.subr.msk.mxu1 %vm1348_vm3, %v4933_v22 }
0x1ac2   :  { %6923 = vmatpush3.xpose.msk.msra.mxu1 %vm1348_vm3, %v4933_v22 }
0x1ac5   :  { %6925 = vmatmul.mubr.msk.f32.vlgmr.msra.gmra.mxu1 %vm1348_vm3, %v4931_v34  ;;  %v3443_v34 = vld [vmem:[#allocation5 + $0x32d] sm:$0xff] }
0x1b34   :  { %v6905_v18 = vpop.f32.mrf.mxu0 }
0x1b36   :  { %v4741_v19 = vpop.f32.mrf.mxu0 }
0x1b62   :  { %v6919_v30 = vpop.f32.mrf.mxu0 }
0x1b63   :  { %v5020_v31 = vmul.f32 0.35355338, %v6919_v30 }
0x1b64   :  { %v4919_v35 = vpop.f32.mrf.mxu0 }
0x1b65   :  { %v5019_v36 = vmul.f32 0.35355338, %v4919_v35  ;;  %v5026_v37 = vsel %vm1525_vm4, %v5020_v31, -inf }
0x1b66   :  { %5027 = vmax.xlane.f32.xlu1 %v5026_v37 }
0x1b67   :  { %v5023_v38 = vsel %vm1525_vm4, %v5019_v36, -inf }
0x1b68   :  { %5024 = vmax.xlane.f32.xlu0 %v5023_v38 }
0x1b7d   :  { %v8029_v39 = vpop.f32.mrf.mxu1 }
0x1b7f   :  { %v8031_v9 = vpop.f32.mrf.mxu1 }
0x1b85   :  { %v6926_v40 = vpop.f32.mrf.mxu1 }
0x1b86   :  { %v5022_v43 = vmul.f32 0.35355338, %v6926_v40 }
0x1b87   :  { %v5010_v41 = vpop.f32.mrf.mxu1 }
0x1b88   :  { %v5021_v42 = vmul.f32 0.35355338, %v5010_v41  ;;  %v5032_v44 = vsel %vm1525_vm4, %v5022_v43, -inf }
0x1b8a   :  { %v5029_v8 = vsel %vm1525_vm4, %v5021_v42, -inf }
0x1b8b   :  { %5030 = vmax.xlane.f32.xlu0 %v5029_v8 }
0x1b8f   :  { %5033 = vmax.xlane.f32.xlu0 %v5032_v44 }
0x1bef   :  { %v5028_v46 = vpop.xlane.xlu1 %5027 }
0x1bf0   :  { %v5036_v47 = vsub.f32 %v5020_v31, %v5028_v46 }
0x1bf1   :  { %v5025_v48 = vpop.xlane.xlu0 %5024 }
0x1bf2   :  { %v5041_v49 = vmul.f32 1.442695, %v5036_v47  ;;  %v5035_v50 = vsub.f32 %v5019_v36, %v5025_v48 }
0x1bf4   :  { %7169 = vpow2.f32 %v5041_v49  ;;  %v5039_v51 = vmul.f32 1.442695, %v5035_v50 }
0x1bf6   :  { %7171 = vpow2.f32 %v5039_v51 }
0x1c01   :  { %v7170_v11 = vpop.eup %7169 }
0x1c02   :  { %v5050_v52 = vsel %vm1525_vm4, %v7170_v11, 0.0 }
0x1c03   :  { %v7172_v60 = vpop.eup %7171  ;;  %5051 = vadd.xlane.f32.xlu0 %v5050_v52 }
0x1c04   :  { %v5047_v63 = vsel %vm1525_vm4, %v7172_v60, 0.0 }
0x1c05   :  { %5048 = vadd.xlane.f32.xlu1 %v5047_v63 }
0x1c14   :  { %v5031_v0 = vpop.xlane.xlu0 %5030 }
0x1c15   :  { %v5037_v2 = vsub.f32 %v5021_v42, %v5031_v0  ;;  %v6107_v0 = vld [vmem:[#allocation5 + $0x33d] ss:$0 sm:$0xff] }
0x1c16   :  { %5069 = vrot.lane.b32.xlu1 %v7835_v33, %s7271_s21 }
0x1c17   :  { %v5043_v61 = vmul.f32 1.442695, %v5037_v2 }
0x1c18   :  { %v5034_v1 = vpop.xlane.xlu0 %5033 }
0x1c19   :  { %v5038_v53 = vsub.f32 %v5022_v43, %v5034_v1 }
0x1c1a   :  { %5156 = vrot.lane.b32.xlu1 %v7845_v3, %s7271_s21 }
0x1c1b   :  { %v5045_v55 = vmul.f32 1.442695, %v5038_v53 }
0x1c1d   :  { %7173 = vpow2.f32 %v5045_v55 }
0x1c1e   :  { %7175 = vpow2.f32 %v5043_v61 }
0x1c2a   :  { %v7174_v54 = vpop.eup %7173 }
0x1c2b   :  { %v5056_v5 = vsel %vm1525_vm4, %v7174_v54, 0.0  ;;  %v7176_v45 = vpop.eup %7175 }
0x1c2c   :  { %5057 = vadd.xlane.f32.xlu0 %v5056_v5  ;;  %v5053_v57 = vsel %vm1525_vm4, %v7176_v45, 0.0 }
0x1c3e   :  { %5054 = vadd.xlane.f32.xlu1 %v5053_v57 }
0x1c42   :  { %5067 = vrot.lane.b32.xlu0 %v7837_v58, %s7271_s21 }
0x1c46   :  { %5245 = vrot.lane.b32.xlu0 %v7973_v15, %s7259_s13 }
0x1c4a   :  { %5261 = vrot.lane.b32.xlu0 %v4741_v19, %s7272_s22  ;;  %v3441_v19 = vld [vmem:[#allocation5 + $0x31d] sm:$0xff] }
0x1c4f   :  { %5154 = vrot.lane.b32.xlu1 %v7847_v4, %s7271_s21 }
0x1c53   :  { %5247 = vrot.lane.b32.xlu1 %v7971_v14, %s7259_s13 }
0x1c57   :  { %5263 = vrot.lane.b32.xlu1 %v6905_v18, %s7272_s22  ;;  %v3442_v18 = vld [vmem:[#allocation5 + $0x325] sm:$0xff] }
0x1c8c   :  { %v5052_v6 = vpop.xlane.xlu0 %5051 }
0x1c8e   :  { %v5049_v33 = vpop.xlane.xlu1 %5048 }
0x1c8f   :  { %7177 = vrcp.f32 %v5049_v33 }
0x1c90   :  { %7179 = vrcp.f32 %v5052_v6 }
0x1c92   :  { %v5070_v3 = vpop.permute.xlu1 %5069 }
0x1c93   :  { %6927 = vmatprep.subr.mxu0 %v5070_v3 }
0x1c94   :  { %6928 = vmatpush3.msra.mxu0 %v5070_v3 }
0x1c96   :  { %v5157_v59 = vpop.permute.xlu1 %5156 }
0x1c97   :  { %6934 = vmatprep.subr.mxu1 %v5157_v59 }
0x1c98   :  { %6935 = vmatpush3.msra.mxu1 %v5157_v59 }
0x1c9c   :  { %v7178_v58 = vpop.eup %7177 }
0x1c9d   :  { %v5060_v15 = vmul.f32 %v7178_v58, %v7172_v60  ;;  %v7180_v12 = vpop.eup %7179 }
0x1c9e   :  { %v5062_v14 = vmul.f32 %v7180_v12, %v7170_v11 }
0x1c9f   :  { %6931 = vmatprep.mubr.msk.f32.mxu0 %vm1525_vm4, %v5060_v15 }
0x1cb5   :  { %v5058_v4 = vpop.xlane.xlu0 %5057 }
0x1cb6   :  { %7181 = vrcp.f32 %v5058_v4 }
0x1cb9   :  { %v5068_v13 = vpop.permute.xlu0 %5067 }
0x1cba   :  { %6929 = vmatprep.subr.mxu0 %v5068_v13 }
0x1cbb   :  { %6930 = vmatpush3.msra.mxu0 %v5068_v13 }
0x1cbc   :  { %6932 = vmatmul.mubr.msk.f32.vlgmr.msra.gmra.mxu0 %vm1525_vm4, %v5062_v14  ;;  %6941 = vmatprep.subr.mxu0 %v3444_v32 }
0x1cbd   :  { %6942 = vmatpush3.msra.mxu0 %v3444_v32  ;;  %v5246_v38 = vpop.permute.xlu0 %5245 }
0x1cbe   :  { %6943 = vmatprep.subr.mxu0 %v3443_v34 }
0x1cbf   :  { %6944 = vmatpush3.msra.mxu0 %v3443_v34  ;;  %v3449_v34 = vld [vmem:[#allocation5 + $0x356] sm:$0xff] }
0x1cc0   :  { %6945 = vmatprep.subr.mxu0 %v3442_v18 }
0x1cc1   :  { %6946 = vmatpush3.msra.mxu0 %v3442_v18  ;;  %v5262_v41 = vpop.permute.xlu0 %5261  ;;  %v3448_v18 = vld [vmem:[#allocation5 + $0x34e] sm:$0xff] }
0x1cc2   :  { %6947 = vmatprep.subr.mxu0 %v3441_v19 }
0x1cc3   :  { %v7182_v24 = vpop.eup %7181  ;;  %6948 = vmatpush3.msra.mxu0 %v3441_v19 }
0x1cc4   :  { %v5066_v27 = vmul.f32 %v7182_v24, %v7174_v54 }
0x1cc7   :  { %v5055_v22 = vpop.xlane.xlu1 %5054 }
0x1cc8   :  { %7183 = vrcp.f32 %v5055_v22 }
0x1ccb   :  { %v5155_v23 = vpop.permute.xlu1 %5154 }
0x1ccc   :  { %6936 = vmatprep.subr.mxu1 %v5155_v23 }
0x1ccd   :  { %6937 = vmatpush3.msra.mxu1 %v5155_v23 }
0x1cce   :  { %6955 = vmatprep.subr.mxu1 %v3449_v34 }
0x1ccf   :  { %v5248_v37 = vpop.permute.xlu1 %5247 }
0x1cd3   :  { %v5264_v40 = vpop.permute.xlu1 %5263 }
0x1cd5   :  { %v7184_v25 = vpop.eup %7183 }
0x1cd6   :  { %v5064_v26 = vmul.f32 %v7184_v25, %v7176_v45 }
0x1cd8   :  { %6938 = vmatprep.mubr.msk.f32.mxu1 %vm1525_vm4, %v5064_v26 }
0x1cd9   :  { %6939 = vmatmul.mubr.msk.f32.vlgmr.msra.gmra.mxu1 %vm1525_vm4, %v5066_v27 }
0x1cda   :  { %6956 = vmatpush3.msra.mxu1 %v3449_v34 }
0x1cdb   :  { %6957 = vmatprep.subr.mxu1 %v3448_v18 }
0x1cdc   :  { %6958 = vmatpush3.msra.mxu1 %v3448_v18 }
0x1d7c   :  { %v6933_v30 = vpop.f32.mrf.mxu0 }
0x1d7d   :  { %5279 = vrot.lane.b32.xlu1 %v6933_v30, %s7273_s23 }
0x1d7e   :  { %v5145_v31 = vpop.f32.mrf.mxu0 }
0x1d7f   :  { %5277 = vrot.lane.b32.xlu0 %v5145_v31, %s7273_s23  ;;  %v3447_v31 = vld [vmem:[#allocation5 + $0x346] sm:$0xff] }
0x1d80   :  { %6959 = vmatprep.subr.mxu1 %v3447_v31 }
0x1d81   :  { %5251 = vrot.lane.b32.xlu1 %v7977_v28, %s7259_s13  ;;  %v5289_v28 = vsel %vm1348_vm3, %v7919_v17, %v5246_v38  ;;  %6960 = vmatpush3.msra.mxu1 %v3447_v31 }
0x1d82   :  { %v5293_v42 = vsel %vm1525_vm4, %v5289_v28, %v5262_v41 }
0x1d83   :  { %5249 = vrot.lane.b32.xlu0 %v7979_v29, %s7259_s13  ;;  %s7277_s13 = smov [#allocation8]  }
0x1d84   :  { %s5935_s24 = sshll.u32 %s7277_s13, 4  ;;  %s5936_s24 = int_to_ptr.vmem [resolvable:$true] %s5935_s24 }
0x1d85   :  { %5267 = vrot.lane.b32.xlu1 %v8029_v39, %s7272_s22  ;;  %v5290_v39 = vsel %vm1348_vm3, %v7917_v16, %v5248_v37  ;;  %s7233_s25 = scalar_lea.vmem %s5936_s24, 32  ;;  %p7238_p6 = scmp.lt.s32.totalorder %s5936_s24, %s5936_s24 }
0x1d86   :  { %v5294_v43 = vsel %vm1525_vm4, %v5290_v39, %v5264_v40  ;;  %p7234_p5 = scmp.ne.s32.totalorder %s5936_s24, %s7233_s25  ;;  %p7239_p7 = scmp.lt.s32.totalorder %s7233_s25, %s7233_s25 }
0x1d87   :  { %5265 = vrot.lane.b32.xlu0 %v8031_v9, %s7272_s22 }
0x1d88   :  { %p7240_p8 = por %p7239_p7, %p7238_p6 }
0x1d8a   :  { %p7241_p9 = pnand %p7240_p8, %p7234_p5 }
0x1d99   :  { %v6940_v35 = vpop.f32.mrf.mxu1 }
0x1d9a   :  { %5283 = vrot.lane.b32.xlu1 %v6940_v35, %s7273_s23 }
0x1d9b   :  { %v5232_v36 = vpop.f32.mrf.mxu1 }
0x1d9c   :  { %5281 = vrot.lane.b32.xlu0 %v5232_v36, %s7273_s23  ;;  %v3446_v36 = vld [vmem:[#allocation5 + $0x33e] sm:$0xff] }
0x1d9d   :  { %6961 = vmatprep.subr.mxu1 %v3446_v36 }
0x1d9e   :  { %6962 = vmatpush3.msra.mxu1 %v3446_v36 }
0x1def   :  { %v5280_v29 = vpop.permute.xlu1 %5279 }
0x1df0   :  { %v5298_v44 = vsel %vm3012_vm5, %v5294_v43, %v5280_v29  ;;  %v6112_v43 = vld [vmem:[#allocation5 + $0x2fa] ss:$0 sm:$0xff] }
0x1df1   :  { %v5278_v9 = vpop.permute.xlu0 %5277 }
0x1df2   :  { %v5297_v8 = vsel %vm3012_vm5, %v5293_v42, %v5278_v9 }
0x1df3   :  { %6949 = vmatprep.mubr.msk.f32.mxu0 %vm1171_vm2, %v5297_v8  ;;  %v5252_v46 = vpop.permute.xlu1 %5251 }
0x1df4   :  { %6950 = vmatmul.mubr.msk.f32.vlgmr.msra.gmra.mxu0 %vm1171_vm2, %v5298_v44  ;;  %v5292_v16 = vsel %vm1348_vm3, %v7921_v20, %v5252_v46 }
0x1df5   :  { %v5250_v47 = vpop.permute.xlu0 %5249 }
0x1df6   :  { %v5291_v49 = vsel %vm1348_vm3, %v7923_v21, %v5250_v47  ;;  %v6113_v47 = vld [vmem:[#allocation5 + $0x2fb] ss:$0 sm:$0xff] }
0x1df7   :  { %v5268_v17 = vpop.permute.xlu1 %5267 }
0x1df8   :  { %v5296_v52 = vsel %vm1525_vm4, %v5292_v16, %v5268_v17 }
0x1df9   :  { %v5266_v48 = vpop.permute.xlu0 %5265 }
0x1dfa   :  { %v5295_v51 = vsel %vm1525_vm4, %v5291_v49, %v5266_v48 }
0x1e0c   :  { %v5284_v50 = vpop.permute.xlu1 %5283 }
0x1e0d   :  { %v5300_v63 = vsel %vm3012_vm5, %v5296_v52, %v5284_v50 }
0x1e0e   :  { %v5282_v11 = vpop.permute.xlu0 %5281 }
0x1e0f   :  { %v5299_v60 = vsel %vm3012_vm5, %v5295_v51, %v5282_v11 }
0x1e10   :  { %6952 = vmatprep.mubr.msk.f32.mxu0 %vm1171_vm2, %v5299_v60 }
0x1e11   :  { %6953 = vmatmul.mubr.msk.f32.gmra.mxu0 %vm1171_vm2, %v5300_v63 }
0x1eb4   :  { %v6951_v1 = vpop.f32.mrf.mxu0 }
0x1eb5   :  { %v5389_v21 = vadd.f32 %v6951_v1, %v6107_v0 }
0x1eb6   :  { %v5383_v53 = vpop.f32.mrf.mxu0 }
0x1eb7   :  { %v8090_v55 = vadd.f32 %v5389_v21, %v7804_v10  ;;  %v5384_v20 = vadd.f32 %v6107_v0, %v5383_v53 }
0x1eb9   :  { %v8093_v2 = vadd.f32 %v5384_v20, %v7807_v62  ;;  %v5409_v61 = vsel %vm1171_vm2, %v8090_v55, 0.0 }
0x1eba   :  { %5410 = vadd.xlane.f32.xlu1 %v5409_v61 }
0x1ebb   :  { %v5406_v54 = vsel %vm1171_vm2, %v8093_v2, 0.0 }
0x1ebc   :  { %5407 = vadd.xlane.f32.xlu0 %v5406_v54 }
0x1ed1   :  { %v6954_v5 = vpop.f32.mrf.mxu0 }
0x1ed2   :  { %v5399_v57 = vadd.f32 %v6954_v5, %v6107_v0  ;;  %v3458_v5 = vld [vmem:[#allocation5 + $0x397] sm:$0xff] }
0x1ed3   :  { %v5393_v45 = vpop.f32.mrf.mxu0  ;;  %6969 = vmatprep.subr.mxu0 %v3458_v5 }
0x1ed4   :  { %v5394_v33 = vadd.f32 %v6107_v0, %v5393_v45  ;;  %v8103_v10 = vadd.f32 %v5399_v57, %v7814_v56  ;;  %6970 = vmatpush3.msra.mxu0 %v3458_v5  ;;  %v3457_v45 = vld [vmem:[#allocation5 + $0x38f] sm:$0xff]  ;;  %v3456_v57 = vld [vmem:[#allocation5 + $0x387] sm:$0xff] }
0x1ed5   :  { %6971 = vmatprep.subr.mxu0 %v3457_v45 }
0x1ed6   :  { %v8100_v3 = vadd.f32 %v5394_v33, %v7817_v7  ;;  %v5415_v59 = vsel %vm1171_vm2, %v8103_v10, 0.0  ;;  %6972 = vmatpush3.msra.mxu0 %v3457_v45  ;;  %v3455_v33 = vld [vmem:[#allocation5 + $0x37f] sm:$0xff] }
0x1ed7   :  { %6973 = vmatprep.subr.mxu0 %v3456_v57 }
0x1ed8   :  { %v5412_v62 = vsel %vm1171_vm2, %v8100_v3, 0.0  ;;  %6974 = vmatpush3.msra.mxu0 %v3456_v57 }
0x1ed9   :  { %5413 = vadd.xlane.f32.xlu0 %v5412_v62  ;;  %v3454_v62 = vld [vmem:[#allocation5 + $0x377] sm:$0xff]  ;;  %6975 = vmatprep.subr.mxu0 %v3455_v33 }
0x1eda   :  { %6976 = vmatpush3.msra.mxu0 %v3455_v33 }
0x1edb   :  { %6977 = vmatprep.subr.mxu0 %v3454_v62 }
0x1edc   :  { %6978 = vmatpush3.msra.mxu0 %v3454_v62 }
0x1edd   :  { %5416 = vadd.xlane.f32.xlu0 %v5415_v59  ;;  %v3453_v59 = vld [vmem:[#allocation5 + $0x36f] sm:$0xff] }
0x1ede   :  { %6979 = vmatprep.subr.mxu0 %v3453_v59 }
0x1edf   :  { %6980 = vmatpush3.msra.mxu0 %v3453_v59 }
0x1f43   :  { %v5411_v58 = vpop.xlane.xlu1 %5410 }
0x1f44   :  { %v5419_v15 = vmul.f32 0.03125, %v5411_v58  ;;  %v3452_v58 = vld [vmem:[#allocation5 + $0x367] sm:$0xff] }
0x1f45   :  { %v5408_v6 = vpop.xlane.xlu0 %5407  ;;  %6981 = vmatprep.subr.mxu0 %v3452_v58 }
0x1f46   :  { %v5423_v4 = vsub.f32 %v8090_v55, %v5419_v15  ;;  %v5418_v12 = vmul.f32 0.03125, %v5408_v6  ;;  %v3451_v15 = vld [vmem:[#allocation5 + $0x35f] sm:$0xff]  ;;  %6982 = vmatpush3.msra.mxu0 %v3452_v58  ;;  %v6114_v6 = vld [vmem:[#allocation5 + $0x35e] ss:$0 sm:$0xff] }
0x1f47   :  { %6983 = vmatprep.subr.mxu0 %v3451_v15 }
0x1f48   :  { %v5422_v7 = vsub.f32 %v8093_v2, %v5418_v12  ;;  %v5427_v13 = vmul.f32 %v5423_v4, %v5423_v4  ;;  %6984 = vmatpush3.msra.mxu0 %v3451_v15 }
0x1f4a   :  { %v5433_v56 = vsel %vm1171_vm2, %v5427_v13, 0.0  ;;  %v5426_v14 = vmul.f32 %v5422_v7, %v5422_v7 }
0x1f4b   :  { %5434 = vadd.xlane.f32.xlu0 %v5433_v56 }
0x1f4c   :  { %v5430_v22 = vsel %vm1171_vm2, %v5426_v14, 0.0 }
0x1f4d   :  { %5431 = vadd.xlane.f32.xlu1 %v5430_v22 }
0x1f62   :  { %v5414_v23 = vpop.xlane.xlu0 %5413 }
0x1f63   :  { %v5420_v24 = vmul.f32 0.03125, %v5414_v23 }
0x1f65   :  { %v5424_v25 = vsub.f32 %v8100_v3, %v5420_v24 }
0x1f66   :  { %v5417_v26 = vpop.xlane.xlu0 %5416 }
0x1f67   :  { %v5421_v27 = vmul.f32 0.03125, %v5417_v26  ;;  %v5428_v32 = vmul.f32 %v5424_v25, %v5424_v25 }
0x1f69   :  { %v5425_v19 = vsub.f32 %v8103_v10, %v5421_v27  ;;  %v5436_v30 = vsel %vm1171_vm2, %v5428_v32, 0.0 }
0x1f6a   :  { %5437 = vadd.xlane.f32.xlu1 %v5436_v30 }
0x1f6b   :  { %v5429_v35 = vmul.f32 %v5425_v19, %v5425_v19 }
0x1f6d   :  { %v5439_v37 = vsel %vm1171_vm2, %v5429_v35, 0.0 }
0x1f6e   :  { %5440 = vadd.xlane.f32.xlu0 %v5439_v37 }
0x1fd4   :  { %v5435_v38 = vpop.xlane.xlu0 %5434 }
0x1fd5   :  { %v5443_v40 = vmul.f32 0.03125, %v5435_v38 }
0x1fd6   :  { %v5432_v41 = vpop.xlane.xlu1 %5431 }
0x1fd7   :  { %v5447_v28 = vadd.f32 1e-05, %v5443_v40  ;;  %v5442_v29 = vmul.f32 0.03125, %v5432_v41 }
0x1fd9   :  { %7185 = vrsqrt.f32 %v5447_v28  ;;  %v5446_v42 = vadd.f32 1e-05, %v5442_v29 }
0x1fdb   :  { %7187 = vrsqrt.f32 %v5446_v42 }
0x1fe6   :  { %v7186_v39 = vpop.eup %7185 }
0x1fe7   :  { %v5455_v9 = vmul.f32 %v7186_v39, %v5423_v4 }
0x1fe8   :  { %v7188_v8 = vpop.eup %7187 }
0x1fe9   :  { %v5454_v44 = vmul.f32 %v7188_v8, %v5422_v7  ;;  %v5463_v46 = vmul.f32 %v6112_v43, %v5455_v9 }
0x1feb   :  { %v5462_v17 = vmul.f32 %v6112_v43, %v5454_v44  ;;  %v5471_v49 = vadd.f32 %v6113_v47, %v5463_v46 }
0x1fed   :  { %v5470_v48 = vadd.f32 %v6113_v47, %v5462_v17 }
0x1fef   :  { %6963 = vmatprep.mubr.msk.f32.mxu1 %vm1171_vm2, %v5470_v48 }
0x1ff0   :  { %6964 = vmatmul.mubr.msk.f32.vlgmr.msra.gmra.mxu1 %vm1171_vm2, %v5471_v49 }
0x1ff3   :  { %v5438_v50 = vpop.xlane.xlu1 %5437 }
0x1ff4   :  { %v5444_v16 = vmul.f32 0.03125, %v5438_v50 }
0x1ff6   :  { %v5448_v51 = vadd.f32 1e-05, %v5444_v16 }
0x1ff7   :  { %v5441_v11 = vpop.xlane.xlu0 %5440 }
0x1ff8   :  { %7189 = vrsqrt.f32 %v5448_v51  ;;  %v5445_v52 = vmul.f32 0.03125, %v5441_v11 }
0x1ffa   :  { %v5449_v60 = vadd.f32 1e-05, %v5445_v52 }
0x1ffc   :  { %7191 = vrsqrt.f32 %v5449_v60 }
0x2005   :  { %v7190_v63 = vpop.eup %7189 }
0x2006   :  { %v5456_v0 = vmul.f32 %v7190_v63, %v5424_v25 }
0x2008   :  { %v5464_v1 = vmul.f32 %v6112_v43, %v5456_v0  ;;  %v6119_v0 = vld [vmem:[#allocation5 + $0x39f] ss:$0 sm:$0xff] }
0x2009   :  { %v7192_v21 = vpop.eup %7191 }
0x200a   :  { %v5472_v53 = vadd.f32 %v6113_v47, %v5464_v1  ;;  %v5457_v20 = vmul.f32 %v7192_v21, %v5425_v19 }
0x200c   :  { %6966 = vmatprep.mubr.msk.f32.mxu1 %vm1171_vm2, %v5472_v53  ;;  %v5465_v61 = vmul.f32 %v6112_v43, %v5457_v20  ;;  %v6124_v20 = vld [vmem:[#allocation5 + $0x3a0] ss:$0 sm:$0xff] }
0x200e   :  { %v5473_v54 = vadd.f32 %v6113_v47, %v5465_v61 }
0x2010   :  { %6967 = vmatmul.mubr.msk.f32.gmra.mxu1 %vm1171_vm2, %v5473_v54 }
0x20b0   :  { %v6965_v4 = vpop.f32.mrf.mxu1 }
0x20b1   :  { %v5562_v12 = vadd.f32 %v6965_v4, %v6114_v6 }
0x20b2   :  { %v5556_v7 = vpop.f32.mrf.mxu1 }
0x20b3   :  { %v5580_v13 = vmul.f32 0.044715, %v5562_v12  ;;  %v5557_v56 = vadd.f32 %v6114_v6, %v5556_v7  ;;  %v5576_v36 = vmul.f32 0.5, %v5562_v12 }
0x20b5   :  { %v5584_v14 = vmul.f32 %v5580_v13, %v5562_v12  ;;  %v5579_v22 = vmul.f32 0.044715, %v5557_v56  ;;  %v5575_v31 = vmul.f32 0.5, %v5557_v56 }
0x20b7   :  { %v5588_v23 = vmul.f32 %v5584_v14, %v5562_v12  ;;  %v5583_v24 = vmul.f32 %v5579_v22, %v5557_v56  ;;  %v6125_v14 = vld [vmem:[#allocation5 + $0x3a1] ss:$0 sm:$0xff] }
0x20b9   :  { %v5592_v25 = vadd.f32 %v5588_v23, %v5562_v12  ;;  %v5587_v26 = vmul.f32 %v5583_v24, %v5557_v56 }
0x20bb   :  { %v5596_v27 = vmul.f32 0.7978846, %v5592_v25  ;;  %v5591_v32 = vadd.f32 %v5587_v26, %v5557_v56  ;;  %v7274_v56 = vmov 0  }
0x20bc   :  { %7024 = vset.pattern.permute.xlu0 %v7274_v56  ;;  %7023 = vset.pattern.permute.xlu1 %v7274_v56 }
0x20bd   :  { %7193 = vtanh.f32 %v5596_v27  ;;  %v5595_v34 = vmul.f32 0.7978846, %v5591_v32 }
0x20bf   :  { %7195 = vtanh.f32 %v5595_v34 }
0x20ca   :  { %v7194_v18 = vpop.eup %7193 }
0x20cb   :  { %v5604_v30 = vadd.f32 1.0, %v7194_v18 }
0x20cc   :  { %v7196_v19 = vpop.eup %7195 }
0x20cd   :  { %v5603_v35 = vadd.f32 1.0, %v7196_v19  ;;  %v5608_v38 = vmul.f32 %v5604_v30, %v5576_v36 }
0x20cf   :  { %v5607_v37 = vmul.f32 %v5603_v35, %v5575_v31 }
0x20d0   :  { %v6968_v40 = vpop.f32.mrf.mxu1 }
0x20d1   :  { %v5572_v41 = vadd.f32 %v6968_v40, %v6114_v6  ;;  %6985 = vmatprep.mubr.msk.f32.mxu0 %vm54_vm0, %v5607_v37 }
0x20d2   :  { %6986 = vmatmul.mubr.msk.f32.vlgmr.msra.gmra.mxu0 %vm54_vm0, %v5608_v38  ;;  %v5566_v28 = vpop.f32.mrf.mxu1 }
0x20d3   :  { %v5582_v29 = vmul.f32 0.044715, %v5572_v41  ;;  %v5567_v42 = vadd.f32 %v6114_v6, %v5566_v28  ;;  %v5578_v52 = vmul.f32 0.5, %v5572_v41 }
0x20d5   :  { %v5586_v39 = vmul.f32 %v5582_v29, %v5572_v41  ;;  %v5581_v9 = vmul.f32 0.044715, %v5567_v42  ;;  %v5577_v51 = vmul.f32 0.5, %v5567_v42 }
0x20d7   :  { %v5590_v43 = vmul.f32 %v5586_v39, %v5572_v41  ;;  %v5585_v8 = vmul.f32 %v5581_v9, %v5567_v42 }
0x20d9   :  { %v5594_v44 = vadd.f32 %v5590_v43, %v5572_v41  ;;  %v5589_v46 = vmul.f32 %v5585_v8, %v5567_v42 }
0x20db   :  { %v5593_v47 = vadd.f32 %v5589_v46, %v5567_v42  ;;  %v5598_v17 = vmul.f32 0.7978846, %v5594_v44 }
0x20dd   :  { %v5597_v48 = vmul.f32 0.7978846, %v5593_v47  ;;  %7197 = vtanh.f32 %v5598_v17 }
0x20df   :  { %7199 = vtanh.f32 %v5597_v48 }
0x20ea   :  { %v7198_v49 = vpop.eup %7197 }
0x20eb   :  { %v5606_v16 = vadd.f32 1.0, %v7198_v49 }
0x20ec   :  { %v7200_v50 = vpop.eup %7199 }
0x20ed   :  { %v5605_v11 = vadd.f32 1.0, %v7200_v50  ;;  %v5610_v63 = vmul.f32 %v5606_v16, %v5578_v52 }
0x20ef   :  { %v5609_v60 = vmul.f32 %v5605_v11, %v5577_v51 }
0x20f1   :  { %6988 = vmatprep.mubr.msk.f32.mxu0 %vm54_vm0, %v5609_v60 }
0x20f2   :  { %6989 = vmatmul.mubr.msk.f32.gmra.mxu0 %vm54_vm0, %v5610_v63 }
0x2192   :  { %v6987_v1 = vpop.f32.mrf.mxu0 }
0x2193   :  { %v5699_v21 = vadd.f32 %v6987_v1, %v6119_v0 }
0x2194   :  { %v5693_v53 = vpop.f32.mrf.mxu0 }
0x2195   :  { %v8126_v61 = vadd.f32 %v5699_v21, %v8090_v55  ;;  %v5694_v54 = vadd.f32 %v6119_v0, %v5693_v53 }
0x2197   :  { %v8129_v5 = vadd.f32 %v5694_v54, %v8093_v2  ;;  %v5728_v45 = vmul.f32 %v6124_v20, %v8126_v61 }
0x2199   :  { %v5734_v57 = vsel %vm1171_vm2, %v5728_v45, 0.0  ;;  %v5727_v33 = vmul.f32 %v6124_v20, %v8129_v5 }
0x219a   :  { %5735 = vadd.xlane.f32.xlu0 %v5734_v57 }
0x219b   :  { %v5731_v62 = vsel %vm1171_vm2, %v5727_v33, 0.0 }
0x219c   :  { %5732 = vadd.xlane.f32.xlu1 %v5731_v62 }
0x21b2   :  { %v6990_v59 = vpop.f32.mrf.mxu0 }
0x21b3   :  { %v5709_v58 = vadd.f32 %v6990_v59, %v6119_v0 }
0x21b4   :  { %v5703_v15 = vpop.f32.mrf.mxu0 }
0x21b5   :  { %v8136_v55 = vadd.f32 %v5709_v58, %v8103_v10  ;;  %v5704_v6 = vadd.f32 %v6119_v0, %v5703_v15 }
0x21b7   :  { %v8139_v2 = vadd.f32 %v5704_v6, %v8100_v3  ;;  %v5730_v4 = vmul.f32 %v6124_v20, %v8136_v55 }
0x21b9   :  { %v5740_v12 = vsel %vm1171_vm2, %v5730_v4, 0.0  ;;  %v5729_v7 = vmul.f32 %v6124_v20, %v8139_v2 }
0x21ba   :  { %5741 = vadd.xlane.f32.xlu0 %v5740_v12 }
0x21bb   :  { %v5737_v13 = vsel %vm1171_vm2, %v5729_v7, 0.0 }
0x21bc   :  { %5738 = vadd.xlane.f32.xlu1 %v5737_v13 }
0x2223   :  { %v5736_v10 = vpop.xlane.xlu0 %5735 }
0x2224   :  { %v5748_v22 = vadd.f32 %v6125_v14, %v5736_v10 }
0x2225   :  { %v5733_v23 = vpop.xlane.xlu1 %5732 }
0x2226   :  { %v5747_v3 = vadd.f32 %v6125_v14, %v5733_v23  ;;  %v5753_v24 = vsel %vm5751_vm6, %v5748_v22, -inf  ;;  %v5721_v23 = vld [vmem:[#allocation5 + $0x3ba] sm:$0xff] }
0x2228   :  { %v5752_v25 = vsel %vm5751_vm6, %v5747_v3, -inf }
0x2229   :  { %v5754_v26 = vmax.f32 %v5752_v25, %v5753_v24  ;;  %v5720_v24 = vld [vmem:[#allocation5 + $0x3b2] sm:$0xff]  ;;  %v5719_v25 = vld [vmem:[#allocation5 + $0x3aa] sm:$0xff] }
0x222b   :  { %v5755_v27 = vrot.slane %v5754_v26, 4 }
0x222d   :  { %v5756_v32 = vmax.f32 %v5754_v26, %v5755_v27  ;;  %v5718_v26 = vld [vmem:[#allocation5 + $0x3a2] sm:$0xff] }
0x222f   :  { %v5757_v34 = vrot.slane %v5756_v32, 2 }
0x2231   :  { %v5758_v18 = vmax.f32 %v5756_v32, %v5757_v34 }
0x2233   :  { %v5759_v19 = vrot.slane %v5758_v18, 1 }
0x2235   :  { %v5760_v30 = vmax.f32 %v5758_v18, %v5759_v19 }
0x2237   :  { %v5770_v31 = vsub.f32 %v5747_v3, %v5760_v30  ;;  %v5771_v35 = vsub.f32 %v5748_v22, %v5760_v30  ;;  %v7275_v3 = vmov 0.0  }
0x2238   :  { %6991 = vmatprep.subr.mxu1 %v7275_v3  ;;  %6999 = vmatprep.mubr.msk.f32.mxu1 %vm7276_vm7, %v7275_v3 }
0x2239   :  { %v5774_v36 = vmul.f32 1.442695, %v5770_v31  ;;  %v5776_v37 = vmul.f32 1.442695, %v5771_v35  ;;  %6992 = vmatpush3.msra.mxu1 %v5721_v23 }
0x223a   :  { %6993 = vmatprep.subr.mxu1 %v7275_v3 }
0x223b   :  { %7201 = vpow2.f32 %v5774_v36  ;;  %6994 = vmatpush3.msra.mxu1 %v5720_v24 }
0x223c   :  { %7203 = vpow2.f32 %v5776_v37  ;;  %6995 = vmatprep.subr.mxu1 %v7275_v3 }
0x223d   :  { %6996 = vmatpush3.msra.mxu1 %v5719_v25 }
0x223e   :  { %6997 = vmatprep.subr.mxu1 %v7275_v3 }
0x223f   :  { %6998 = vmatpush3.msra.mxu1 %v5718_v26 }
0x2243   :  { %v5742_v38 = vpop.xlane.xlu0 %5741 }
0x2244   :  { %v5750_v40 = vadd.f32 %v6125_v14, %v5742_v38 }
0x2245   :  { %v5739_v41 = vpop.xlane.xlu1 %5738 }
0x2246   :  { %v5749_v28 = vadd.f32 %v6125_v14, %v5739_v41  ;;  %v5762_v42 = vsel %vm5751_vm6, %v5750_v40, -inf }
0x2248   :  { %v7202_v29 = vpop.eup %7201  ;;  %v5761_v39 = vsel %vm5751_vm6, %v5749_v28, -inf }
0x2249   :  { %v7204_v9 = vpop.eup %7203  ;;  %v5782_v43 = vsel %vm5751_vm6, %v7202_v29, 0.0  ;;  %v5763_v8 = vmax.f32 %v5761_v39, %v5762_v42 }
0x224a   :  { %v5783_v44 = vsel %vm5751_vm6, %v7204_v9, 0.0 }
0x224b   :  { %v5784_v46 = vadd.f32 %v5783_v44, %v5782_v43  ;;  %v5764_v47 = vrot.slane %v5763_v8, 4 }
0x224d   :  { %v5785_v17 = vrot.slane %v5784_v46, 4  ;;  %v5765_v48 = vmax.f32 %v5763_v8, %v5764_v47 }
0x224f   :  { %v5786_v49 = vadd.f32 %v5785_v17, %v5784_v46  ;;  %v5766_v50 = vrot.slane %v5765_v48, 2 }
0x2251   :  { %v5787_v16 = vrot.slane %v5786_v49, 2  ;;  %v5767_v51 = vmax.f32 %v5765_v48, %v5766_v50 }
0x2253   :  { %v5788_v11 = vadd.f32 %v5787_v16, %v5786_v49  ;;  %v5768_v52 = vrot.slane %v5767_v51, 1 }
0x2255   :  { %v5769_v60 = vmax.f32 %v5767_v51, %v5768_v52  ;;  %v5789_v63 = vrot.slane %v5788_v11, 1 }
0x2257   :  { %v5772_v0 = vsub.f32 %v5749_v28, %v5769_v60  ;;  %v5773_v1 = vsub.f32 %v5750_v40, %v5769_v60  ;;  %v5790_v21 = vadd.f32 %v5789_v63, %v5788_v11 }
0x2259   :  { %v5778_v53 = vmul.f32 1.442695, %v5772_v0  ;;  %v5780_v20 = vmul.f32 1.442695, %v5773_v1  ;;  %7205 = vrcp.f32 %v5790_v21 }
0x225b   :  { %7207 = vpow2.f32 %v5778_v53 }
0x225c   :  { %7209 = vpow2.f32 %v5780_v20 }
0x2266   :  { %v7206_v54 = vpop.eup %7205 }
0x2267   :  { %v5802_v45 = vmul.f32 %v7206_v54, %v7204_v9  ;;  %v5801_v57 = vmul.f32 %v7206_v54, %v7202_v29 }
0x2268   :  { %v7208_v33 = vpop.eup %7207 }
0x2269   :  { %v7210_v62 = vpop.eup %7209  ;;  %v5791_v59 = vsel %vm5751_vm6, %v7208_v33, 0.0  ;;  %5813 = vperm.xlu0 %7024, %v5802_v45   ;;  %5808 = vperm.xlu1 %7023, %v5801_v57  }
0x226a   :  { %v5792_v58 = vsel %vm5751_vm6, %v7210_v62, 0.0 }
0x226b   :  { %v5793_v15 = vadd.f32 %v5792_v58, %v5791_v59 }
0x226d   :  { %v5794_v6 = vrot.slane %v5793_v15, 4 }
0x226f   :  { %v5795_v4 = vadd.f32 %v5794_v6, %v5793_v15 }
0x2271   :  { %v5796_v12 = vrot.slane %v5795_v4, 2 }
0x2273   :  { %v5797_v7 = vadd.f32 %v5796_v12, %v5795_v4 }
0x2275   :  { %v5798_v13 = vrot.slane %v5797_v7, 1 }
0x2277   :  { %v5799_v56 = vadd.f32 %v5798_v13, %v5797_v7 }
0x2279   :  { %7211 = vrcp.f32 %v5799_v56 }
0x2286   :  { %v7212_v14 = vpop.eup %7211 }
0x2287   :  { %v5804_v10 = vmul.f32 %v7212_v14, %v7208_v33  ;;  %v5805_v22 = vmul.f32 %v7212_v14, %v7210_v62 }
0x2289   :  { %5818 = vperm.xlu1 %7023, %v5804_v10  }
0x228d   :  { %5823 = vperm.xlu1 %7023, %v5805_v22  }
0x22e4   :  { %v5809_v27 = vpop.permute.xlu1 %5808  ;;  %v5814_v32 = vpop.permute.xlu0 %5813 }
0x22e5   :  { %v5826_v34 = vmul.f32 %v5809_v27, %v8129_v5  ;;  %v5827_v18 = vmul.f32 %v5814_v32, %v8126_v61 }
0x22e7   :  { %v5830_v19 = vsel %vm1171_vm2, %v5826_v34, 0.0  ;;  %v5831_v30 = vsel %vm1171_vm2, %v5827_v18, 0.0 }
0x22e8   :  { %v5832_v31 = vadd.f32 %v5831_v30, %v5830_v19 }
0x22ea   :  { %v5833_v35 = vrot.slane %v5832_v31, 4 }
0x22ec   :  { %v5834_v38 = vadd.f32 %v5833_v35, %v5832_v31 }
0x22ee   :  { %v5835_v5 = vrot.slane %v5834_v38, 2 }
0x22f0   :  { %v5836_v39 = vadd.f32 %v5835_v5, %v5834_v38 }
0x22f2   :  { %v5837_v8 = vrot.slane %v5836_v39, 1 }
0x22f4   :  { %v5838_v47 = vadd.f32 %v5837_v8, %v5836_v39 }
0x2304   :  { %v5819_v36 = vpop.permute.xlu1 %5818 }
0x2305   :  { %v5828_v37 = vmul.f32 %v5819_v36, %v8139_v2 }
0x2307   :  { %v5839_v28 = vsel %vm1171_vm2, %v5828_v37, 0.0 }
0x2308   :  { %v5824_v40 = vpop.permute.xlu1 %5823 }
0x2309   :  { %v5829_v41 = vmul.f32 %v5824_v40, %v8136_v55  ;;  %v6126_v55 = vld [vmem:[#allocation5 + $0x3c2] ss:$0 sm:$0xff] }
0x230b   :  { %v5840_v29 = vsel %vm1171_vm2, %v5829_v41, 0.0 }
0x230c   :  { %v5841_v42 = vadd.f32 %v5840_v29, %v5839_v28 }
0x230e   :  { %v5842_v61 = vrot.slane %v5841_v42, 4 }
0x2310   :  { %v5843_v9 = vadd.f32 %v5842_v61, %v5841_v42 }
0x2312   :  { %v5844_v43 = vrot.slane %v5843_v9, 2 }
0x2314   :  { %v5845_v44 = vadd.f32 %v5844_v43, %v5843_v9 }
0x2316   :  { %v5846_v46 = vrot.slane %v5845_v44, 1 }
0x2318   :  { %v5847_v2 = vadd.f32 %v5846_v46, %v5845_v44 }
0x231a   :  { %v5855_v17 = vsel %vm5854_vm8, %v5847_v2, %v5838_v47 }
0x231b   :  { %7000 = vmatmul.mubr.msk.f32.vlgmr.msra.gmra.mxu1 %vm1171_vm2, %v5855_v17 }
0x23db   :  { %v5924_v48 = vpop.f32.mrf.mxu1 }
0x23dc   :  { %v5925_v49 = vadd.f32 %v6126_v55, %v5924_v48 }
0x23dd   :  { %v7001_v50 = vpop.f32.mrf.mxu1 }
0x23de   :  { %5928 = vst [vmem:[#allocation8] sm:$0x3] %v5925_v49 }
0x23df   :  { %7244 = shalt.err (!%p7241_p9)
}
0x23e0   :  { %5938 = dma.vmem_to_hbm [thread:$0]  %s5936_s24, 32, %s8167_s2, [#allocation7]  }
0x23e1   :  { %7255 = dma.done.wait [#allocation7], 32  }
0x23e2   :  { %7256 = vsyncadd [#allocation7], 4294967264 }
0x23e3   :  { %5942 = vsyncpa [#allocation6], 1 }
0x23e4   :  { %5943 = vsyncpa [#allocation7], 1 }

</bundles_post_ra>
